<compile_context>
chip_gen: v7x
topology: tpu7x:2x2x1
jax: 0.10.0
libtpu: 0.0.40
codegen_flags: <defaults>
</compile_context>

<pallas_src>
import functools

import jax
import jax.numpy as jnp
from jax.experimental import pallas as pl
from jax.experimental.pallas import tpu as pltpu


def _conv_bn_leaky_kernel(x_ref, w_ref, shift_ref, o_ref, *,
                          kh_kw, stride, tile_ho, wo):
    """One (batch_elem, output-row-tile) grid step.

    x_ref:     (1, Hp, Wp, C_in)         bf16 zero-padded NHWC image (resident per batch)
    w_ref:     (KH*KW, C_in, C_out_pad)  bf16 weight taps, BN scale folded in
    shift_ref: (1, C_out_pad)            f32 folded BN shift
    o_ref:     (1, tile_ho, Wo, C_out_pad)
    """
    i = pl.program_id(1)
    c_in = x_ref.shape[-1]
    c_out = o_ref.shape[-1]
    row0 = pl.multiple_of(i * (tile_ho * stride), tile_ho * stride)

    acc = jnp.zeros((tile_ho * wo, c_out), jnp.float32)
    for t, (kh, kw) in enumerate(kh_kw):          # static unroll over KH*KW taps
        if stride == 1:
            patch = x_ref[0, pl.ds(row0 + kh, tile_ho), pl.ds(kw, wo), :]
        else:
            patch = x_ref[0, pl.ds(row0 + kh, tile_ho, stride),
                          pl.ds(kw, wo, stride), :]
        patch = patch.reshape(tile_ho * wo, c_in)
        acc = acc + jnp.dot(patch, w_ref[t], preferred_element_type=jnp.float32)

    y = acc + shift_ref[...]                      # folded BN shift (scale is in weights)
    y = jnp.where(y >= 0.0, y, 0.1 * y)           # LeakyReLU(0.1)
    o_ref[...] = y.reshape(1, tile_ho, wo, c_out).astype(o_ref.dtype)


def conv2d_bn_leaky(x, weight, gamma, beta, running_mean, running_var, *,
                    stride, padding, eps=1e-5, tile_ho=None,
                    compute_dtype=jnp.bfloat16, target_rows=512):
    N, C_in, H, W = x.shape
    C_out, _, KH, KW = weight.shape
    s, p = stride, padding
    Ho = (H + 2 * p - KH) // s + 1
    Wo = (W + 2 * p - KW) // s + 1

    lane = 128
    C_out_pad = ((C_out + lane - 1) // lane) * lane

    # ---- output-row tiling (aim ~target_rows GEMM rows per grid step) -------
    if tile_ho is None:
        tile_ho = max(1, min(Ho, (target_rows + Wo - 1) // Wo))
    num_ho_tiles = -(-Ho // tile_ho)
    Ho_pad = num_ho_tiles * tile_ho

    # ---- glue (plain JAX): NCHW -> NHWC, spatial zero-pad, bf16 staging ------
    xh = jnp.transpose(x, (0, 2, 3, 1))                         # (N, H, W, C_in)
    Hp_need = (Ho_pad - 1) * s + KH                             # rows the last tile reads
    extra_h = max(0, Hp_need - (H + 2 * p))
    xh = jnp.pad(xh, ((0, 0), (p, p + extra_h), (p, p), (0, 0)))
    Hp = H + 2 * p + extra_h
    Wp = W + 2 * p
    xh = xh.astype(compute_dtype)

    # ---- fold BatchNorm (eval mode) into weight taps + a per-channel shift ---
    inv_std = gamma / jnp.sqrt(running_var + eps)               # (C_out,)
    shift = beta - running_mean * inv_std                       # (C_out,)
    w_taps = jnp.transpose(weight, (2, 3, 1, 0)) * inv_std      # (KH, KW, C_in, C_out)
    w_taps = jnp.pad(w_taps, ((0, 0), (0, 0), (0, 0), (0, C_out_pad - C_out)))
    w_taps = w_taps.reshape(KH * KW, C_in, C_out_pad).astype(compute_dtype)
    shift = jnp.pad(shift, (0, C_out_pad - C_out)).reshape(1, C_out_pad)
    shift = shift.astype(jnp.float32)

    kh_kw = tuple((kh, kw) for kh in range(KH) for kw in range(KW))
    kernel = functools.partial(_conv_bn_leaky_kernel, kh_kw=kh_kw,
                               stride=s, tile_ho=tile_ho, wo=Wo)

    out = pl.pallas_call(
        kernel,
        out_shape=jax.ShapeDtypeStruct((N, Ho_pad, Wo, C_out_pad), x.dtype),
        grid_spec=pltpu.PrefetchScalarGridSpec(
            num_scalar_prefetch=0,
            grid=(N, num_ho_tiles),
            in_specs=[
                # full padded image of batch element n (resident across row tiles)
                pl.BlockSpec((1, Hp, Wp, C_in), lambda n, i: (n, 0, 0, 0)),
                # grid-invariant weight taps / shift
                pl.BlockSpec((KH * KW, C_in, C_out_pad), lambda n, i: (0, 0, 0)),
                pl.BlockSpec((1, C_out_pad), lambda n, i: (0, 0)),
            ],
            out_specs=pl.BlockSpec((1, tile_ho, Wo, C_out_pad),
                                   lambda n, i: (n, i, 0, 0)),
        ),
        compiler_params=pltpu.CompilerParams(
            dimension_semantics=("parallel", "parallel"),
            vmem_limit_bytes=48 * 1024 * 1024,
        ),
    )(xh, w_taps, shift)

    # back to PyTorch NCHW; drop C_out / output-row padding.
    # TODO(synk): NHWC-consuming pipelines could skip this final transpose.
    return jnp.transpose(out[:, :Ho, :, :C_out], (0, 3, 1, 2))


def _reference(x, weight, gamma, beta, running_mean, running_var, *, stride, padding, eps=1e-5):
    dn = jax.lax.conv_dimension_numbers(x.shape, weight.shape, ("NCHW", "OIHW", "NCHW"))
    conv = jax.lax.conv_general_dilated(
        x, weight, (stride, stride), ((padding, padding), (padding, padding)),
        dimension_numbers=dn)
    c = lambda v: v[None, :, None, None]
    bn = (conv - c(running_mean)) / jnp.sqrt(c(running_var) + eps) * c(gamma) + c(beta)
    return jnp.where(bn >= 0.0, bn, 0.1 * bn)


if __name__ == "__main__":
    key = jax.random.PRNGKey(0)
    k_x, k_w, k_g, k_b, k_m, k_v = jax.random.split(key, 6)

    N, C_in, C_out, H, W = 2, 4, 8, 16, 16
    ksize, stride, padding = 3, 1, 1

    x = jax.random.normal(k_x, (N, C_in, H, W), dtype=jnp.float32)
    weight = jax.random.normal(k_w, (C_out, C_in, ksize, ksize), dtype=jnp.float32) * 0.1
    gamma = jax.random.uniform(k_g, (C_out,), minval=0.5, maxval=1.5, dtype=jnp.float32)
    beta = jax.random.normal(k_b, (C_out,), dtype=jnp.float32) * 0.1
    running_mean = jax.random.normal(k_m, (C_out,), dtype=jnp.float32) * 0.1
    running_var = jax.random.uniform(k_v, (C_out,), minval=0.5, maxval=1.5, dtype=jnp.float32)

    out = conv2d_bn_leaky(x, weight, gamma, beta, running_mean, running_var,
                          stride=stride, padding=padding)
    out = jax.block_until_ready(out)

    ref = _reference(x, weight, gamma, beta, running_mean, running_var,
                     stride=stride, padding=padding)
    assert out.shape == (N, C_out, H, W), out.shape
    # bf16 MXU inputs (f32 accumulation) -> looser tolerance than pure f32.
    assert jnp.allclose(out, ref, atol=5e-2, rtol=5e-2), float(jnp.max(jnp.abs(out - ref)))

    print("KERNEL_OK")
</pallas_src>

<mosaic_0001>
module attributes {stable_mosaic.version = 11 : i64} {
  func.func @_conv_bn_leaky_kernel(%arg0: i32, %arg1: i32, %arg2: memref<1x18x18x4xbf16, #tpu.memory_space<vmem>>, %arg3: memref<9x4x128xbf16, #tpu.memory_space<vmem>>, %arg4: memref<1x128xf32, #tpu.memory_space<vmem>>, %arg5: memref<1x16x16x128xf32, #tpu.memory_space<vmem>>) attributes {dimension_semantics = [#tpu.dimension_semantics<parallel>, #tpu.dimension_semantics<parallel>], iteration_bounds = array<i64: 2, 1>, scalar_prefetch = 0 : i64, scratch_operands = 0 : i64, tpu.core_type = #tpu.core_type<tc>, window_params = [{transform_indices = @transform_0, window_bounds = array<i64: 1, 18, 18, 4>}, {pipeline_mode = #tpu.pipeline_mode<synchronous>, transform_indices = @transform_1, window_bounds = array<i64: 9, 4, 128>}, {pipeline_mode = #tpu.pipeline_mode<synchronous>, transform_indices = @transform_2, window_bounds = array<i64: 1, 128>}, {transform_indices = @transform_3, window_bounds = array<i64: 1, 16, 16, 128>}]} {
    %c16_i32 = arith.constant 16 : i32
    %0 = arith.muli %arg1, %c16_i32 : i32
    %1 = tpu.assume_multiple %0, 16 : i32
    %cst = arith.constant 0.000000e+00 : f32
    %2 = vector.broadcast %cst : f32 to vector<256x128xf32>
    %c0_i32 = arith.constant 0 : i32
    %3 = arith.addi %1, %c0_i32 : i32
    %c0 = arith.constant 0 : index
    %4 = arith.index_cast %3 : i32 to index
    %c0_0 = arith.constant 0 : index
    %c0_1 = arith.constant 0 : index
    %5 = vector.load %arg2[%c0, %4, %c0_0, %c0_1] : memref<1x18x18x4xbf16, #tpu.memory_space<vmem>>, vector<1x16x16x4xbf16>
    %6 = vector.shape_cast %5 : vector<1x16x16x4xbf16> to vector<16x16x4xbf16>
    %7 = vector.shape_cast %6 : vector<16x16x4xbf16> to vector<256x4xbf16>
    %c0_2 = arith.constant 0 : index
    %c0_3 = arith.constant 0 : index
    %c0_4 = arith.constant 0 : index
    %8 = vector.load %arg3[%c0_2, %c0_3, %c0_4] : memref<9x4x128xbf16, #tpu.memory_space<vmem>>, vector<1x4x128xbf16>
    %9 = vector.shape_cast %8 : vector<1x4x128xbf16> to vector<4x128xbf16>
    %cst_5 = arith.constant dense<0.000000e+00> : vector<256x128xf32>
    %10 = tpu.matmul %7, %9, %cst_5 {dimension_numbers = #tpu.dot_dimension_numbers<[1], [0], [0], [1], [0, 0, 1, 1], [], []>} : vector<256x4xbf16>, vector<4x128xbf16>, vector<256x128xf32> -> vector<256x128xf32>
    %11 = arith.addf %2, %10 : vector<256x128xf32>
    %c0_i32_6 = arith.constant 0 : i32
    %12 = arith.addi %1, %c0_i32_6 : i32
    %c0_7 = arith.constant 0 : index
    %13 = arith.index_cast %12 : i32 to index
    %c1 = arith.constant 1 : index
    %c0_8 = arith.constant 0 : index
    %14 = vector.load %arg2[%c0_7, %13, %c1, %c0_8] : memref<1x18x18x4xbf16, #tpu.memory_space<vmem>>, vector<1x16x16x4xbf16>
    %15 = vector.shape_cast %14 : vector<1x16x16x4xbf16> to vector<16x16x4xbf16>
    %16 = vector.shape_cast %15 : vector<16x16x4xbf16> to vector<256x4xbf16>
    %c1_9 = arith.constant 1 : index
    %c0_10 = arith.constant 0 : index
    %c0_11 = arith.constant 0 : index
    %17 = vector.load %arg3[%c1_9, %c0_10, %c0_11] : memref<9x4x128xbf16, #tpu.memory_space<vmem>>, vector<1x4x128xbf16>
    %18 = vector.shape_cast %17 : vector<1x4x128xbf16> to vector<4x128xbf16>
    %cst_12 = arith.constant dense<0.000000e+00> : vector<256x128xf32>
    %19 = tpu.matmul %16, %18, %cst_12 {dimension_numbers = #tpu.dot_dimension_numbers<[1], [0], [0], [1], [0, 0, 1, 1], [], []>} : vector<256x4xbf16>, vector<4x128xbf16>, vector<256x128xf32> -> vector<256x128xf32>
    %20 = arith.addf %11, %19 : vector<256x128xf32>
    %c0_i32_13 = arith.constant 0 : i32
    %21 = arith.addi %1, %c0_i32_13 : i32
    %c0_14 = arith.constant 0 : index
    %22 = arith.index_cast %21 : i32 to index
    %c2 = arith.constant 2 : index
    %c0_15 = arith.constant 0 : index
    %23 = vector.load %arg2[%c0_14, %22, %c2, %c0_15] : memref<1x18x18x4xbf16, #tpu.memory_space<vmem>>, vector<1x16x16x4xbf16>
    %24 = vector.shape_cast %23 : vector<1x16x16x4xbf16> to vector<16x16x4xbf16>
    %25 = vector.shape_cast %24 : vector<16x16x4xbf16> to vector<256x4xbf16>
    %c2_16 = arith.constant 2 : index
    %c0_17 = arith.constant 0 : index
    %c0_18 = arith.constant 0 : index
    %26 = vector.load %arg3[%c2_16, %c0_17, %c0_18] : memref<9x4x128xbf16, #tpu.memory_space<vmem>>, vector<1x4x128xbf16>
    %27 = vector.shape_cast %26 : vector<1x4x128xbf16> to vector<4x128xbf16>
    %cst_19 = arith.constant dense<0.000000e+00> : vector<256x128xf32>
    %28 = tpu.matmul %25, %27, %cst_19 {dimension_numbers = #tpu.dot_dimension_numbers<[1], [0], [0], [1], [0, 0, 1, 1], [], []>} : vector<256x4xbf16>, vector<4x128xbf16>, vector<256x128xf32> -> vector<256x128xf32>
    %29 = arith.addf %20, %28 : vector<256x128xf32>
    %c1_i32 = arith.constant 1 : i32
    %30 = arith.addi %1, %c1_i32 : i32
    %c0_20 = arith.constant 0 : index
    %31 = arith.index_cast %30 : i32 to index
    %c0_21 = arith.constant 0 : index
    %c0_22 = arith.constant 0 : index
    %32 = vector.load %arg2[%c0_20, %31, %c0_21, %c0_22] : memref<1x18x18x4xbf16, #tpu.memory_space<vmem>>, vector<1x16x16x4xbf16>
    %33 = vector.shape_cast %32 : vector<1x16x16x4xbf16> to vector<16x16x4xbf16>
    %34 = vector.shape_cast %33 : vector<16x16x4xbf16> to vector<256x4xbf16>
    %c3 = arith.constant 3 : index
    %c0_23 = arith.constant 0 : index
    %c0_24 = arith.constant 0 : index
    %35 = vector.load %arg3[%c3, %c0_23, %c0_24] : memref<9x4x128xbf16, #tpu.memory_space<vmem>>, vector<1x4x128xbf16>
    %36 = vector.shape_cast %35 : vector<1x4x128xbf16> to vector<4x128xbf16>
    %cst_25 = arith.constant dense<0.000000e+00> : vector<256x128xf32>
    %37 = tpu.matmul %34, %36, %cst_25 {dimension_numbers = #tpu.dot_dimension_numbers<[1], [0], [0], [1], [0, 0, 1, 1], [], []>} : vector<256x4xbf16>, vector<4x128xbf16>, vector<256x128xf32> -> vector<256x128xf32>
    %38 = arith.addf %29, %37 : vector<256x128xf32>
    %c1_i32_26 = arith.constant 1 : i32
    %39 = arith.addi %1, %c1_i32_26 : i32
    %c0_27 = arith.constant 0 : index
    %40 = arith.index_cast %39 : i32 to index
    %c1_28 = arith.constant 1 : index
    %c0_29 = arith.constant 0 : index
    %41 = vector.load %arg2[%c0_27, %40, %c1_28, %c0_29] : memref<1x18x18x4xbf16, #tpu.memory_space<vmem>>, vector<1x16x16x4xbf16>
    %42 = vector.shape_cast %41 : vector<1x16x16x4xbf16> to vector<16x16x4xbf16>
    %43 = vector.shape_cast %42 : vector<16x16x4xbf16> to vector<256x4xbf16>
    %c4 = arith.constant 4 : index
    %c0_30 = arith.constant 0 : index
    %c0_31 = arith.constant 0 : index
    %44 = vector.load %arg3[%c4, %c0_30, %c0_31] : memref<9x4x128xbf16, #tpu.memory_space<vmem>>, vector<1x4x128xbf16>
    %45 = vector.shape_cast %44 : vector<1x4x128xbf16> to vector<4x128xbf16>
    %cst_32 = arith.constant dense<0.000000e+00> : vector<256x128xf32>
    %46 = tpu.matmul %43, %45, %cst_32 {dimension_numbers = #tpu.dot_dimension_numbers<[1], [0], [0], [1], [0, 0, 1, 1], [], []>} : vector<256x4xbf16>, vector<4x128xbf16>, vector<256x128xf32> -> vector<256x128xf32>
    %47 = arith.addf %38, %46 : vector<256x128xf32>
    %c1_i32_33 = arith.constant 1 : i32
    %48 = arith.addi %1, %c1_i32_33 : i32
    %c0_34 = arith.constant 0 : index
    %49 = arith.index_cast %48 : i32 to index
    %c2_35 = arith.constant 2 : index
    %c0_36 = arith.constant 0 : index
    %50 = vector.load %arg2[%c0_34, %49, %c2_35, %c0_36] : memref<1x18x18x4xbf16, #tpu.memory_space<vmem>>, vector<1x16x16x4xbf16>
    %51 = vector.shape_cast %50 : vector<1x16x16x4xbf16> to vector<16x16x4xbf16>
    %52 = vector.shape_cast %51 : vector<16x16x4xbf16> to vector<256x4xbf16>
    %c5 = arith.constant 5 : index
    %c0_37 = arith.constant 0 : index
    %c0_38 = arith.constant 0 : index
    %53 = vector.load %arg3[%c5, %c0_37, %c0_38] : memref<9x4x128xbf16, #tpu.memory_space<vmem>>, vector<1x4x128xbf16>
    %54 = vector.shape_cast %53 : vector<1x4x128xbf16> to vector<4x128xbf16>
    %cst_39 = arith.constant dense<0.000000e+00> : vector<256x128xf32>
    %55 = tpu.matmul %52, %54, %cst_39 {dimension_numbers = #tpu.dot_dimension_numbers<[1], [0], [0], [1], [0, 0, 1, 1], [], []>} : vector<256x4xbf16>, vector<4x128xbf16>, vector<256x128xf32> -> vector<256x128xf32>
    %56 = arith.addf %47, %55 : vector<256x128xf32>
    %c2_i32 = arith.constant 2 : i32
    %57 = arith.addi %1, %c2_i32 : i32
    %c0_40 = arith.constant 0 : index
    %58 = arith.index_cast %57 : i32 to index
    %c0_41 = arith.constant 0 : index
    %c0_42 = arith.constant 0 : index
    %59 = vector.load %arg2[%c0_40, %58, %c0_41, %c0_42] : memref<1x18x18x4xbf16, #tpu.memory_space<vmem>>, vector<1x16x16x4xbf16>
    %60 = vector.shape_cast %59 : vector<1x16x16x4xbf16> to vector<16x16x4xbf16>
    %61 = vector.shape_cast %60 : vector<16x16x4xbf16> to vector<256x4xbf16>
    %c6 = arith.constant 6 : index
    %c0_43 = arith.constant 0 : index
    %c0_44 = arith.constant 0 : index
    %62 = vector.load %arg3[%c6, %c0_43, %c0_44] : memref<9x4x128xbf16, #tpu.memory_space<vmem>>, vector<1x4x128xbf16>
    %63 = vector.shape_cast %62 : vector<1x4x128xbf16> to vector<4x128xbf16>
    %cst_45 = arith.constant dense<0.000000e+00> : vector<256x128xf32>
    %64 = tpu.matmul %61, %63, %cst_45 {dimension_numbers = #tpu.dot_dimension_numbers<[1], [0], [0], [1], [0, 0, 1, 1], [], []>} : vector<256x4xbf16>, vector<4x128xbf16>, vector<256x128xf32> -> vector<256x128xf32>
    %65 = arith.addf %56, %64 : vector<256x128xf32>
    %c2_i32_46 = arith.constant 2 : i32
    %66 = arith.addi %1, %c2_i32_46 : i32
    %c0_47 = arith.constant 0 : index
    %67 = arith.index_cast %66 : i32 to index
    %c1_48 = arith.constant 1 : index
    %c0_49 = arith.constant 0 : index
    %68 = vector.load %arg2[%c0_47, %67, %c1_48, %c0_49] : memref<1x18x18x4xbf16, #tpu.memory_space<vmem>>, vector<1x16x16x4xbf16>
    %69 = vector.shape_cast %68 : vector<1x16x16x4xbf16> to vector<16x16x4xbf16>
    %70 = vector.shape_cast %69 : vector<16x16x4xbf16> to vector<256x4xbf16>
    %c7 = arith.constant 7 : index
    %c0_50 = arith.constant 0 : index
    %c0_51 = arith.constant 0 : index
    %71 = vector.load %arg3[%c7, %c0_50, %c0_51] : memref<9x4x128xbf16, #tpu.memory_space<vmem>>, vector<1x4x128xbf16>
    %72 = vector.shape_cast %71 : vector<1x4x128xbf16> to vector<4x128xbf16>
    %cst_52 = arith.constant dense<0.000000e+00> : vector<256x128xf32>
    %73 = tpu.matmul %70, %72, %cst_52 {dimension_numbers = #tpu.dot_dimension_numbers<[1], [0], [0], [1], [0, 0, 1, 1], [], []>} : vector<256x4xbf16>, vector<4x128xbf16>, vector<256x128xf32> -> vector<256x128xf32>
    %74 = arith.addf %65, %73 : vector<256x128xf32>
    %c2_i32_53 = arith.constant 2 : i32
    %75 = arith.addi %1, %c2_i32_53 : i32
    %c0_54 = arith.constant 0 : index
    %76 = arith.index_cast %75 : i32 to index
    %c2_55 = arith.constant 2 : index
    %c0_56 = arith.constant 0 : index
    %77 = vector.load %arg2[%c0_54, %76, %c2_55, %c0_56] : memref<1x18x18x4xbf16, #tpu.memory_space<vmem>>, vector<1x16x16x4xbf16>
    %78 = vector.shape_cast %77 : vector<1x16x16x4xbf16> to vector<16x16x4xbf16>
    %79 = vector.shape_cast %78 : vector<16x16x4xbf16> to vector<256x4xbf16>
    %c8 = arith.constant 8 : index
    %c0_57 = arith.constant 0 : index
    %c0_58 = arith.constant 0 : index
    %80 = vector.load %arg3[%c8, %c0_57, %c0_58] : memref<9x4x128xbf16, #tpu.memory_space<vmem>>, vector<1x4x128xbf16>
    %81 = vector.shape_cast %80 : vector<1x4x128xbf16> to vector<4x128xbf16>
    %cst_59 = arith.constant dense<0.000000e+00> : vector<256x128xf32>
    %82 = tpu.matmul %79, %81, %cst_59 {dimension_numbers = #tpu.dot_dimension_numbers<[1], [0], [0], [1], [0, 0, 1, 1], [], []>} : vector<256x4xbf16>, vector<4x128xbf16>, vector<256x128xf32> -> vector<256x128xf32>
    %83 = arith.addf %74, %82 : vector<256x128xf32>
    %c0_60 = arith.constant 0 : index
    %c0_61 = arith.constant 0 : index
    %84 = vector.load %arg4[%c0_60, %c0_61] : memref<1x128xf32, #tpu.memory_space<vmem>>, vector<1x128xf32>
    %85 = vector.broadcast %84 : vector<1x128xf32> to vector<256x128xf32>
    %86 = arith.addf %83, %85 : vector<256x128xf32>
    %cst_62 = arith.constant 0.000000e+00 : f32
    %87 = vector.broadcast %cst_62 : f32 to vector<256x128xf32>
    %88 = arith.cmpf oge, %86, %87 : vector<256x128xf32>
    %cst_63 = arith.constant 1.000000e-01 : f32
    %89 = vector.broadcast %cst_63 : f32 to vector<256x128xf32>
    %90 = arith.mulf %89, %86 : vector<256x128xf32>
    %91 = arith.select %88, %86, %90 : vector<256x128xi1>, vector<256x128xf32>
    %92 = vector.shape_cast %91 : vector<256x128xf32> to vector<1x16x16x128xf32>
    %c0_64 = arith.constant 0 : index
    %c0_65 = arith.constant 0 : index
    %c0_66 = arith.constant 0 : index
    %c0_67 = arith.constant 0 : index
    %93 = vector.load %arg5[%c0_64, %c0_65, %c0_66, %c0_67] : memref<1x16x16x128xf32, #tpu.memory_space<vmem>>, vector<1x16x16x128xf32>
    tpu.vector_store %arg5[%c0_64, %c0_65, %c0_66, %c0_67], %92 {strides = array<i32>} : memref<1x16x16x128xf32, #tpu.memory_space<vmem>>, vector<1x16x16x128xf32>,
    return
  }
  func.func @transform_0(%arg0: i32, %arg1: i32) -> (i32, i32, i32, i32) {
    %c0_i32 = arith.constant 0 : i32
    %c0_i32_0 = arith.constant 0 : i32
    %c0_i32_1 = arith.constant 0 : i32
    %c0_i32_2 = arith.constant 0 : i32
    return %arg0, %c0_i32, %c0_i32_0, %c0_i32_1 : i32, i32, i32, i32
  }
  func.func @transform_1(%arg0: i32, %arg1: i32) -> (i32, i32, i32) {
    %c0_i32 = arith.constant 0 : i32
    %c0_i32_0 = arith.constant 0 : i32
    %c0_i32_1 = arith.constant 0 : i32
    %c0_i32_2 = arith.constant 0 : i32
    return %c0_i32, %c0_i32_0, %c0_i32_1 : i32, i32, i32
  }
  func.func @transform_2(%arg0: i32, %arg1: i32) -> (i32, i32) {
    %c0_i32 = arith.constant 0 : i32
    %c0_i32_0 = arith.constant 0 : i32
    %c0_i32_1 = arith.constant 0 : i32
    return %c0_i32, %c0_i32_0 : i32, i32
  }
  func.func @transform_3(%arg0: i32, %arg1: i32) -> (i32, i32, i32, i32) {
    %c0_i32 = arith.constant 0 : i32
    %c0_i32_0 = arith.constant 0 : i32
    %c0_i32_1 = arith.constant 0 : i32
    return %arg0, %arg1, %c0_i32, %c0_i32_0 : i32, i32, i32, i32
  }
}

</mosaic_0001>

<bundles_post_ra>
// kernel: tpu_custom_call.1
= control target key start
LH: loop header
LB: loop body
LE: loop exit
PB: predicated region body
PF: predicated region fallthrough
CT: control target
= control target key end

     0   :  { %8 = vsyncpa [#allocation3], 0  ;;  %s8476_s0 = inlined_call_operand.vmem [shape: bf16[2,18,18,4], index: 0, kind: input, shape index: {}]   ;;  %s8477_s1 = inlined_call_operand.vmem [shape: bf16[9,4,128], index: 1, kind: input, shape index: {}]   ;;  %s8478_s2 = inlined_call_operand.vmem [shape: f32[1,128], index: 2, kind: input, shape index: {}]   ;;  %s8479_s3 = inlined_call_operand.hbm [shape: f32[2,16,16,128], index: 3, kind: output, shape index: {}]  }
   0x1   :  { %10 = vsyncpa [#allocation3 + $0x1], 0  ;;  %s6564_s12 = smov 0   ;;  %s6566_s13 = smov 0  }
   0x2   :  { %s6568_s14 = smov 0   ;;  %s6570_s15 = smov 0  }
   0x3   :  { %s6572_s16 = smov 0   ;;  %s6574_s17 = smov 0  }
   0x4 LB: > { %s5021_s18 = sadd.s32 4294967295, %s6539_s17   ;;  %s5022_s19 = sadd.s32 4294967294, %s6539_s17   ;;  %s6539_s17 = sphi %s6574_s17, %s16_s17   ;;  %s6535_s16 = sphi %s6572_s16, %s8553_s16   ;;  %s6531_s15 = sphi %s6570_s15, %s8552_s15   ;;  %s6527_s14 = sphi %s6568_s14, %s8551_s14   ;;  %s6523_s13 = sphi %s6566_s13, %s8550_s13   ;;  %s6519_s12 = sphi %s6564_s12, %s8549_s12  }
   0x5   : > { %s28_s20 = sadd.s32 1, %s6535_s16  ;;  %s105_s21 = sadd.s32 1, %s6527_s14 }
   0x6   : > { %p30_p0 = scmp.ge.s32.totalorder %s28_s20, 2  ;;  %p115_p1 = scmp.ne.s32.totalorder %s6527_s14, %s6523_s13 }
   0x7   : > { %p116_p2 = scmp.eq.s32.totalorder %s5021_s18, 1  ;;  %p121_p3 = scmp.ne.s32.totalorder %s6523_s13, %s6519_s12 }
   0x8   : > { %s8555_s20 = smov (%p30_p0, %s28_s20), 0  ;;  %p122_p5 = scmp.eq.s32.totalorder %s5022_s19, 1 }
   0x9   : > { %p6604_p4 = por %p116_p2, %p115_p1  ;;  %s100_s23 = ssub.s32 %s6535_s16, %s8555_s20 }
   0xa   : > { %p5025_p6 = scmp.ge.s32.totalorder %s6539_s17, 1  ;;  %p103_p7 = scmp.eq.s32.totalorder %s100_s23, 0 }
   0xb   : > { %p6611_p8 = por %p122_p5, %p121_p3  ;;  %p154_p9 = scmp.lt.s32.totalorder %s6539_s17, 3 }
   0xc   : > { %s6617_s25 = scalar_select %p103_p7, %s6527_s14, %s105_s21  }
   0xd   : > { %p155_p10 = pnand %p5025_p6, %p154_p9 }
   0xf   : > { %158 = sbr.rel (%p155_p10) target bundleno = 612 (0x264), region = 32 }
  0x16   : > { %v5028_v0 = vld [vmem:[%s8477_s1 + $0x2] sm:$0x3]  ;;  %vm724_vm0 = vcmask 1041408   ;;  %v5255_v1 = vld [vmem:[%s8477_s1 + $0x8] sm:$0x3]  ;;  %p178_p11 = scmp.lt.s32.totalorder %s6531_s15, 1 }
  0x17   : > { %6288 = vmatprep.subr.msk.bf16.mxu1 %vm724_vm0, %v5028_v0  ;;  %6292 = vmatprep.subr.msk.bf16.mxu0 %vm724_vm0, %v5255_v1  ;;  %v726_v2 = vsel %vm724_vm0, %v5028_v0, 0  ;;  %v6630_v3 = vsel %vm724_vm0, %v5255_v1, 0  ;;  %v221_v4 = vld [vmem:[%s8477_s1] sm:$0x3]  ;;  %v5320_v5 = vld [vmem:[%s8477_s1 + $0xa] sm:$0x3] }
  0x18   : > { %8495 = vst [vmem:[#allocation5_spill] sm:$0xff] %v6630_v3  ;;  %5725 = vmatpush3.bf16.msra.mxu1 %v726_v2  ;;  %5861 = vmatpush3.bf16.msra.mxu0 %v6630_v3  ;;  %s179_s30 = scalar_select %p178_p11, %s6531_s15, 1  ;;  %vm238_vm1 = vsmask.f32 3328  ;;  %vm239_vm2 = vsmask.f32 7440 }
  0x19   : > { %6289 = vmatprep.subr.msk.bf16.mxu1 %vm724_vm0, %v221_v4  ;;  %6294 = vmatprep.subr.msk.bf16.mxu0 %vm724_vm0, %v5320_v5  ;;  %vm675_vm3 = vcmask 31744   ;;  %v6658_v17 = vsel %vm724_vm0, %v221_v4, 0  ;;  %v6664_v26 = vld [vmem:[%s8477_s1 + $0xc] sm:$0x3]  ;;  %vm6671_vm4 = vmor %vm238_vm1, %vm239_vm2  ;;  %v6677_v37 = vsel %vm724_vm0, %v5320_v5, 0  ;;  %vm1229_vm5 = vcmask 1042432  }
  0x1a   : > { %s6298_s8 = smul.u32 216, %s179_s30  ;;  %v6681_v41 = vsel %vm724_vm0, %v6664_v26, 0  ;;  %vm1230_vm6 = vcmask 1046532   ;;  %s175_s9 = sand.u32 1, %s6523_s13  }
  0x1b   : > { %vm6897_vm7 = vmor %vm1229_vm5, %vm1230_vm6  ;;  %s5026_s18 = sshll.u32 %s175_s9, 8  ;;  %s5570_s21 = sshll.u32 %s6531_s15, 12 }
  0x1c   : > { %s6645_s11 = scalar_lea.vmem %s8476_s0, %s6298_s8  ;;  %s8349_s19 = scalar_lea.vmem [#allocation2], %s5026_s18 }
  0x1d   : > { %v189_v6 = vld [vmem:[%s6645_s11] sm:$0xf]  ;;  %v190_v7 = vld [vmem:[%s6645_s11 + $0x4] sm:$0xf]  ;;  %v222_v8 = vld [vmem:[%s6645_s11 + $0x8] sm:$0x1]  ;;  %s8421_s15 = scalar_lea.hbm %s8479_s3, %s5570_s21 }
  0x1e   : > { %v242_v9 = vshrl.u32 %v189_v6, 16  ;;  %v245_v10 = vshll.u32 %v189_v6, 16  ;;  %v251_v11 = vshll.u32 %v190_v7, 16  ;;  %v255_v12 = vshrl.u32 %v190_v7, 16  ;;  %v5207_v13 = vld [vmem:[%s6645_s11 + $0xc] sm:$0xf] }
  0x1f   : > { %v261_v14 = vshll.u32 %v222_v8, 16  ;;  %v6652_v15 = vld [vmem:[%s6645_s11 + $0x10] sm:$0xf]  ;;  %v6655_v16 = vld [vmem:[%s6645_s11 + $0x14] sm:$0x1]  ;;  %v2049_v23 = vshrl.u32 %v5207_v13, 16 }
  0x20   : > { %v244_v18 = vrot.slane %v242_v9, 4  ;;  %v247_v19 = vrot.slane %v245_v10, 5  ;;  %v253_v20 = vrot.slane %v251_v11, 5  ;;  %v257_v21 = vrot.slane %v255_v12, 4  ;;  %v191_v31 = vld [vmem:[%s6645_s11 + $0xc] sm:$0xf] }
  0x21   : > { %v263_v22 = vrot.slane %v261_v14, 5  ;;  %v2052_v24 = vshll.u32 %v5207_v13, 16  ;;  %v2058_v25 = vshll.u32 %v6652_v15, 16  ;;  %v2062_v29 = vshrl.u32 %v6652_v15, 16  ;;  %v192_v36 = vld [vmem:[%s6645_s11 + $0x10] sm:$0xf] }
  0x22   : > { %v248_v27 = vor.u32 %v247_v19, %v244_v18  ;;  %v258_v28 = vor.u32 %v257_v21, %v253_v20  ;;  %v2068_v30 = vshll.u32 %v6655_v16, 16  ;;  %v2051_v33 = vrot.slane %v2049_v23, 4  ;;  %v223_v44 = vld [vmem:[%s6645_s11 + $0x14] sm:$0x1]  ;;  %v5210_v55 = vld [vmem:[%s6645_s11 + $0x18] sm:$0xf] }
  0x23   : > { %v2054_v34 = vrot.slane %v2052_v24, 5  ;;  %v2060_v35 = vrot.slane %v2058_v25, 5  ;;  %v2064_v40 = vrot.slane %v2062_v29, 4  ;;  %v266_v45 = vshrl.u32 %v191_v31, 16  ;;  %v6690_v60 = vld [vmem:[%s6645_s11 + $0x1c] sm:$0xf] }
  0x24   : > { %v249_v38 = vrot.slane %v248_v27, 4  ;;  %v259_v39 = vrot.slane %v258_v28, 4  ;;  %v2070_v43 = vrot.slane %v2068_v30, 5  ;;  %v269_v46 = vshll.u32 %v191_v31, 16  ;;  %v6698_v1 = vld [vmem:[%s6645_s11 + $0x20] sm:$0x1] }
  0x25   : > { %v2055_v42 = vor.u32 %v2054_v34, %v2051_v33  ;;  %v2065_v49 = vor.u32 %v2064_v40, %v2060_v35  ;;  %v275_v50 = vshll.u32 %v192_v36, 16  ;;  %v268_v53 = vrot.slane %v266_v45, 4  ;;  %v193_v18 = vld [vmem:[%s6645_s11 + $0x18] sm:$0xf]  ;;  %v194_v23 = vld [vmem:[%s6645_s11 + $0x1c] sm:$0xf] }
  0x26   : > { %v254_v47 = vsel %vm6671_vm4, %v249_v38, %v253_v20  ;;  %v264_v48 = vsel %vm6671_vm4, %v259_v39, %v263_v22  ;;  %v271_v54 = vrot.slane %v269_v46, 5  ;;  %v279_v58 = vshrl.u32 %v192_v36, 16  ;;  %v224_v31 = vld [vmem:[%s6645_s11 + $0x20] sm:$0x1]  ;;  %v5213_v40 = vld [vmem:[%s6645_s11 + $0x24] sm:$0xf] }
  0x27   : > { %v5029_v51 = vcombine.low %v254_v47, %v264_v48  ;;  %v2056_v52 = vrot.slane %v2055_v42, 4  ;;  %v2066_v56 = vrot.slane %v2065_v49, 4  ;;  %v277_v57 = vrot.slane %v275_v50, 5  ;;  %v6721_v46 = vld [vmem:[%s6645_s11 + $0x28] sm:$0xf]  ;;  %s4938_s23 = sshll.u32 %s8349_s19, 4  ;;  %s8423_s23 = int_to_ptr.vmem [resolvable:$true] %s4938_s23 }
  0x28   : > { %v285_v59 = vshll.u32 %v223_v44, 16  ;;  %v2792_v62 = vrot.slane %v6652_v15, 5  ;;  %v2795_v63 = vrot.slane %v6655_v16, 5  ;;  %v272_v0 = vor.u32 %v271_v54, %v268_v53  ;;  %v6730_v54 = vld [vmem:[%s6645_s11 + $0x2c] sm:$0x1]  ;;  %s8430_s28 = scalar_lea.sflag [#allocation3], %s175_s9 }
  0x29   : > { %5726 = vmatprep.mubr.msk.bf16.mxu1 %vm675_vm3, %v5029_v51  ;;  %v2061_v61 = vsel %vm6671_vm4, %v2056_v52, %v2060_v35  ;;  %v2071_v2 = vsel %vm6671_vm4, %v2066_v56, %v2070_v43  ;;  %v281_v4 = vrot.slane %v279_v58, 4  ;;  %v2073_v6 = vshrl.u32 %v5210_v55, 16  ;;  %v5109_v51 = vld [vmem:[%s8477_s1 + $0x4] sm:$0x3]  ;;  %v6930_v16 = vld [vmem:[%s6645_s11 + $0x7c] sm:$0xf] }
  0x2a   : > { %v287_v5 = vrot.slane %v285_v59, 5  ;;  %v5256_v7 = vcombine.low %v2061_v61, %v2071_v2  ;;  %v273_v8 = vrot.slane %v272_v0, 4  ;;  %v2076_v9 = vshll.u32 %v5210_v55, 16  ;;  %v195_v0 = vld [vmem:[%s6645_s11 + $0x24] sm:$0xf]  ;;  %s6461_s29 = scalar_lea.vmem %s8423_s23, 4096 }
  0x2b   : > { %v2082_v10 = vshll.u32 %v6690_v60, 16  ;;  %v282_v11 = vor.u32 %v281_v4, %v277_v57  ;;  %v2075_v12 = vrot.slane %v2073_v6, 4  ;;  %v2086_v13 = vshrl.u32 %v6690_v60, 16  ;;  %p6462_p12 = scmp.ne.s32.totalorder %s8423_s23, %s6461_s29  ;;  %s6541_s30 = smov [#allocation2]  }
  0x2c   : > { %v2092_v14 = vshll.u32 %v6698_v1, 16  ;;  %5862 = vmatprep.mubr.msk.bf16.mxu0 %vm675_vm3, %v5256_v7  ;;  %v278_v19 = vsel %vm6671_vm4, %v273_v8, %v277_v57  ;;  %v2078_v20 = vrot.slane %v2076_v9, 5  ;;  %v2799_v22 = vrot.slane %v6690_v60, 5  ;;  %v196_v7 = vld [vmem:[%s6645_s11 + $0x28] sm:$0xf]  ;;  %s6465_s4 = sshll.u32 %s6541_s30, 4  ;;  %s6466_s4 = int_to_ptr.vmem [resolvable:$false] %s6465_s4 }
  0x2d   : > { %v2084_v21 = vrot.slane %v2082_v10, 5  ;;  %v283_v24 = vrot.slane %v282_v11, 4  ;;  %v2088_v25 = vrot.slane %v2086_v13, 4  ;;  %v2802_v28 = vrot.slane %v6698_v1, 5  ;;  %v225_v13 = vld [vmem:[%s6645_s11 + $0x2c] sm:$0x1]  ;;  %p6463_p13 = pnand %p6462_p12, %p6604_p4  ;;  %p6468_p1 = scmp.lt.s32.totalorder %s8423_s23, %s6466_s4 }
  0x2e   : > { %v2094_v27 = vrot.slane %v2092_v14, 5  ;;  %v2079_v29 = vor.u32 %v2078_v20, %v2075_v12  ;;  %v6714_v30 = vrot.slane %v2799_v22, 4  ;;  %v290_v33 = vshrl.u32 %v193_v18, 16  ;;  %s6467_s5 = scalar_lea.vmem %s6466_s4, 8192 }
  0x2f   : > { %v293_v34 = vshll.u32 %v193_v18, 16  ;;  %v288_v35 = vsel %vm6671_vm4, %v283_v24, %v287_v5  ;;  %v2089_v36 = vor.u32 %v2088_v25, %v2084_v21  ;;  %v299_v38 = vshll.u32 %v194_v23, 16  ;;  %v5216_v24 = vld [vmem:[%s6645_s11 + $0x30] sm:$0xf]  ;;  %p6464_p0 = pneg %p6463_p13  ;;  %p6469_p2 = scmp.lt.s32.totalorder %s6467_s5, %s6461_s29 }
  0x30   : > { %v303_v39 = vshrl.u32 %v194_v23, 16  ;;  %v5030_v42 = vcombine.low %v278_v19, %v288_v35  ;;  %v2080_v43 = vrot.slane %v2079_v29, 4  ;;  %v292_v44 = vrot.slane %v290_v33, 4  ;;  %v6750_v33 = vld [vmem:[%s6645_s11 + $0x34] sm:$0xf] }
  0x31   : > { %v295_v45 = vrot.slane %v293_v34, 5  ;;  %v2090_v47 = vrot.slane %v2089_v36, 4  ;;  %v301_v48 = vrot.slane %v299_v38, 5  ;;  %v309_v50 = vshll.u32 %v224_v31, 16  ;;  %p6470_p3 = por %p6469_p2, %p6468_p1 }
  0x32   : > { %v305_v49 = vrot.slane %v303_v39, 4  ;;  %5727 = vmatmul.mubr.msk.bf16.vlgmr.msra.gmra.mrb[0].mxu1 %vm675_vm3, %v5030_v42  ;;  %v2085_v52 = vsel %vm6671_vm4, %v2080_v43, %v2084_v21  ;;  %v2097_v55 = vshrl.u32 %v5213_v40, 16  ;;  %v2100_v56 = vshll.u32 %v5213_v40, 16  ;;  %v6758_v40 = vld [vmem:[%s6645_s11 + $0x38] sm:$0x1] }
  0x33   : > { %v296_v53 = vor.u32 %v295_v45, %v292_v44  ;;  %5759 = vmatpush3.bf16.msra.mxu1 %v6658_v17  ;;  %v2095_v57 = vsel %vm6671_vm4, %v2090_v47, %v2094_v27  ;;  %v311_v59 = vrot.slane %v309_v50, 5  ;;  %v2106_v61 = vshll.u32 %v6721_v46, 16  ;;  %p6471_p5 = pnand %p6470_p3, %p6464_p0 }
  0x34   : > { %v306_v58 = vor.u32 %v305_v49, %v301_v48  ;;  %v5257_v2 = vcombine.low %v2085_v52, %v2095_v57  ;;  %v2099_v5 = vrot.slane %v2097_v55, 4  ;;  %v2102_v6 = vrot.slane %v2100_v56, 5  ;;  %6290 = vmatprep.subr.msk.bf16.mxu1 %vm724_vm0, %v5109_v51  ;;  %v197_v52 = vld [vmem:[%s6645_s11 + $0x30] sm:$0xf] }
  0x35   : > { %v297_v4 = vrot.slane %v296_v53, 4  ;;  %v2108_v9 = vrot.slane %v2106_v61, 5  ;;  %v2110_v17 = vshrl.u32 %v6721_v46, 16  ;;  %v2116_v10 = vshll.u32 %v6730_v54, 16 }
  0x36   : > { %v307_v8 = vrot.slane %v306_v58, 4  ;;  %5863 = vmatmul.mubr.msk.bf16.vlgmr.msra.gmra.mrb[0].mxu0 %vm675_vm3, %v5257_v2  ;;  %v2103_v12 = vor.u32 %v2102_v6, %v2099_v5  ;;  %v314_v14 = vshrl.u32 %v195_v0, 16  ;;  %v317_v18 = vshll.u32 %v195_v0, 16  ;;  %v198_v58 = vld [vmem:[%s6645_s11 + $0x34] sm:$0xf] }
  0x37   : > { %v302_v11 = vsel %vm6671_vm4, %v297_v4, %v301_v48  ;;  %5895 = vmatpush3.bf16.msra.mxu0 %v6677_v37  ;;  %v2112_v20 = vrot.slane %v2110_v17, 4  ;;  %v2118_v21 = vrot.slane %v2116_v10, 5  ;;  %v323_v23 = vshll.u32 %v196_v7, 16  ;;  %v226_v4 = vld [vmem:[%s6645_s11 + $0x38] sm:$0x1] }
  0x38   : > { %v312_v19 = vsel %vm6671_vm4, %v307_v8, %v311_v59  ;;  %v2104_v27 = vrot.slane %v2103_v12, 4  ;;  %v316_v29 = vrot.slane %v314_v14, 4  ;;  %v319_v31 = vrot.slane %v317_v18, 5  ;;  %6295 = vmatprep.subr.msk.bf16.mxu0 %vm724_vm0, %v6664_v26  ;;  %v5219_v12 = vld [vmem:[%s6645_s11 + $0x3c] sm:$0xf] }
  0x39   : > { %v5031_v25 = vcombine.low %v302_v11, %v312_v19  ;;  %v2113_v34 = vor.u32 %v2112_v20, %v2108_v9  ;;  %v325_v35 = vrot.slane %v323_v23, 5  ;;  %v327_v37 = vshrl.u32 %v196_v7, 16  ;;  %v6775_v20 = vld [vmem:[%s6645_s11 + $0x40] sm:$0xf] }
  0x3a   : > { %v333_v36 = vshll.u32 %v225_v13, 16  ;;  %v2109_v38 = vsel %vm6671_vm4, %v2104_v27, %v2108_v9  ;;  %v320_v39 = vor.u32 %v319_v31, %v316_v29  ;;  %v2121_v42 = vshrl.u32 %v5216_v24, 16 }
  0x3b   : > { %5730 = vmatprep.mubr.msk.bf16.mxu1 %vm675_vm3, %v5031_v25  ;;  %v2124_v43 = vshll.u32 %v5216_v24, 16  ;;  %v2114_v44 = vrot.slane %v2113_v34, 4  ;;  %v329_v45 = vrot.slane %v327_v37, 4  ;;  %v2130_v26 = vshll.u32 %v6750_v33, 16  ;;  %v6780_v34 = vld [vmem:[%s6645_s11 + $0x44] sm:$0x1] }
  0x3c   : > { %v335_v47 = vrot.slane %v333_v36, 5  ;;  %v321_v48 = vrot.slane %v320_v39, 4  ;;  %v2123_v49 = vrot.slane %v2121_v42, 4  ;;  %v2134_v51 = vshrl.u32 %v6750_v33, 16  ;;  %v199_v42 = vld [vmem:[%s6645_s11 + $0x3c] sm:$0xf] }
  0x3d   : > { %v2126_v50 = vrot.slane %v2124_v43, 5  ;;  %v2119_v53 = vsel %vm6671_vm4, %v2114_v44, %v2118_v21  ;;  %v330_v55 = vor.u32 %v329_v45, %v325_v35  ;;  %v2132_v56 = vrot.slane %v2130_v26, 5  ;;  %v200_v26 = vld [vmem:[%s6645_s11 + $0x40] sm:$0xf] }
  0x3e   : > { %v2140_v57 = vshll.u32 %v6758_v40, 16  ;;  %v5258_v59 = vcombine.low %v2109_v38, %v2119_v53  ;;  %v326_v61 = vsel %vm6671_vm4, %v321_v48, %v325_v35  ;;  %v2136_v2 = vrot.slane %v2134_v51, 4 }
  0x3f   : > { %v2127_v0 = vor.u32 %v2126_v50, %v2123_v49  ;;  %v331_v5 = vrot.slane %v330_v55, 4  ;;  %v338_v7 = vshrl.u32 %v197_v52, 16  ;;  %v341_v8 = vshll.u32 %v197_v52, 16 }
  0x40   : > { %v2142_v6 = vrot.slane %v2140_v57, 5  ;;  %5866 = vmatprep.mubr.msk.bf16.mxu0 %vm675_vm3, %v5258_v59  ;;  %v2137_v17 = vor.u32 %v2136_v2, %v2132_v56  ;;  %v347_v10 = vshll.u32 %v198_v58, 16  ;;  %v351_v11 = vshrl.u32 %v198_v58, 16  ;;  %v5222_v2 = vld [vmem:[%s6645_s11 + $0x48] sm:$0xf] }
  0x41   : > { %v2128_v9 = vrot.slane %v2127_v0, 4  ;;  %v336_v13 = vsel %vm6671_vm4, %v331_v5, %v335_v47  ;;  %v340_v14 = vrot.slane %v338_v7, 4  ;;  %v343_v18 = vrot.slane %v341_v8, 5  ;;  %v6798_v8 = vld [vmem:[%s6645_s11 + $0x4c] sm:$0xf] }
  0x42   : > { %v357_v19 = vshll.u32 %v226_v4, 16  ;;  %v5032_v21 = vcombine.low %v326_v61, %v336_v13  ;;  %v2138_v24 = vrot.slane %v2137_v17, 4  ;;  %v349_v25 = vrot.slane %v347_v10, 5  ;;  %v227_v61 = vld [vmem:[%s6645_s11 + $0x44] sm:$0x1] }
  0x43   : > { %v2133_v23 = vsel %vm6671_vm4, %v2128_v9, %v2132_v56  ;;  %v344_v27 = vor.u32 %v343_v18, %v340_v14  ;;  %v353_v29 = vrot.slane %v351_v11, 4  ;;  %v2145_v35 = vshrl.u32 %v5219_v12, 16 }
  0x44   : > { %v359_v31 = vrot.slane %v357_v19, 5  ;;  %5731 = vmatmul.mubr.msk.bf16.gmra.mrb[4].mxu1 %vm675_vm3, %v5032_v21  ;;  %v2143_v37 = vsel %vm6671_vm4, %v2138_v24, %v2142_v6  ;;  %v2148_v36 = vshll.u32 %v5219_v12, 16  ;;  %v2154_v38 = vshll.u32 %v6775_v20, 16 }
  0x45   : > { %v2158_v39 = vshrl.u32 %v6775_v20, 16  ;;  %v5259_v43 = vcombine.low %v2133_v23, %v2143_v37  ;;  %v345_v44 = vrot.slane %v344_v27, 4  ;;  %v354_v45 = vor.u32 %v353_v29, %v349_v25  ;;  %v6806_v23 = vld [vmem:[%s6645_s11 + $0x50] sm:$0x1]  ;;  %v6810_v27 = vld [vmem:[%s6645_s11 + $0x48] sm:$0xf] }
  0x46   : > { %v2147_v47 = vrot.slane %v2145_v35, 4  ;;  %v2150_v48 = vrot.slane %v2148_v36, 5  ;;  %v2156_v49 = vrot.slane %v2154_v38, 5  ;;  %v2164_v51 = vshll.u32 %v6780_v34, 16  ;;  %v6813_v36 = vld [vmem:[%s6645_s11 + $0x4c] sm:$0xf] }
  0x47   : > { %v2160_v50 = vrot.slane %v2158_v39, 4  ;;  %5867 = vmatmul.mubr.msk.bf16.gmra.mrb[4].mxu0 %vm675_vm3, %v5259_v43  ;;  %v350_v52 = vsel %vm6671_vm4, %v345_v44, %v349_v25  ;;  %v355_v53 = vrot.slane %v354_v45, 4  ;;  %v362_v55 = vshrl.u32 %v199_v42, 16 }
  0x48   : > { %v365_v56 = vshll.u32 %v199_v42, 16  ;;  %v2151_v57 = vor.u32 %v2150_v48, %v2147_v47  ;;  %v2166_v59 = vrot.slane %v2164_v51, 5  ;;  %v371_v0 = vshll.u32 %v200_v26, 16 }
  0x49   : > { %v2161_v58 = vor.u32 %v2160_v50, %v2156_v49  ;;  %v360_v4 = vsel %vm6671_vm4, %v355_v53, %v359_v31  ;;  %v364_v5 = vrot.slane %v362_v55, 4  ;;  %v375_v7 = vshrl.u32 %v200_v26, 16  ;;  %v228_v26 = vld [vmem:[%s6645_s11 + $0x50] sm:$0x1]  ;;  %v5225_v53 = vld [vmem:[%s6645_s11 + $0x54] sm:$0xf] }
  0x4a   : > { %v367_v6 = vrot.slane %v365_v56, 5  ;;  %v5033_v9 = vcombine.low %v350_v52, %v360_v4  ;;  %v2152_v17 = vrot.slane %v2151_v57, 4  ;;  %v373_v11 = vrot.slane %v371_v0, 5  ;;  %v6829_v4 = vld [vmem:[%s6645_s11 + $0x58] sm:$0xf] }
  0x4b   : > { %v2162_v10 = vrot.slane %v2161_v58, 4  ;;  %v377_v13 = vrot.slane %v375_v7, 4  ;;  %v381_v14 = vshll.u32 %v227_v61, 16  ;;  %v2169_v18 = vshrl.u32 %v5222_v2, 16 }
  0x4c   : > { %v368_v12 = vor.u32 %v367_v6, %v364_v5  ;;  %5734 = vmatprep.mubr.msk.bf16.mxu1 %vm675_vm3, %v5033_v9  ;;  %v2157_v19 = vsel %vm6671_vm4, %v2152_v17, %v2156_v49  ;;  %v2172_v24 = vshll.u32 %v5222_v2, 16  ;;  %v2178_v25 = vshll.u32 %v6798_v8, 16 }
  0x4d   : > { %v2167_v21 = vsel %vm6671_vm4, %v2162_v10, %v2166_v59  ;;  %v378_v35 = vor.u32 %v377_v13, %v373_v11  ;;  %v383_v37 = vrot.slane %v381_v14, 5  ;;  %v2171_v38 = vrot.slane %v2169_v18, 4 }
  0x4e   : > { %v5260_v29 = vcombine.low %v2157_v19, %v2167_v21  ;;  %v369_v31 = vrot.slane %v368_v12, 4  ;;  %v2174_v39 = vrot.slane %v2172_v24, 5  ;;  %v2180_v42 = vrot.slane %v2178_v25, 5  ;;  %v6835_v12 = vld [vmem:[%s6645_s11 + $0x5c] sm:$0x1] }
  0x4f   : > { %v2182_v43 = vshrl.u32 %v6798_v8, 16  ;;  %v379_v45 = vrot.slane %v378_v35, 4  ;;  %v2188_v47 = vshll.u32 %v6806_v23, 16  ;;  %v386_v48 = vshrl.u32 %v6810_v27, 16  ;;  %v6839_v24 = vld [vmem:[%s6645_s11 + $0x54] sm:$0xf] }
  0x50   : > { %5870 = vmatprep.mubr.msk.bf16.mxu0 %vm675_vm3, %v5260_v29  ;;  %v374_v44 = vsel %vm6671_vm4, %v369_v31, %v373_v11  ;;  %v2175_v49 = vor.u32 %v2174_v39, %v2171_v38  ;;  %v389_v51 = vshll.u32 %v6810_v27, 16  ;;  %v395_v52 = vshll.u32 %v6813_v36, 16 }
  0x51   : > { %v2184_v50 = vrot.slane %v2182_v43, 4  ;;  %v384_v55 = vsel %vm6671_vm4, %v379_v45, %v383_v37  ;;  %v2190_v56 = vrot.slane %v2188_v47, 5  ;;  %v388_v57 = vrot.slane %v386_v48, 4  ;;  %v6845_v37 = vld [vmem:[%s6645_s11 + $0x58] sm:$0xf] }
  0x52   : > { %v399_v58 = vshrl.u32 %v6813_v36, 16  ;;  %v5034_v59 = vcombine.low %v374_v44, %v384_v55  ;;  %v2176_v61 = vrot.slane %v2175_v49, 4  ;;  %v391_v2 = vrot.slane %v389_v51, 5 }
  0x53   : > { %v2185_v0 = vor.u32 %v2184_v50, %v2180_v42  ;;  %v397_v5 = vrot.slane %v395_v52, 5  ;;  %v405_v7 = vshll.u32 %v228_v26, 16  ;;  %v2193_v9 = vshrl.u32 %v5225_v53, 16  ;;  %v229_v26 = vld [vmem:[%s6645_s11 + $0x5c] sm:$0x1] }
  0x54   : > { %v401_v6 = vrot.slane %v399_v58, 4  ;;  %5735 = vmatmul.mubr.msk.bf16.gmra.mrb[8].mxu1 %vm675_vm3, %v5034_v59  ;;  %v2181_v17 = vsel %vm6671_vm4, %v2176_v61, %v2180_v42  ;;  %v392_v11 = vor.u32 %v391_v2, %v388_v57  ;;  %v2196_v13 = vshll.u32 %v5225_v53, 16  ;;  %v5228_v53 = vld [vmem:[%s6645_s11 + $0x60] sm:$0xf]  ;;  %v6859_v59 = vld [vmem:[%s6645_s11 + $0x64] sm:$0xf] }
  0x55   : > { %v2186_v10 = vrot.slane %v2185_v0, 4  ;;  %v407_v18 = vrot.slane %v405_v7, 5  ;;  %v2195_v19 = vrot.slane %v2193_v9, 4  ;;  %v2202_v21 = vshll.u32 %v6829_v4, 16  ;;  %v6866_v9 = vld [vmem:[%s6645_s11 + $0x68] sm:$0x1] }
  0x56   : > { %v402_v14 = vor.u32 %v401_v6, %v397_v5  ;;  %v393_v29 = vrot.slane %v392_v11, 4  ;;  %v2198_v31 = vrot.slane %v2196_v13, 5  ;;  %v2206_v35 = vshrl.u32 %v6829_v4, 16 }
  0x57   : > { %v2191_v25 = vsel %vm6671_vm4, %v2186_v10, %v2190_v56  ;;  %v2204_v42 = vrot.slane %v2202_v21, 5  ;;  %v2212_v43 = vshll.u32 %v6835_v12, 16  ;;  %v410_v48 = vshrl.u32 %v6839_v24, 16 }
  0x58   : > { %v5261_v38 = vcombine.low %v2181_v17, %v2191_v25  ;;  %v403_v39 = vrot.slane %v402_v14, 4  ;;  %v398_v44 = vsel %vm6671_vm4, %v393_v29, %v397_v5  ;;  %v2199_v45 = vor.u32 %v2198_v31, %v2195_v19  ;;  %v6870_v19 = vld [vmem:[%s6645_s11 + $0x60] sm:$0xf] }
  0x59   : > { %v2208_v47 = vrot.slane %v2206_v35, 4  ;;  %v2214_v50 = vrot.slane %v2212_v43, 5  ;;  %v413_v51 = vshll.u32 %v6839_v24, 16  ;;  %v419_v52 = vshll.u32 %v6845_v37, 16  ;;  %v6876_v35 = vld [vmem:[%s6645_s11 + $0x64] sm:$0xf] }
  0x5a   : > { %5871 = vmatmul.mubr.msk.bf16.gmra.mrb[8].mxu0 %vm675_vm3, %v5261_v38  ;;  %v408_v49 = vsel %vm6671_vm4, %v403_v39, %v407_v18  ;;  %v2200_v56 = vrot.slane %v2199_v45, 4  ;;  %v412_v58 = vrot.slane %v410_v48, 4  ;;  %v423_v2 = vshrl.u32 %v6845_v37, 16 }
  0x5b   : > { %v5035_v55 = vcombine.low %v398_v44, %v408_v49  ;;  %v2209_v57 = vor.u32 %v2208_v47, %v2204_v42  ;;  %v415_v61 = vrot.slane %v413_v51, 5  ;;  %v421_v0 = vrot.slane %v419_v52, 5 }
  0x5c   : > { %v429_v5 = vshll.u32 %v229_v26, 16  ;;  %v2205_v6 = vsel %vm6671_vm4, %v2200_v56, %v2204_v42  ;;  %v2217_v17 = vshrl.u32 %v5228_v53, 16  ;;  %v2220_v10 = vshll.u32 %v5228_v53, 16 }
  0x5d   : > { %5738 = vmatprep.mubr.msk.bf16.mxu1 %vm675_vm3, %v5035_v55  ;;  %v2210_v7 = vrot.slane %v2209_v57, 4  ;;  %v416_v11 = vor.u32 %v415_v61, %v412_v58  ;;  %v425_v13 = vrot.slane %v423_v2, 4  ;;  %v2226_v18 = vshll.u32 %v6859_v59, 16  ;;  %v5288_v58 = vld [vmem:[%s6645_s11 + $0xc] sm:$0xe] }
  0x5e   : > { %v431_v14 = vrot.slane %v429_v5, 5  ;;  %v2219_v25 = vrot.slane %v2217_v17, 4  ;;  %v2222_v29 = vrot.slane %v2220_v10, 5  ;;  %v2230_v31 = vshrl.u32 %v6859_v59, 16 }
  0x5f   : > { %v2215_v21 = vsel %vm6671_vm4, %v2210_v7, %v2214_v50  ;;  %v417_v39 = vrot.slane %v416_v11, 4  ;;  %v426_v42 = vor.u32 %v425_v13, %v421_v0  ;;  %v2228_v43 = vrot.slane %v2226_v18, 5  ;;  %v230_v50 = vld [vmem:[%s6645_s11 + $0x68] sm:$0x1] }
  0x60   : > { %v5262_v38 = vcombine.low %v2205_v6, %v2215_v21  ;;  %v2223_v44 = vor.u32 %v2222_v29, %v2219_v25  ;;  %v2232_v45 = vrot.slane %v2230_v31, 4  ;;  %v2236_v47 = vshll.u32 %v6866_v9, 16  ;;  %v6904_v29 = vld [vmem:[%s6645_s11 + $0x70] sm:$0xf] }
  0x61   : > { %v434_v26 = vshrl.u32 %v6870_v19, 16  ;;  %v422_v48 = vsel %vm6671_vm4, %v417_v39, %v421_v0  ;;  %v427_v49 = vrot.slane %v426_v42, 4  ;;  %v437_v51 = vshll.u32 %v6870_v19, 16  ;;  %v6891_v0 = vld [vmem:[%s6645_s11 + $0x6c] sm:$0xf] }
  0x62   : > { %5874 = vmatprep.mubr.msk.bf16.mxu0 %vm675_vm3, %v5262_v38  ;;  %v443_v52 = vshll.u32 %v6876_v35, 16  ;;  %v2224_v53 = vrot.slane %v2223_v44, 4  ;;  %v2233_v55 = vor.u32 %v2232_v45, %v2228_v43  ;;  %v2238_v56 = vrot.slane %v2236_v47, 5 }
  0x63   : > { %v436_v57 = vrot.slane %v434_v26, 4  ;;  %v432_v61 = vsel %vm6671_vm4, %v427_v49, %v431_v14  ;;  %v439_v2 = vrot.slane %v437_v51, 5  ;;  %v447_v6 = vshrl.u32 %v6876_v35, 16  ;;  %v231_v26 = vld [vmem:[%s6645_s11 + $0x74] sm:$0x1] }
  0x64   : > { %v445_v5 = vrot.slane %v443_v52, 5  ;;  %v5036_v7 = vcombine.low %v422_v48, %v432_v61  ;;  %v2229_v17 = vsel %vm6671_vm4, %v2224_v53, %v2228_v43  ;;  %v2234_v10 = vrot.slane %v2233_v55, 4  ;;  %v5289_v48 = vld [vmem:[%s6645_s11 + $0x18] sm:$0xe] }
  0x65   : > { %v453_v11 = vshll.u32 %v230_v50, 16  ;;  %v440_v14 = vor.u32 %v439_v2, %v436_v57  ;;  %v449_v18 = vrot.slane %v447_v6, 4  ;;  %v5304_v21 = vrot.slane %v5288_v58, 9  ;;  %v6923_v53 = vld [vmem:[%s6645_s11 + $0x78] sm:$0xf] }
  0x66   : > { %v2794_v25 = vrot.slane %v2792_v62, 4  ;;  %5739 = vmatmul.mubr.msk.bf16.gmra.mrb[12].mxu1 %vm675_vm3, %v5036_v7  ;;  %v2239_v31 = vsel %vm6671_vm4, %v2234_v10, %v2238_v56  ;;  %v458_v39 = vshrl.u32 %v6891_v0, 16  ;;  %v461_v42 = vshll.u32 %v6891_v0, 16  ;;  %v232_v57 = vld [vmem:[%s6645_s11 + $0x80] sm:$0x1] }
  0x67   : > { %v455_v38 = vrot.slane %v453_v11, 5  ;;  %v5263_v43 = vcombine.low %v2229_v17, %v2239_v31  ;;  %v441_v44 = vrot.slane %v440_v14, 4  ;;  %v450_v45 = vor.u32 %v449_v18, %v445_v5  ;;  %v5290_v10 = vld [vmem:[%s6645_s11 + $0x24] sm:$0xe] }
  0x68   : > { %v2793_v47 = vsel %vm6897_vm7, %v5304_v21, %v2792_v62  ;;  %v2796_v49 = vsel %vm6897_vm7, %v2794_v25, %v2795_v63  ;;  %v460_v50 = vrot.slane %v458_v39, 4  ;;  %v463_v51 = vrot.slane %v461_v42, 5  ;;  %v6949_v39 = vld [vmem:[%s6645_s11 + $0x84] sm:$0xf] }
  0x69   : > { %v467_v52 = vshll.u32 %v6904_v29, 16  ;;  %5875 = vmatmul.mubr.msk.bf16.gmra.mrb[12].mxu0 %vm675_vm3, %v5263_v43  ;;  %v446_v15 = vsel %vm6671_vm4, %v441_v44, %v445_v5  ;;  %v451_v62 = vrot.slane %v450_v45, 4  ;;  %v5321_v55 = vcombine.low %v2793_v47, %v2796_v49  ;;  %v6957_v43 = vld [vmem:[%s6645_s11 + $0x88] sm:$0xf] }
  0x6a   : > { %v471_v56 = vshrl.u32 %v6904_v29, 16  ;;  %v464_v63 = vor.u32 %v463_v51, %v460_v50  ;;  %v477_v61 = vshll.u32 %v231_v26, 16  ;;  %v5305_v2 = vrot.slane %v5289_v48, 9 }
  0x6b   : > { %v469_v58 = vrot.slane %v467_v52, 5  ;;  %v456_v6 = vsel %vm6671_vm4, %v451_v62, %v455_v38  ;;  %5896 = vmatprep.mubr.msk.bf16.mxu0 %vm675_vm3, %v5321_v55  ;;  %v2803_v5 = vsel %vm6897_vm7, %v6714_v30, %v2802_v28  ;;  %v482_v17 = vshrl.u32 %v6923_v53, 16  ;;  %v233_v52 = vld [vmem:[%s6645_s11 + $0x8c] sm:$0x1] }
  0x6c   : > { %v473_v7 = vrot.slane %v471_v56, 4  ;;  %v5037_v11 = vcombine.low %v446_v15, %v456_v6  ;;  %v465_v14 = vrot.slane %v464_v63, 4  ;;  %v479_v18 = vrot.slane %v477_v61, 5 }
  0x6d   : > { %v2800_v21 = vsel %vm6897_vm7, %v5305_v2, %v2799_v22  ;;  %v484_v38 = vrot.slane %v482_v17, 4  ;;  %v485_v1 = vshll.u32 %v6923_v53, 16  ;;  %v491_v30 = vshll.u32 %v6930_v16, 16  ;;  %v6962_v22 = vld [vmem:[%s8477_s1 + $0xe] sm:$0x3] }
  0x6e   : > { %v474_v25 = vor.u32 %v473_v7, %v469_v58  ;;  %v5322_v31 = vcombine.low %v2800_v21, %v2803_v5  ;;  %5742 = vmatprep.mubr.msk.bf16.mxu1 %vm675_vm3, %v5037_v11  ;;  %v470_v28 = vsel %vm6671_vm4, %v465_v14, %v469_v58  ;;  %v495_v60 = vshrl.u32 %v6930_v16, 16  ;;  %v6981_v5 = vld [vmem:[%s6645_s11 + $0x90] sm:$0xf] }
  0x6f   : > { %v501_v42 = vshll.u32 %v232_v57, 16  ;;  %v487_v45 = vrot.slane %v485_v1, 5  ;;  %v5306_v47 = vrot.slane %v5290_v10, 9  ;;  %v2806_v26 = vrot.slane %v6721_v46, 5  ;;  %v5291_v57 = vld [vmem:[%s6645_s11 + $0x30] sm:$0xe] }
  0x70   : > { %v475_v44 = vrot.slane %v474_v25, 4  ;;  %v493_v48 = vrot.slane %v491_v30, 5  ;;  %v497_v49 = vrot.slane %v495_v60, 4  ;;  %v2809_v51 = vrot.slane %v6730_v54, 5  ;;  %v6993_v30 = vld [vmem:[%s6645_s11 + $0x94] sm:$0xf] }
  0x71   : > { %v503_v50 = vrot.slane %v501_v42, 5  ;;  %5897 = vmatmul.mubr.msk.bf16.vlgmr.msra.gmra.mrb[0].mxu0 %vm675_vm3, %v5322_v31  ;;  %v488_v62 = vor.u32 %v487_v45, %v484_v38  ;;  %v2807_v55 = vsel %vm6897_vm7, %v5306_v47, %v2806_v26  ;;  %v2808_v56 = vrot.slane %v2806_v26, 4  ;;  %v234_v60 = vld [vmem:[%s6645_s11 + $0x98] sm:$0x1]  ;;  %v5292_v26 = vld [vmem:[%s6645_s11 + $0x3c] sm:$0xe] }
  0x72   : > { %v480_v15 = vsel %vm6671_vm4, %v475_v44, %v479_v18  ;;  %5929 = vmatpush3.bf16.msra.mxu0 %v6681_v41  ;;  %v498_v46 = vor.u32 %v497_v49, %v493_v48  ;;  %v506_v58 = vshrl.u32 %v6949_v39, 16  ;;  %v509_v54 = vshll.u32 %v6949_v39, 16 }
  0x73   : > { %v5038_v63 = vcombine.low %v470_v28, %v480_v15  ;;  %v489_v61 = vrot.slane %v488_v62, 4  ;;  %v2810_v2 = vsel %vm6897_vm7, %v2808_v56, %v2809_v51  ;;  %v515_v6 = vshll.u32 %v6957_v43, 16  ;;  %6296 = vmatprep.subr.msk.bf16.mxu0 %vm724_vm0, %v6962_v22 }
  0x74   : > { %v519_v7 = vshrl.u32 %v6957_v43, 16  ;;  %v499_v41 = vrot.slane %v498_v46, 4  ;;  %v5323_v17 = vcombine.low %v2807_v55, %v2810_v2  ;;  %v508_v10 = vrot.slane %v506_v58, 4  ;;  %v7013_v46 = vld [vmem:[%s6645_s11 + $0xa0] sm:$0xf] }
  0x75   : > { %5743 = vmatmul.mubr.msk.bf16.gmra.mrb[16].mxu1 %vm675_vm3, %v5038_v63  ;;  %v511_v11 = vrot.slane %v509_v54, 5  ;;  %v494_v14 = vsel %vm6671_vm4, %v489_v61, %v493_v48  ;;  %v517_v18 = vrot.slane %v515_v6, 5  ;;  %v525_v25 = vshll.u32 %v233_v52, 16  ;;  %v7002_v52 = vld [vmem:[%s6645_s11 + $0x9c] sm:$0xf] }
  0x76   : > { %v521_v21 = vrot.slane %v519_v7, 4  ;;  %v504_v31 = vsel %vm6671_vm4, %v499_v41, %v503_v50  ;;  %5900 = vmatprep.mubr.msk.bf16.mxu0 %vm675_vm3, %v5323_v17  ;;  %v5307_v1 = vrot.slane %v5291_v57, 9  ;;  %v2813_v28 = vrot.slane %v6750_v33, 5 }
  0x77   : > { %v512_v38 = vor.u32 %v511_v11, %v508_v10  ;;  %v5039_v42 = vcombine.low %v494_v14, %v504_v31  ;;  %v527_v45 = vrot.slane %v525_v25, 5  ;;  %v2816_v47 = vrot.slane %v6758_v40, 5  ;;  %v235_v10 = vld [vmem:[%s6645_s11 + $0xa4] sm:$0x1]  ;;  %v5293_v11 = vld [vmem:[%s6645_s11 + $0x48] sm:$0xe] }
  0x78   : > { %v522_v44 = vor.u32 %v521_v21, %v517_v18  ;;  %v2814_v49 = vsel %vm6897_vm7, %v5307_v1, %v2813_v28  ;;  %v2815_v50 = vrot.slane %v2813_v28, 4  ;;  %v530_v51 = vshrl.u32 %v6981_v5, 16 }
  0x79   : > { %v513_v48 = vrot.slane %v512_v38, 4  ;;  %5746 = vmatprep.mubr.msk.bf16.mxu1 %vm675_vm3, %v5039_v42  ;;  %v533_v15 = vshll.u32 %v6981_v5, 16  ;;  %v539_v62 = vshll.u32 %v6993_v30, 16  ;;  %v543_v40 = vshrl.u32 %v6993_v30, 16 }
  0x7a   : > { %v523_v33 = vrot.slane %v522_v44, 4  ;;  %v2817_v56 = vsel %vm6897_vm7, %v2815_v50, %v2816_v47  ;;  %v532_v57 = vrot.slane %v530_v51, 4  ;;  %v549_v63 = vshll.u32 %v234_v60, 16 }
  0x7b   : > { %v518_v55 = vsel %vm6671_vm4, %v513_v48, %v517_v18  ;;  %v5324_v54 = vcombine.low %v2814_v49, %v2817_v56  ;;  %v535_v61 = vrot.slane %v533_v15, 5  ;;  %v541_v2 = vrot.slane %v539_v62, 5  ;;  %v7039_v56 = vld [vmem:[%s6645_s11 + $0xac] sm:$0xf] }
  0x7c   : > { %v528_v58 = vsel %vm6671_vm4, %v523_v33, %v527_v45  ;;  %v545_v7 = vrot.slane %v543_v40, 4  ;;  %v551_v41 = vrot.slane %v549_v63, 5  ;;  %v5308_v17 = vrot.slane %v5292_v26, 9  ;;  %v7034_v33 = vld [vmem:[%s6645_s11 + $0xa8] sm:$0xf] }
  0x7d   : > { %v5040_v6 = vcombine.low %v518_v55, %v528_v58  ;;  %5901 = vmatmul.mubr.msk.bf16.gmra.mrb[4].mxu0 %vm675_vm3, %v5324_v54  ;;  %v536_v14 = vor.u32 %v535_v61, %v532_v57  ;;  %v2820_v18 = vrot.slane %v6775_v20, 5  ;;  %v2823_v21 = vrot.slane %v6780_v34, 5  ;;  %v236_v61 = vld [vmem:[%s6645_s11 + $0xb0] sm:$0x1] }
  0x7e   : > { %v554_v25 = vshrl.u32 %v7002_v52, 16  ;;  %v546_v31 = vor.u32 %v545_v7, %v541_v2  ;;  %v557_v38 = vshll.u32 %v7002_v52, 16  ;;  %v563_v1 = vshll.u32 %v7013_v46, 16 }
  0x7f   : > { %5747 = vmatmul.mubr.msk.bf16.gmra.mrb[20].mxu1 %vm675_vm3, %v5040_v6  ;;  %v567_v28 = vshrl.u32 %v7013_v46, 16  ;;  %v537_v60 = vrot.slane %v536_v14, 4  ;;  %v2821_v42 = vsel %vm6897_vm7, %v5308_v17, %v2820_v18  ;;  %v2822_v20 = vrot.slane %v2820_v18, 4  ;;  %v7054_v14 = vld [vmem:[%s6645_s11 + $0xb4] sm:$0xf] }
  0x80   : > { %v556_v44 = vrot.slane %v554_v25, 4  ;;  %v547_v34 = vrot.slane %v546_v31, 4  ;;  %v559_v45 = vrot.slane %v557_v38, 5  ;;  %v565_v47 = vrot.slane %v563_v1, 5 }
  0x81   : > { %v569_v26 = vrot.slane %v567_v28, 4  ;;  %v542_v48 = vsel %vm6671_vm4, %v537_v60, %v541_v2  ;;  %v2824_v49 = vsel %vm6897_vm7, %v2822_v20, %v2823_v21  ;;  %v573_v50 = vshll.u32 %v235_v10, 16  ;;  %v5294_v2 = vld [vmem:[%s6645_s11 + $0x54] sm:$0xe] }
  0x82   : > { %v5309_v51 = vrot.slane %v5293_v11, 9  ;;  %v552_v15 = vsel %vm6671_vm4, %v547_v34, %v551_v41  ;;  %v5325_v62 = vcombine.low %v2821_v42, %v2824_v49  ;;  %v560_v40 = vor.u32 %v559_v45, %v556_v44  ;;  %v7063_v42 = vld [vmem:[%s6645_s11 + $0xb8] sm:$0xf]  ;;  %v237_v49 = vld [vmem:[%s6645_s11 + $0xbc] sm:$0x1] }
  0x83   : > { %v570_v55 = vor.u32 %v569_v26, %v565_v47  ;;  %v5041_v57 = vcombine.low %v542_v48, %v552_v15  ;;  %v575_v63 = vrot.slane %v573_v50, 5  ;;  %v2827_v58 = vrot.slane %v6798_v8, 5 }
  0x84   : > { %v2830_v54 = vrot.slane %v6806_v23, 5  ;;  %5904 = vmatprep.mubr.msk.bf16.mxu0 %vm675_vm3, %v5325_v62  ;;  %v561_v6 = vrot.slane %v560_v40, 4  ;;  %v578_v41 = vshrl.u32 %v7034_v33, 16  ;;  %v581_v17 = vshll.u32 %v7034_v33, 16 }
  0x85   : > { %v571_v7 = vrot.slane %v570_v55, 4  ;;  %5750 = vmatprep.mubr.msk.bf16.mxu1 %vm675_vm3, %v5041_v57  ;;  %v2828_v10 = vsel %vm6897_vm7, %v5309_v51, %v2827_v58  ;;  %v2829_v11 = vrot.slane %v2827_v58, 4  ;;  %v587_v8 = vshll.u32 %v7039_v56, 16  ;;  %v5295_v55 = vld [vmem:[%s6645_s11 + $0x60] sm:$0xe] }
  0x86   : > { %v591_v23 = vshrl.u32 %v7039_v56, 16  ;;  %v566_v18 = vsel %vm6671_vm4, %v561_v6, %v565_v47  ;;  %v580_v25 = vrot.slane %v578_v41, 4  ;;  %v583_v31 = vrot.slane %v581_v17, 5  ;;  %v5296_v6 = vld [vmem:[%s6645_s11 + $0x6c] sm:$0xe] }
  0x87   : > { %v576_v21 = vsel %vm6671_vm4, %v571_v7, %v575_v63  ;;  %v2831_v1 = vsel %vm6897_vm7, %v2829_v11, %v2830_v54  ;;  %v589_v28 = vrot.slane %v587_v8, 5  ;;  %v597_v34 = vshll.u32 %v236_v61, 16  ;;  %v5232_v11 = vld [vmem:[%s6645_s11 + $0x70] sm:$0xf]  ;;  %v5233_v8 = vld [vmem:[%s6645_s11 + $0x74] sm:$0x1] }
  0x88   : > { %v5042_v38 = vcombine.low %v566_v18, %v576_v21  ;;  %v593_v60 = vrot.slane %v591_v23, 4  ;;  %v5326_v20 = vcombine.low %v2828_v10, %v2831_v1  ;;  %v584_v44 = vor.u32 %v583_v31, %v580_v25 }
  0x89   : > { %v5310_v45 = vrot.slane %v5294_v2, 9  ;;  %v2834_v26 = vrot.slane %v6829_v4, 5  ;;  %v2837_v48 = vrot.slane %v6835_v12, 5  ;;  %v602_v50 = vshrl.u32 %v7054_v14, 16 }
  0x8a   : > { %5751 = vmatmul.mubr.msk.bf16.gmra.mrb[24].mxu1 %vm675_vm3, %v5042_v38  ;;  %v594_v47 = vor.u32 %v593_v60, %v589_v28  ;;  %5905 = vmatmul.mubr.msk.bf16.gmra.mrb[8].mxu0 %vm675_vm3, %v5326_v20  ;;  %v585_v51 = vrot.slane %v584_v44, 4  ;;  %v599_v15 = vrot.slane %v597_v34, 5  ;;  %v605_v62 = vshll.u32 %v7054_v14, 16 }
  0x8b   : > { %v611_v40 = vshll.u32 %v7063_v42, 16  ;;  %v2835_v4 = vsel %vm6897_vm7, %v5310_v45, %v2834_v26  ;;  %v2836_v12 = vrot.slane %v2834_v26, 4  ;;  %v604_v63 = vrot.slane %v602_v50, 4 }
  0x8c   : > { %v595_v57 = vrot.slane %v594_v47, 4  ;;  %v590_v58 = vsel %vm6671_vm4, %v585_v51, %v589_v28  ;;  %v607_v54 = vrot.slane %v605_v62, 5  ;;  %v615_v2 = vshrl.u32 %v7063_v42, 16  ;;  %v5297_v47 = vld [vmem:[%s6645_s11 + $0x78] sm:$0xe] }
  0x8d   : > { %v613_v61 = vrot.slane %v611_v40, 5  ;;  %v2838_v41 = vsel %vm6897_vm7, %v2836_v12, %v2837_v48  ;;  %v621_v17 = vshll.u32 %v237_v49, 16  ;;  %v5311_v10 = vrot.slane %v5295_v55, 9  ;;  %v6404_v51 = vld [vmem:[%s6645_s11] sm:$0xf] }
  0x8e   : > { %v600_v7 = vsel %vm6671_vm4, %v595_v57, %v599_v15  ;;  %v5327_v18 = vcombine.low %v2835_v4, %v2838_v41  ;;  %v608_v21 = vor.u32 %v607_v54, %v604_v63  ;;  %v617_v25 = vrot.slane %v615_v2, 4  ;;  %v7101_v15 = vld [vmem:[%s6645_s11 + $0x4] sm:$0xf]  ;;  %v7105_v40 = vld [vmem:[%s6645_s11 + $0x7c] sm:$0xf] }
  0x8f   : > { %v5043_v23 = vcombine.low %v590_v58, %v600_v7  ;;  %v623_v31 = vrot.slane %v621_v17, 5  ;;  %v2841_v38 = vrot.slane %v6859_v59, 5  ;;  %v2844_v1 = vrot.slane %v6866_v9, 5  ;;  %v7108_v55 = vld [vmem:[%s6645_s11 + $0x80] sm:$0x1] }
  0x90   : > { %v5312_v28 = vrot.slane %v5296_v6, 9  ;;  %5908 = vmatprep.mubr.msk.bf16.mxu0 %vm675_vm3, %v5327_v18  ;;  %v609_v60 = vrot.slane %v608_v21, 4  ;;  %v618_v20 = vor.u32 %v617_v25, %v613_v61  ;;  %v2848_v44 = vrot.slane %v5232_v11, 5  ;;  %v5238_v57 = vld [vmem:[%s6645_s11 + $0x88] sm:$0xf] }
  0x91   : > { %5754 = vmatprep.mubr.msk.bf16.mxu1 %vm675_vm3, %v5043_v23  ;;  %v2851_v34 = vrot.slane %v5233_v8, 5  ;;  %v2842_v45 = vsel %vm6897_vm7, %v5311_v10, %v2841_v38  ;;  %v2843_v59 = vrot.slane %v2841_v38, 4  ;;  %v5061_v62 = vcombine.low %v6404_v51, %v7101_v15  ;;  %v5239_v54 = vld [vmem:[%s6645_s11 + $0x8c] sm:$0x1]  ;;  %v5241_v17 = vld [vmem:[%s6645_s11 + $0x94] sm:$0xf] }
  0x92   : > { %v614_v9 = vsel %vm6671_vm4, %v609_v60, %v613_v61  ;;  %v619_v26 = vrot.slane %v618_v20, 4  ;;  %v2849_v48 = vsel %vm6897_vm7, %v5312_v28, %v2848_v44  ;;  %v2850_v49 = vrot.slane %v2848_v44, 4  ;;  %v5298_v61 = vld [vmem:[%s6645_s11 + $0x84] sm:$0xe]  ;;  %v5299_v23 = vld [vmem:[%s6645_s11 + $0x90] sm:$0xe] }
  0x93   : > { %v2845_v50 = vsel %vm6897_vm7, %v2843_v59, %v2844_v1  ;;  %v5313_v58 = vrot.slane %v5297_v47, 9  ;;  %v2855_v7 = vrot.slane %v7105_v40, 5  ;;  %v2858_v41 = vrot.slane %v7108_v55, 5  ;;  %v5242_v25 = vld [vmem:[%s6645_s11 + $0x98] sm:$0x1] }
  0x94   : > { %v624_v4 = vsel %vm6671_vm4, %v619_v26, %v623_v31  ;;  %v5328_v12 = vcombine.low %v2842_v45, %v2845_v50  ;;  %v2852_v63 = vsel %vm6897_vm7, %v2850_v49, %v2851_v34  ;;  %v5314_v10 = vrot.slane %v5298_v61, 9  ;;  %v5244_v31 = vld [vmem:[%s6645_s11 + $0xa0] sm:$0xf]  ;;  %v5245_v60 = vld [vmem:[%s6645_s11 + $0xa4] sm:$0x1] }
  0x95   : > { %v5044_v2 = vcombine.low %v614_v9, %v624_v4  ;;  %v5329_v6 = vcombine.low %v2849_v48, %v2852_v63  ;;  %v2862_v11 = vrot.slane %v5238_v57, 5  ;;  %v2865_v8 = vrot.slane %v5239_v54, 5  ;;  %v5300_v20 = vld [vmem:[%s6645_s11 + $0x9c] sm:$0xe]  ;;  %v6406_v44 = vld [vmem:[%s6645_s11 + $0xc] sm:$0xf] }
  0x96   : > { %5909 = vmatmul.mubr.msk.bf16.gmra.mrb[12].mxu0 %vm675_vm3, %v5328_v12  ;;  %v2856_v18 = vsel %vm6897_vm7, %v5313_v58, %v2855_v7  ;;  %v2857_v21 = vrot.slane %v2855_v7, 4  ;;  %v2869_v28 = vrot.slane %v5241_v17, 5  ;;  %v7135_v34 = vld [vmem:[%s6645_s11 + $0x10] sm:$0xf]  ;;  %v6408_v47 = vld [vmem:[%s6645_s11 + $0x18] sm:$0xf] }
  0x97   : > { %5755 = vmatmul.mubr.msk.bf16.gmra.mrb[28].mxu1 %vm675_vm3, %v5044_v2  ;;  %5912 = vmatprep.mubr.msk.bf16.mxu0 %vm675_vm3, %v5329_v6  ;;  %v2863_v38 = vsel %vm6897_vm7, %v5314_v10, %v2862_v11  ;;  %v2864_v1 = vrot.slane %v2862_v11, 4  ;;  %v5062_v45 = vcombine.low %v6406_v44, %v7135_v34  ;;  %v7142_v9 = vld [vmem:[%s6645_s11 + $0x1c] sm:$0xf]  ;;  %v5315_v48 = vrot.slane %v5299_v23, 9  ;;  %v5247_v57 = vld [vmem:[%s6645_s11 + $0xac] sm:$0xf] }
  0x98   : > { %5760 = vmatprep.mubr.msk.bf16.mxu1 %vm675_vm3, %v5061_v62  ;;  %v2859_v59 = vsel %vm6897_vm7, %v2857_v21, %v2858_v41  ;;  %v5063_v26 = vcombine.low %v6408_v47, %v7142_v9  ;;  %v2871_v51 = vrot.slane %v2869_v28, 4  ;;  %v2872_v62 = vrot.slane %v5242_v25, 5  ;;  %v6410_v54 = vld [vmem:[%s8477_s1 + $0x4] sm:$0x3]  ;;  %v5250_v2 = vld [vmem:[%s6645_s11 + $0xb8] sm:$0xf] }
  0x99   : > { %v5330_v49 = vcombine.low %v2856_v18, %v2859_v59  ;;  %v2866_v50 = vsel %vm6897_vm7, %v2864_v1, %v2865_v8  ;;  %v5316_v12 = vrot.slane %v5300_v20, 9  ;;  %v2876_v63 = vrot.slane %v5244_v31, 5  ;;  %v7157_v7 = vld [vmem:[%s8477_s1 + $0x6] sm:$0x3]  ;;  %v5248_v10 = vld [vmem:[%s6645_s11 + $0xb0] sm:$0x1] }
  0x9a   : > { %v5331_v4 = vcombine.low %v2863_v38, %v2866_v50  ;;  %v2879_v58 = vrot.slane %v5245_v60, 5  ;;  %v1443_v61 = vsel %vm724_vm0, %v6410_v54, 0  ;;  %v2870_v41 = vsel %vm6897_vm7, %v5315_v48, %v2869_v28  ;;  %v5301_v11 = vld [vmem:[%s6645_s11 + $0xa8] sm:$0xe]  ;;  %v5251_v25 = vld [vmem:[%s6645_s11 + $0xbc] sm:$0x1] }
  0x9b   : > { %v2878_v6 = vrot.slane %v2876_v63, 4  ;;  %v2873_v17 = vsel %vm6897_vm7, %v2871_v51, %v2872_v62  ;;  %v2883_v8 = vrot.slane %v5247_v57, 5  ;;  %v2877_v23 = vsel %vm6897_vm7, %v5316_v12, %v2876_v63  ;;  %v5302_v31 = vld [vmem:[%s6645_s11 + $0xb4] sm:$0xe]  ;;  %v6411_v38 = vld [vmem:[%s6645_s11 + $0x24] sm:$0xf] }
  0x9c   : > { %v2890_v21 = vrot.slane %v5250_v2, 5  ;;  %v7178_v1 = vld [vmem:[%s6645_s11 + $0x28] sm:$0xf]  ;;  %v5332_v60 = vcombine.low %v2870_v41, %v2873_v17  ;;  %v5317_v44 = vrot.slane %v5301_v11, 9  ;;  %v2886_v59 = vrot.slane %v5248_v10, 5 }
  0x9d   : > { %v2880_v18 = vsel %vm6897_vm7, %v2878_v6, %v2879_v58  ;;  %v5064_v28 = vcombine.low %v6411_v38, %v7178_v1  ;;  %v6413_v47 = vld [vmem:[%s6645_s11 + $0x30] sm:$0xf]  ;;  %v2893_v51 = vrot.slane %v5251_v25, 5  ;;  %v5253_v62 = vld [vmem:[%s6645_s11 + $0xc4] sm:$0xf]  ;;  %v2278_v25 = vshrl.u32 %v7105_v40, 16 }
  0x9e   : > { %5913 = vmatmul.mubr.msk.bf16.gmra.mrb[16].mxu0 %vm675_vm3, %v5330_v49  ;;  %v5333_v20 = vcombine.low %v2877_v23, %v2880_v18  ;;  %v5318_v49 = vrot.slane %v5302_v31, 9  ;;  %v2892_v50 = vrot.slane %v2890_v21, 4  ;;  %v2884_v57 = vsel %vm6897_vm7, %v5317_v44, %v2883_v8  ;;  %v5303_v12 = vld [vmem:[%s6645_s11 + $0xc0] sm:$0xe]  ;;  %v6415_v41 = vld [vmem:[%s6645_s11 + $0x3c] sm:$0xf] }
  0x9f   : > { %5761 = vmatmul.mubr.msk.bf16.vlgmr.msra.gmra.mrb[0].mxu1 %vm675_vm3, %v5062_v45  ;;  %5916 = vmatprep.mubr.msk.bf16.mxu0 %vm675_vm3, %v5331_v4  ;;  %v2885_v45 = vrot.slane %v2883_v8, 4  ;;  %v2897_v63 = vrot.slane %v5253_v62, 5  ;;  %v5319_v6 = vrot.slane %v5303_v12, 9  ;;  %v7203_v17 = vld [vmem:[%s6645_s11 + $0x40] sm:$0xf]  ;;  %v5067_v18 = vcombine.low %v6810_v27, %v6813_v36  ;;  %v6367_v62 = vld [vmem:[%s6645_s11 + $0x24] sm:$0xff]  }
  0xa0   : > { %5793 = vmatpush3.bf16.msra.mxu1 %v1443_v61  ;;  %5764 = vmatprep.mubr.msk.bf16.mxu1 %vm675_vm3, %v5063_v26  ;;  %v7183_v26 = vld [vmem:[%s6645_s11 + $0x34] sm:$0xf]  ;;  %v2891_v58 = vsel %vm6897_vm7, %v5318_v49, %v2890_v21  ;;  %v2894_v54 = vsel %vm6897_vm7, %v2892_v50, %v2893_v51  ;;  %v5254_v61 = vld [vmem:[%s6645_s11 + $0xc8] sm:$0x1]  ;;  %v5066_v10 = vcombine.low %v6415_v41, %v7203_v17  ;;  %v2274_v21 = vshll.u32 %v7105_v40, 16 }
  0xa1   : > { %6291 = vmatprep.subr.msk.bf16.mxu1 %vm724_vm0, %v7157_v7  ;;  %v5065_v48 = vcombine.low %v6413_v47, %v7183_v26  ;;  %v2887_v4 = vsel %vm6897_vm7, %v2885_v45, %v2886_v59  ;;  %v5335_v11 = vcombine.low %v2891_v58, %v2894_v54  ;;  %v2899_v8 = vrot.slane %v2897_v63, 4  ;;  %v1181_v45 = vld [vmem:[%s6645_s11] sm:$0xe]  ;;  %v1182_v59 = vld [vmem:[%s6645_s11 + $0xc] sm:$0xe] }
  0xa2   : > { %v5334_v2 = vcombine.low %v2884_v57, %v2887_v4  ;;  %v2900_v23 = vrot.slane %v5254_v61, 5  ;;  %v2898_v31 = vsel %vm6897_vm7, %v5319_v6, %v2897_v63  ;;  %v7218_v27 = vrot.slane %v2274_v21, 5  ;;  %v1185_v41 = vld [vmem:[%s6645_s11 + $0x30] sm:$0xe] }
  0xa3   : > { %v2280_v36 = vrot.slane %v2278_v25, 4  ;;  %v5069_v44 = vcombine.low %v6870_v19, %v6876_v35  ;;  %v2284_v47 = vshll.u32 %v7108_v55, 16  ;;  %v5093_v19 = vrot.slane %v1181_v45, 9 }
  0xa4   : > { %v2901_v38 = vsel %vm6897_vm7, %v2899_v8, %v2900_v23  ;;  %8500 = vst [vmem:[#allocation6_spill] sm:$0xff] %v7218_v27  ;;  %v5094_v35 = vrot.slane %v1182_v59, 9  ;;  %v1248_v4 = vrot.slane %v7142_v9, 5  ;;  %v1255_v12 = vrot.slane %v7178_v1, 5  ;;  %v1186_v8 = vld [vmem:[%s6645_s11 + $0x3c] sm:$0xe] }
  0xa5   : > { %v5336_v40 = vcombine.low %v2898_v31, %v2901_v38  ;;  %v2281_v49 = vor.u32 %v2280_v36, %v7218_v27  ;;  %v7238_v51 = vrot.slane %v2284_v47, 5  ;;  %v5070_v58 = vcombine.low %v6891_v0, %v6904_v29  ;;  %v1187_v31 = vld [vmem:[%s6645_s11 + $0x48] sm:$0xe]  ;;  %v6421_v59 = vld [vmem:[%s6645_s11 + $0x38] sm:$0x1] }
  0xa6   : > { %5917 = vmatmul.mubr.msk.bf16.gmra.mrb[20].mxu0 %vm675_vm3, %v5332_v60  ;;  %v5068_v60 = vcombine.low %v6839_v24, %v6845_v37  ;;  %v6418_v24 = vld [vmem:[%s6645_s11 + $0x14] sm:$0x1]  ;;  %v4089_v54 = vsel %vm724_vm0, %v6962_v22, 0  ;;  %v5071_v61 = vcombine.low %v6923_v53, %v6930_v16  ;;  %v5072_v6 = vcombine.low %v6949_v39, %v6957_v43  ;;  %v6419_v16 = vld [vmem:[%s6645_s11 + $0x20] sm:$0x1] }
  0xa7   : > { %5765 = vmatmul.mubr.msk.bf16.gmra.mrb[4].mxu1 %vm675_vm3, %v5064_v28  ;;  %5920 = vmatprep.mubr.msk.bf16.mxu0 %vm675_vm3, %v5333_v20  ;;  %v1241_v28 = vrot.slane %v7135_v34, 5  ;;  %v6365_v20 = vld [vmem:[%s6645_s11 + $0x18] sm:$0xff]   ;;  %v6417_v34 = vld [vmem:[%s6645_s11 + $0x8] sm:$0x1]  ;;  %v1244_v37 = vrot.slane %v6418_v24, 5  ;;  %8501 = vst [vmem:[#allocation7_spill] sm:$0xff] %v7238_v51  ;;  %v5073_v9 = vcombine.low %v6981_v5, %v6993_v30 }
  0xa8   : > { %5768 = vmatprep.mubr.msk.bf16.mxu1 %vm675_vm3, %v5065_v48  ;;  %v1234_v48 = vrot.slane %v7101_v15, 5  ;;  %v1237_v50 = vrot.slane %v6417_v34, 5  ;;  %v1183_v15 = vld [vmem:[%s6645_s11 + $0x18] sm:$0xe]  ;;  %v7243_v63 = vrot.slane %v2281_v49, 4  ;;  %v1251_v22 = vrot.slane %v6419_v16, 5 }
  0xa9   : > { %v1243_v55 = vrot.slane %v1241_v28, 4  ;;  %v5095_v1 = vrot.slane %v1183_v15, 9  ;;  %v7265_v29 = vsel %vm6897_vm7, %v5094_v35, %v1241_v28  ;;  %v1257_v25 = vrot.slane %v1255_v12, 4  ;;  %v5418_v24 = vld [vmem:[%s6645_s11 + $0x18] sm:$0xf] }
  0xaa   : > { %v1236_v57 = vrot.slane %v1234_v48, 4  ;;  %8502 = vst [vmem:[#allocation8_spill] sm:$0xff] %v7243_v63  ;;  %v7261_v0 = vsel %vm6897_vm7, %v5093_v19, %v1234_v48  ;;  %v1265_v47 = vrot.slane %v6421_v59, 5  ;;  %v7302_v49 = vsel %vm724_vm0, %v7157_v7, 0  ;;  %v5419_v7 = vld [vmem:[%s6645_s11 + $0x1c] sm:$0xf] }
  0xab   : > { %v7269_v53 = vsel %vm6897_vm7, %v1243_v55, %v1244_v37  ;;  %v7306_v34 = vsel %vm6897_vm7, %v5095_v1, %v1248_v4  ;;  %v6371_v37 = vld [vmem:[%s6645_s11 + $0x3c] sm:$0xff]   ;;  %v5098_v35 = vrot.slane %v1186_v8, 9  ;;  %v6422_v55 = vld [vmem:[%s6645_s11 + $0x44] sm:$0x1]  ;;  %v3610_v8 = vshll.u32 %v5418_v24, 16 }
  0xac   : > { %v7280_v23 = vsel %vm6897_vm7, %v1236_v57, %v1237_v50  ;;  %v1188_v50 = vld [vmem:[%s6645_s11 + $0x54] sm:$0xe]  ;;  %v1272_v15 = vrot.slane %v6422_v55, 5  ;;  %v5422_v39 = vld [vmem:[%s6645_s11 + $0x28] sm:$0xf] }
  0xad   : > { %v6429_v5 = vld [vmem:[%s6645_s11 + $0x70] sm:$0xf] }
  0xae   : > { %5921 = vmatmul.mubr.msk.bf16.gmra.mrb[24].mxu0 %vm675_vm3, %v5334_v2  ;;  %v1184_v2 = vld [vmem:[%s6645_s11 + $0x24] sm:$0xe]  ;;  %v1297_v30 = vrot.slane %v6429_v5, 5 }
  0xaf   : > { %5769 = vmatmul.mubr.msk.bf16.gmra.mrb[8].mxu1 %vm675_vm3, %v5066_v10  ;;  %5924 = vmatprep.mubr.msk.bf16.mxu0 %vm675_vm3, %v5335_v11  ;;  %v1262_v10 = vrot.slane %v7183_v26, 5  ;;  %v6369_v11 = vld [vmem:[%s6645_s11 + $0x30] sm:$0xff]   ;;  %v5096_v21 = vrot.slane %v1184_v2, 9 }
  0xb0   : > { %5772 = vmatprep.mubr.msk.bf16.mxu1 %vm675_vm3, %v5067_v18  ;;  %v7276_v26 = vld [vmem:[%s8477_s1 + $0x10] sm:$0x3]  ;;  %v1250_v18 = vrot.slane %v1248_v4, 4  ;;  %v1299_v48 = vrot.slane %v1297_v30, 4 }
  0xb1   : > { %v1264_v45 = vrot.slane %v1262_v10, 4  ;;  %v7313_v19 = vsel %vm6897_vm7, %v5096_v21, %v1255_v12  ;;  %v3620_v21 = vshrl.u32 %v5419_v7, 16 }
  0xb2   : > { %v7322_v4 = vsel %vm6897_vm7, %v1250_v18, %v1251_v22  ;;  %v3607_v22 = vshrl.u32 %v5418_v24, 16  ;;  %v3616_v18 = vshll.u32 %v5419_v7, 16  ;;  %v5421_v24 = vld [vmem:[%s6645_s11 + $0x24] sm:$0xf] }
  0xb3   : > { %v7335_v1 = vsel %vm6897_vm7, %v1264_v45, %v1265_v47 }
  0xb4   : > { %v3609_v43 = vrot.slane %v3607_v22, 4  ;;  %v7377_v7 = vrot.slane %v3616_v18, 5  ;;  %v3634_v22 = vshll.u32 %v5421_v24, 16  ;;  %v3644_v18 = vshrl.u32 %v5422_v39, 16 }
  0xb6   : > { %5925 = vmatmul.mubr.msk.bf16.gmra.mrb[28].mxu0 %vm675_vm3, %v5336_v40  ;;  %v6420_v40 = vld [vmem:[%s6645_s11 + $0x2c] sm:$0x1]  ;;  %v3636_v27 = vrot.slane %v3634_v22, 5 }
  0xb7   : > { %5773 = vmatmul.mubr.msk.bf16.gmra.mrb[12].mxu1 %vm675_vm3, %v5068_v60  ;;  %5930 = vmatprep.mubr.msk.bf16.mxu0 %vm675_vm3, %v6365_v20  ;;  %v1258_v28 = vrot.slane %v6420_v40, 5  ;;  %v1269_v60 = vrot.slane %v7203_v17, 5  ;;  %v6425_v40 = vld [vmem:[%s6645_s11 + $0x50] sm:$0x1]  ;;  %v6430_v17 = vld [vmem:[%s6645_s11 + $0x74] sm:$0x1] }
  0xb8   : > { %5776 = vmatprep.mubr.msk.bf16.mxu1 %vm675_vm3, %v5069_v44  ;;  %v5097_v44 = vrot.slane %v1185_v41, 9  ;;  %v5100_v41 = vrot.slane %v1188_v50, 9  ;;  %v1189_v50 = vld [vmem:[%s6645_s11 + $0x60] sm:$0xe]  ;;  %v5423_v20 = vld [vmem:[%s6645_s11 + $0x2c] sm:$0x1] }
  0xb9   : > { %v1271_v12 = vrot.slane %v1269_v60, 4  ;;  %v7348_v45 = vsel %vm6897_vm7, %v5098_v35, %v1269_v60  ;;  %v6426_v35 = vld [vmem:[%s6645_s11 + $0x5c] sm:$0x1] }
  0xba   : > { %v7331_v2 = vsel %vm6897_vm7, %v5097_v44, %v1262_v10  ;;  %v1286_v55 = vrot.slane %v6426_v35, 5  ;;  %v1190_v35 = vld [vmem:[%s6645_s11 + $0x6c] sm:$0xe] }
  0xbb   : > { %v7352_v59 = vsel %vm6897_vm7, %v1271_v12, %v1272_v15  ;;  %v6427_v15 = vld [vmem:[%s6645_s11 + $0x64] sm:$0xf]  ;;  %v3622_v12 = vrot.slane %v3620_v21, 4  ;;  %v5102_v5 = vrot.slane %v1190_v35, 9 }
  0xbc   : > { %v6377_v21 = vld [vmem:[%s6645_s11 + $0x60] sm:$0xff]  }
  0xbe   : > { %5931 = vmatmul.mubr.msk.bf16.vlgmr.msra.gmra.mrb[0].mxu0 %vm675_vm3, %v6367_v62  ;;  %v6423_v62 = vld [vmem:[%s6645_s11 + $0x4c] sm:$0xf] }
  0xbf   : > { %5777 = vmatmul.mubr.msk.bf16.gmra.mrb[16].mxu1 %vm675_vm3, %v5070_v58  ;;  %5963 = vmatpush3.bf16.msra.mxu0 %v4089_v54  ;;  %v1276_v57 = vrot.slane %v6423_v62, 5  ;;  %v7326_v58 = vsel %vm6897_vm7, %v1257_v25, %v1258_v28  ;;  %v5099_v54 = vrot.slane %v1187_v31, 9  ;;  %v1279_v28 = vrot.slane %v6425_v40, 5 }
  0xc0   : > { %5780 = vmatprep.mubr.msk.bf16.mxu1 %vm675_vm3, %v5071_v61  ;;  %5934 = vmatprep.mubr.msk.bf16.mxu0 %vm675_vm3, %v6369_v11  ;;  %v6373_v61 = vld [vmem:[%s6645_s11 + $0x48] sm:$0xff]   ;;  %v6424_v11 = vld [vmem:[%s6645_s11 + $0x58] sm:$0xf]  ;;  %v1290_v62 = vrot.slane %v6427_v15, 5  ;;  %v5425_v15 = vld [vmem:[%s6645_s11 + $0x34] sm:$0xf] }
  0xc1   : > { %6297 = vmatprep.subr.msk.bf16.mxu0 %vm724_vm0, %v7276_v26  ;;  %v1283_v16 = vrot.slane %v6424_v11, 5  ;;  %v1278_v31 = vrot.slane %v1276_v57, 4  ;;  %v7356_v47 = vsel %vm6897_vm7, %v5099_v54, %v1276_v57  ;;  %v5420_v57 = vld [vmem:[%s6645_s11 + $0x20] sm:$0x1]  ;;  %v5424_v54 = vld [vmem:[%s6645_s11 + $0x30] sm:$0xf] }
  0xc2   : > { %v5101_v11 = vrot.slane %v1189_v50, 9  ;;  %v3658_v50 = vshll.u32 %v5424_v54, 16  ;;  %v3626_v25 = vshll.u32 %v5420_v57, 16  ;;  %v3664_v36 = vshll.u32 %v5425_v15, 16 }
  0xc3   : > { %v7367_v60 = vsel %vm6897_vm7, %v5100_v41, %v1283_v16  ;;  %v7383_v41 = vsel %vm6897_vm7, %v1278_v31, %v1279_v28  ;;  %v1292_v31 = vrot.slane %v1290_v62, 4  ;;  %v3655_v28 = vshrl.u32 %v5424_v54, 16 }
  0xc4   : > { %v7425_v35 = vrot.slane %v3664_v36, 5 }
  0xc6   : > { %5935 = vmatmul.mubr.msk.bf16.gmra.mrb[4].mxu0 %vm675_vm3, %v6371_v37  ;;  %v1285_v37 = vrot.slane %v1283_v16, 4  ;;  %v6428_v16 = vld [vmem:[%s6645_s11 + $0x68] sm:$0x1] }
  0xc7   : > { %5781 = vmatmul.mubr.msk.bf16.gmra.mrb[20].mxu1 %vm675_vm3, %v5072_v6  ;;  %5938 = vmatprep.mubr.msk.bf16.mxu0 %vm675_vm3, %v6373_v61  ;;  %v3612_v6 = vrot.slane %v3610_v8, 5  ;;  %v6375_v61 = vld [vmem:[%s6645_s11 + $0x54] sm:$0xff]   ;;  %v1293_v40 = vrot.slane %v6428_v16, 5  ;;  %v3640_v8 = vshll.u32 %v5422_v39, 16  ;;  %v3623_v16 = vor.u32 %v3622_v12, %v7377_v7 }
  0xc8   : > { %5784 = vmatprep.mubr.msk.bf16.mxu1 %vm675_vm3, %v5073_v9  ;;  %v3631_v9 = vshrl.u32 %v5421_v24, 16  ;;  %v7392_v44 = vsel %vm6897_vm7, %v1285_v37, %v1286_v55  ;;  %v1300_v24 = vrot.slane %v6430_v17, 5  ;;  %v3668_v39 = vshrl.u32 %v5425_v15, 16 }
  0xc9   : > { %v3613_v10 = vor.u32 %v3612_v6, %v3609_v43  ;;  %v7398_v37 = vrot.slane %v3640_v8, 5  ;;  %v3646_v55 = vrot.slane %v3644_v18, 4  ;;  %v8503_v43 = vcombine.low %v7002_v52, %v7013_v46  ;;  %v6431_v8 = vld [vmem:[%s6645_s11 + $0x7c] sm:$0xf]  ;;  %v7434_v18 = vld [vmem:[%s6645_s11 + $0x38] sm:$0x1] }
  0xca   : > { %v3633_v38 = vrot.slane %v3631_v9, 4  ;;  %v7407_v17 = vsel %vm6897_vm7, %v5101_v11, %v1290_v62  ;;  %v7411_v57 = vsel %vm6897_vm7, %v1292_v31, %v1293_v40  ;;  %v3657_v6 = vrot.slane %v3655_v28, 4  ;;  %8505 = vst [vmem:[#allocation9_spill] sm:$0xff] %v7434_v18 }
  0xcb   : > { %v3660_v12 = vrot.slane %v3658_v50, 5  ;;  %v8504_v52 = vcombine.low %v7034_v33, %v7039_v56  ;;  %v3614_v46 = vrot.slane %v3613_v10, 4  ;;  %v3624_v54 = vrot.slane %v3623_v16, 4  ;;  %v6379_v33 = vld [vmem:[%s6645_s11 + $0x6c] sm:$0xff]   ;;  %v1192_v16 = vld [vmem:[%s6645_s11 + $0x84] sm:$0xe] }
  0xcc   : > { %v3650_v62 = vshll.u32 %v5423_v20, 16  ;;  %v7419_v11 = vsel %vm6897_vm7, %v5102_v5, %v1297_v30  ;;  %v7423_v40 = vsel %vm6897_vm7, %v1299_v48, %v1300_v24  ;;  %v3670_v9 = vrot.slane %v3668_v39, 4  ;;  %v6380_v48 = vld [vmem:[%s6645_s11 + $0x78] sm:$0xff]  }
  0xcd   : > { %v3637_v10 = vor.u32 %v3636_v27, %v3633_v38  ;;  %v3647_v20 = vor.u32 %v3646_v55, %v7398_v37  ;;  %v1304_v30 = vrot.slane %v6431_v8, 5  ;;  %v3661_v38 = vor.u32 %v3660_v12, %v3657_v6  ;;  %v5427_v5 = vld [vmem:[%s6645_s11 + $0x3c] sm:$0xf] }
  0xce   : > { %5939 = vmatmul.mubr.msk.bf16.gmra.mrb[8].mxu0 %vm675_vm3, %v6375_v61  ;;  %v3628_v61 = vrot.slane %v3626_v25, 5  ;;  %v1191_v25 = vld [vmem:[%s6645_s11 + $0x78] sm:$0xe]  ;;  %v7450_v50 = vrot.slane %v3650_v62, 5  ;;  %v3671_v39 = vor.u32 %v3670_v9, %v7425_v35  ;;  %v3674_v55 = vshll.u32 %v7434_v18, 16 }
  0xcf   : > { %5785 = vmatmul.mubr.msk.bf16.gmra.mrb[24].mxu1 %vm675_vm3, %v8503_v43  ;;  %5942 = vmatprep.mubr.msk.bf16.mxu0 %vm675_vm3, %v6377_v21  ;;  %v3619_v21 = vsel %vm6671_vm4, %v3614_v46, %v7377_v7  ;;  %v5103_v24 = vrot.slane %v1191_v25, 9  ;;  %v6432_v43 = vld [vmem:[%s6645_s11 + $0x88] sm:$0xf]  ;;  %v7458_v7 = vld [vmem:[%s6645_s11 + $0x40] sm:$0xf]  ;;  %v3638_v12 = vrot.slane %v3637_v10, 4  ;;  %v8507_v62 = vcombine.low %v7054_v14, %v7063_v42 }
  0xd0   : > { %5788 = vmatprep.mubr.msk.bf16.mxu1 %vm675_vm3, %v8504_v52  ;;  %v3629_v31 = vsel %vm6671_vm4, %v3624_v54, %v3628_v61  ;;  %v1311_v6 = vrot.slane %v6432_v43, 5  ;;  %8506 = vst [vmem:[#allocation10_spill] sm:$0xff] %v7458_v7  ;;  %v3648_v52 = vrot.slane %v3647_v20, 4  ;;  %v1306_v46 = vrot.slane %v1304_v30, 4  ;;  %v6433_v54 = vld [vmem:[%s6645_s11 + $0x80] sm:$0x1] }
  0xd1   : > { %v1307_v61 = vrot.slane %v6433_v54, 5  ;;  %v3662_v9 = vrot.slane %v3661_v38, 4  ;;  %v5104_v25 = vrot.slane %v1192_v16, 9  ;;  %v3679_v8 = vshrl.u32 %v5427_v5, 16  ;;  %v6381_v10 = vld [vmem:[%s6645_s11 + $0x84] sm:$0xff]  }
  0xd2   : > { %v3682_v43 = vshll.u32 %v5427_v5, 16  ;;  %v7472_v20 = vcombine.low %v3619_v21, %v3629_v31  ;;  %v7476_v14 = vsel %vm724_vm0, %v7276_v26, 0  ;;  %v3692_v38 = vshrl.u32 %v7458_v7, 16  ;;  %v6382_v21 = vld [vmem:[%s6645_s11 + $0x90] sm:$0xff]   ;;  %v6438_v18 = vld [vmem:[%s6645_s11 + $0xa0] sm:$0xf] }
  0xd3   : > { %v3672_v16 = vrot.slane %v3671_v39, 4  ;;  %v3676_v5 = vrot.slane %v3674_v55, 5  ;;  %v1313_v54 = vrot.slane %v1311_v6, 4  ;;  %v3643_v31 = vsel %vm6671_vm4, %v3638_v12, %v7398_v37 }
  0xd4   : > { %v3653_v26 = vsel %vm6671_vm4, %v3648_v52, %v7450_v50  ;;  %v7491_v39 = vsel %vm6897_vm7, %v5103_v24, %v1304_v30  ;;  %v7495_v55 = vsel %vm6897_vm7, %v1306_v46, %v1307_v61  ;;  %v3667_v37 = vsel %vm6671_vm4, %v3662_v9, %v7425_v35  ;;  %v5433_v30 = vld [vmem:[%s6645_s11 + $0x54] sm:$0xf]  ;;  %v7512_v24 = vld [vmem:[%s6645_s11 + $0x58] sm:$0xf]  ;;  %v7517_v61 = vld [vmem:[%s6645_s11 + $0x90] sm:$0xe] }
  0xd5   : > { %v7508_v12 = vsel %vm6897_vm7, %v5104_v25, %v1311_v6  ;;  %v3681_v50 = vrot.slane %v3679_v8, 4  ;;  %v3684_v52 = vrot.slane %v3682_v43, 5  ;;  %v3694_v46 = vrot.slane %v3692_v38, 4 }
  0xd6   : > { %5943 = vmatmul.mubr.msk.bf16.gmra.mrb[12].mxu0 %vm675_vm3, %v6379_v33  ;;  %v8508_v33 = vcombine.low %v7261_v0, %v7280_v23  ;;  %v6434_v0 = vld [vmem:[%s6645_s11 + $0x8c] sm:$0x1]  ;;  %v3677_v36 = vsel %vm6671_vm4, %v3672_v16, %v3676_v5  ;;  %v3727_v25 = vshrl.u32 %v5433_v30, 16  ;;  %v3730_v8 = vshll.u32 %v5433_v30, 16 }
  0xd7   : > { %5789 = vmatmul.mubr.msk.bf16.gmra.mrb[28].mxu1 %vm675_vm3, %v8507_v62  ;;  %5946 = vmatprep.mubr.msk.bf16.mxu0 %vm675_vm3, %v6380_v48  ;;  %v3688_v48 = vshll.u32 %v7458_v7, 16  ;;  %v1314_v23 = vrot.slane %v6434_v0, 5  ;;  %v5430_v62 = vld [vmem:[%s6645_s11 + $0x48] sm:$0xf]  ;;  %v7501_v0 = vld [vmem:[%s6645_s11 + $0x4c] sm:$0xf]  ;;  %v8510_v38 = vcombine.low %v7265_v29, %v7269_v53  ;;  %v7535_v16 = vcombine.low %v3643_v31, %v3653_v26 }
  0xd8   : > { %5794 = vmatprep.mubr.msk.bf16.mxu1 %vm675_vm3, %v8508_v33  ;;  %v7498_v33 = vld [vmem:[%s6645_s11 + $0x44] sm:$0x1]  ;;  %v3703_v27 = vshrl.u32 %v5430_v62, 16  ;;  %v3706_v15 = vshll.u32 %v5430_v62, 16  ;;  %v3712_v6 = vshll.u32 %v7501_v0, 16  ;;  %v3716_v9 = vshrl.u32 %v7501_v0, 16 }
  0xd9   : > { %8509 = vst [vmem:[#allocation11_spill] sm:$0xff] %v7498_v33  ;;  %v7514_v28 = vrot.slane %v3688_v48, 5  ;;  %v7523_v35 = vsel %vm6897_vm7, %v1313_v54, %v1314_v23  ;;  %v3736_v43 = vshll.u32 %v7512_v24, 16  ;;  %v3740_v48 = vshrl.u32 %v7512_v24, 16  ;;  %v5436_v31 = vld [vmem:[%s6645_s11 + $0x60] sm:$0xf] }
  0xda   : > { %v3698_v5 = vshll.u32 %v7498_v33, 16  ;;  %v5105_v54 = vrot.slane %v7517_v61, 9  ;;  %v8511_v23 = vcombine.low %v7306_v34, %v7322_v4  ;;  %v7546_v29 = vcombine.low %v3667_v37, %v3677_v36  ;;  %v6383_v26 = vld [vmem:[%s6645_s11 + $0x9c] sm:$0xff]   ;;  %v6384_v30 = vld [vmem:[%s6645_s11 + $0xa8] sm:$0xff]  }
  0xdb   : > { %v3685_v53 = vor.u32 %v3684_v52, %v3681_v50  ;;  %v3705_v62 = vrot.slane %v3703_v27, 4  ;;  %v7557_v34 = vrot.slane %v3712_v6, 5  ;;  %v3718_v4 = vrot.slane %v3716_v9, 4  ;;  %v6435_v36 = vld [vmem:[%s8477_s1 + $0x8] sm:$0x3] }
  0xdc   : > { %v3729_v27 = vrot.slane %v3727_v25, 4  ;;  %v3732_v37 = vrot.slane %v3730_v8, 5  ;;  %v7566_v50 = vrot.slane %v3736_v43, 5  ;;  %v3742_v52 = vrot.slane %v3740_v48, 4  ;;  %v6436_v6 = vld [vmem:[%s6645_s11 + $0x94] sm:$0xf] }
  0xdd   : > { %v7572_v9 = vld [vmem:[%s6645_s11 + $0x64] sm:$0xf]  ;;  %v3751_v61 = vshrl.u32 %v5436_v31, 16  ;;  %v7574_v22 = vrot.slane %v3685_v53, 4  ;;  %v1325_v25 = vrot.slane %v6438_v18, 5  ;;  %v3719_v43 = vor.u32 %v3718_v4, %v7557_v34 }
  0xde   : > { %5947 = vmatmul.mubr.msk.bf16.gmra.mrb[16].mxu0 %vm675_vm3, %v6381_v10  ;;  %8512 = vst [vmem:[#allocation12_spill] sm:$0xff] %v7572_v9  ;;  %v3754_v10 = vshll.u32 %v5436_v31, 16  ;;  %v3733_v31 = vor.u32 %v3732_v37, %v3729_v27  ;;  %v3743_v53 = vor.u32 %v3742_v52, %v7566_v50  ;;  %v8513_v18 = vcombine.low %v7313_v19, %v7326_v58  ;;  %v6385_v37 = vld [vmem:[%s6645_s11 + $0xb4] sm:$0xff]  }
  0xdf   : > { %5795 = vmatmul.mubr.msk.bf16.vlgmr.msra.gmra.mrb[0].mxu1 %vm675_vm3, %v8510_v38  ;;  %5950 = vmatprep.mubr.msk.bf16.mxu0 %vm675_vm3, %v6382_v21  ;;  %v3708_v21 = vrot.slane %v3706_v15, 5  ;;  %v7555_v38 = vld [vmem:[%s6645_s11 + $0x50] sm:$0x1]  ;;  %v7564_v15 = vld [vmem:[%s6645_s11 + $0x5c] sm:$0x1]  ;;  %v8514_v27 = vcombine.low %v7331_v2, %v7335_v1  ;;  %v1327_v52 = vrot.slane %v1325_v25, 4 }
  0xe0   : > { %5827 = vmatpush3.bf16.msra.mxu1 %v7302_v49  ;;  %5798 = vmatprep.mubr.msk.bf16.mxu1 %vm675_vm3, %v8511_v23  ;;  %v3695_v49 = vor.u32 %v3694_v46, %v7514_v28  ;;  %v7568_v46 = vrot.slane %v3698_v5, 5  ;;  %v1318_v23 = vrot.slane %v6436_v6, 5  ;;  %v3722_v48 = vshll.u32 %v7555_v38, 16  ;;  %v1194_v5 = vld [vmem:[%s6645_s11 + $0x9c] sm:$0xe] }
  0xe1   : > { %6293 = vmatprep.subr.msk.bf16.mxu1 %vm724_vm0, %v6435_v36  ;;  %v6437_v36 = vld [vmem:[%s6645_s11 + $0x98] sm:$0x1]  ;;  %v3709_v7 = vor.u32 %v3708_v21, %v3705_v62  ;;  %v3746_v6 = vshll.u32 %v7564_v15, 16  ;;  %v3764_v62 = vshrl.u32 %v7572_v9, 16  ;;  %v3756_v4 = vrot.slane %v3754_v10, 5 }
  0xe2   : > { %v1321_v33 = vrot.slane %v6437_v36, 5  ;;  %v3696_v8 = vrot.slane %v3695_v49, 4  ;;  %v3760_v36 = vshll.u32 %v7572_v9, 16  ;;  %v7593_v21 = vsel %vm6897_vm7, %v5105_v54, %v1318_v23  ;;  %v7604_v2 = vld [vmem:[%s6645_s11 + $0x68] sm:$0x1] }
  0xe3   : > { %v3753_v49 = vrot.slane %v3751_v61, 4  ;;  %v3710_v19 = vrot.slane %v3709_v7, 4  ;;  %v5106_v58 = vrot.slane %v1194_v5, 9  ;;  %v3720_v3 = vrot.slane %v3719_v43, 4  ;;  %8515 = vst [vmem:[#allocation13_spill] sm:$0xff] %v7604_v2  ;;  %v6386_v5 = vld [vmem:[%s6645_s11 + $0xc0] sm:$0xff]  }
  0xe4   : > { %v3724_v54 = vrot.slane %v3722_v48, 5  ;;  %v3748_v63 = vrot.slane %v3746_v6, 5  ;;  %v1332_v61 = vrot.slane %v7039_v56, 5  ;;  %v3734_v10 = vrot.slane %v3733_v31, 4  ;;  %v1196_v31 = vld [vmem:[%s6645_s11 + $0xb4] sm:$0xe] }
  0xe5   : > { %v3744_v51 = vrot.slane %v3743_v53, 4  ;;  %v7606_v1 = vrot.slane %v3760_v36, 5  ;;  %v3766_v7 = vrot.slane %v3764_v62, 4  ;;  %v3691_v43 = vsel %vm6671_vm4, %v7574_v22, %v7514_v28  ;;  %v6440_v62 = vld [vmem:[%s6645_s11 + $0xb0] sm:$0x1] }
  0xe6   : > { %5951 = vmatmul.mubr.msk.bf16.gmra.mrb[20].mxu0 %vm675_vm3, %v6383_v26  ;;  %v1320_v26 = vrot.slane %v1318_v23, 4  ;;  %v1195_v23 = vld [vmem:[%s6645_s11 + $0xa8] sm:$0xe]  ;;  %v3701_v48 = vsel %vm6671_vm4, %v3696_v8, %v7568_v46  ;;  %v3757_v6 = vor.u32 %v3756_v4, %v3753_v49  ;;  %v3715_v53 = vsel %vm6671_vm4, %v3710_v19, %v7557_v34  ;;  %v5439_v46 = vld [vmem:[%s6645_s11 + $0x6c] sm:$0xf] }
  0xe7   : > { %5799 = vmatmul.mubr.msk.bf16.gmra.mrb[4].mxu1 %vm675_vm3, %v8513_v18  ;;  %5954 = vmatprep.mubr.msk.bf16.mxu0 %vm675_vm3, %v6384_v30  ;;  %v6439_v18 = vld [vmem:[%s6645_s11 + $0xa4] sm:$0x1]  ;;  %v7626_v36 = vsel %vm6897_vm7, %v5106_v58, %v1325_v25  ;;  %v5107_v28 = vrot.slane %v1195_v23, 9  ;;  %v1334_v8 = vrot.slane %v1332_v61, 4  ;;  %v3770_v49 = vshll.u32 %v7604_v2, 16 }
  0xe8   : > { %5802 = vmatprep.mubr.msk.bf16.mxu1 %vm675_vm3, %v8514_v27  ;;  %v1328_v30 = vrot.slane %v6439_v18, 5  ;;  %v7618_v56 = vsel %vm6897_vm7, %v1320_v26, %v1321_v33  ;;  %v3725_v33 = vsel %vm6671_vm4, %v3720_v3, %v3724_v54  ;;  %v1335_v26 = vrot.slane %v6440_v62, 5  ;;  %v5442_v18 = vld [vmem:[%s6645_s11 + $0x78] sm:$0xf]  ;;  %v7681_v54 = vld [vmem:[%s6645_s11 + $0xbc] sm:$0x1] }
  0xe9   : > { %v3739_v34 = vsel %vm6671_vm4, %v3734_v10, %v7566_v50  ;;  %v3749_v25 = vsel %vm6671_vm4, %v3744_v51, %v3748_v63  ;;  %v3767_v4 = vor.u32 %v3766_v7, %v7606_v1  ;;  %v5108_v27 = vrot.slane %v1196_v31, 9  ;;  %v7655_v51 = vld [vmem:[%s6645_s11 + $0x70] sm:$0xf]  ;;  %v7685_v10 = vld [vmem:[%s6645_s11 + $0x7c] sm:$0xf] }
  0xea   : > { %v7630_v22 = vsel %vm6897_vm7, %v1327_v52, %v1328_v30  ;;  %v8517_v3 = vcombine.low %v7348_v45, %v7352_v59  ;;  %v7651_v19 = vrot.slane %v3757_v6, 4  ;;  %v1339_v50 = vrot.slane %v7063_v42, 5  ;;  %8518 = vst [vmem:[#allocation15_spill] sm:$0xff] %v7655_v51  ;;  %8520 = vst [vmem:[#allocation16_spill] sm:$0xff] %v7685_v10  ;;  %v5445_v7 = vld [vmem:[%s6645_s11 + $0x84] sm:$0xf] }
  0xeb   : > { %8516 = vst [vmem:[#allocation14_spill] sm:$0xff] %v7630_v22  ;;  %v3775_v63 = vshrl.u32 %v5439_v46, 16  ;;  %v8519_v45 = vcombine.low %v7356_v47, %v7383_v41  ;;  %v7663_v58 = vcombine.low %v3715_v53, %v3725_v33  ;;  %v7669_v42 = vsel %vm6897_vm7, %v5107_v28, %v1332_v61  ;;  %v6387_v61 = vld [vmem:[%s6645_s11 + $0xcc] sm:$0xff]   ;;  %v7697_v31 = vld [vmem:[%s6645_s11 + $0x88] sm:$0xf] }
  0xec   : > { %v7672_v30 = vcombine.low %v3739_v34, %v3749_v25  ;;  %v7676_v47 = vsel %vm6897_vm7, %v1334_v8, %v1335_v26  ;;  %v7678_v41 = vrot.slane %v3770_v49, 5  ;;  %v3784_v6 = vshll.u32 %v7655_v51, 16  ;;  %8521 = vst [vmem:[#allocation17_spill] sm:$0xff] %v7697_v31  ;;  %v5448_v62 = vld [vmem:[%s6645_s11 + $0x90] sm:$0xf] }
  0xed   : > { %v7703_v28 = vrot.slane %v1339_v50, 4  ;;  %v7705_v33 = vrot.slane %v3775_v63, 4  ;;  %v3788_v8 = vshrl.u32 %v7655_v51, 16  ;;  %v3799_v26 = vshrl.u32 %v5442_v18, 16  ;;  %v7712_v25 = vld [vmem:[%s6645_s11 + $0x94] sm:$0xf] }
  0xee   : > { %5955 = vmatmul.mubr.msk.bf16.gmra.mrb[24].mxu0 %vm675_vm3, %v6385_v37  ;;  %v7649_v37 = vcombine.low %v3691_v43, %v3701_v48  ;;  %v7693_v43 = vsel %vm6897_vm7, %v5108_v27, %v1339_v50  ;;  %v3778_v48 = vshll.u32 %v5439_v46, 16  ;;  %v3802_v49 = vshll.u32 %v5442_v18, 16  ;;  %8522 = vst [vmem:[#allocation18_spill] sm:$0xff] %v7712_v25  ;;  %v7750_v2 = vld [vmem:[%s6645_s11 + $0x8c] sm:$0x1] }
  0xef   : > { %5803 = vmatmul.mubr.msk.bf16.gmra.mrb[8].mxu1 %vm675_vm3, %v8517_v3  ;;  %5958 = vmatprep.mubr.msk.bf16.mxu0 %vm675_vm3, %v6386_v5  ;;  %v7689_v5 = vrot.slane %v3767_v4, 4  ;;  %v3808_v46 = vshll.u32 %v7685_v10, 16  ;;  %v3812_v34 = vshrl.u32 %v7685_v10, 16  ;;  %v3823_v4 = vshrl.u32 %v5445_v7, 16 }
  0xf0   : > { %5806 = vmatprep.mubr.msk.bf16.mxu1 %vm675_vm3, %v8519_v45  ;;  %v3826_v27 = vshll.u32 %v5445_v7, 16  ;;  %v3832_v3 = vshll.u32 %v7697_v31, 16  ;;  %v3836_v50 = vshrl.u32 %v7697_v31, 16  ;;  %v7722_v45 = vld [vmem:[%s6645_s11 + $0x74] sm:$0x1]  ;;  %v3780_v18 = vrot.slane %v3778_v48, 5 }
  0xf1   : > { %v3847_v52 = vshrl.u32 %v5448_v62, 16  ;;  %v3850_v53 = vshll.u32 %v5448_v62, 16  ;;  %v8523_v7 = vcombine.low %v7367_v60, %v7392_v44  ;;  %v3790_v59 = vrot.slane %v3788_v8, 4  ;;  %v5451_v48 = vld [vmem:[%s6645_s11 + $0x9c] sm:$0xf] }
  0xf2   : > { %v3856_v63 = vshll.u32 %v7712_v25, 16  ;;  %v3860_v23 = vshrl.u32 %v7712_v25, 16  ;;  %v8524_v62 = vcombine.low %v7407_v17, %v7411_v57  ;;  %v7740_v44 = vld [vmem:[%s6645_s11 + $0x80] sm:$0x1]  ;;  %v3801_v60 = vrot.slane %v3799_v26, 4 }
  0xf3   : > { %8525 = vst [vmem:[#allocation19_spill] sm:$0xff] %v7740_v44  ;;  %v3825_v31 = vrot.slane %v3823_v4, 4  ;;  %v3828_v8 = vrot.slane %v3826_v27, 5  ;;  %v7744_v10 = vrot.slane %v3832_v3, 5  ;;  %v3838_v51 = vrot.slane %v3836_v50, 4 }
  0xf4   : > { %v7747_v25 = vld [vmem:[%s6645_s11 + $0xa0] sm:$0xf]  ;;  %v3849_v17 = vrot.slane %v3847_v52, 4  ;;  %v3852_v57 = vrot.slane %v3850_v53, 5  ;;  %v3874_v9 = vshll.u32 %v5451_v48, 16  ;;  %v3781_v26 = vor.u32 %v3780_v18, %v7705_v33 }
  0xf5   : > { %v3818_v27 = vshll.u32 %v7740_v44, 16  ;;  %v7759_v3 = vld [vmem:[%s6645_s11 + $0x98] sm:$0x1]  ;;  %v3880_v50 = vshll.u32 %v7747_v25, 16  ;;  %v3884_v52 = vshrl.u32 %v7747_v25, 16  ;;  %v3829_v22 = vor.u32 %v3828_v8, %v3825_v31 }
  0xf6   : > { %5959 = vmatmul.mubr.msk.bf16.gmra.mrb[28].mxu0 %vm675_vm3, %v6387_v61  ;;  %v7730_v61 = vrot.slane %v3784_v6, 5  ;;  %v3814_v6 = vrot.slane %v3812_v34, 4  ;;  %v3862_v34 = vrot.slane %v3860_v23, 4  ;;  %v3842_v33 = vshll.u32 %v7750_v2, 16 }
  0xf7   : > { %5807 = vmatmul.mubr.msk.bf16.gmra.mrb[12].mxu1 %vm675_vm3, %v8523_v7  ;;  %5964 = vmatprep.mubr.msk.bf16.mxu0 %vm675_vm3, %v7472_v20  ;;  %v3804_v7 = vrot.slane %v3802_v49, 5  ;;  %v7742_v20 = vrot.slane %v3808_v46, 5  ;;  %v3794_v49 = vshll.u32 %v7722_v45, 16  ;;  %v7754_v46 = vrot.slane %v3856_v63, 5 }
  0xf8   : > { %5810 = vmatprep.mubr.msk.bf16.mxu1 %vm675_vm3, %v8524_v62  ;;  %v3871_v62 = vshrl.u32 %v5451_v48, 16  ;;  %v3791_v4 = vor.u32 %v3790_v59, %v7730_v61  ;;  %v3839_v23 = vor.u32 %v3838_v51, %v7744_v10  ;;  %v3853_v59 = vor.u32 %v3852_v57, %v3849_v17  ;;  %v7792_v57 = vld [vmem:[%s6645_s11 + $0xa4] sm:$0x1] }
  0xf9   : > { %v3805_v53 = vor.u32 %v3804_v7, %v3801_v60  ;;  %v3815_v48 = vor.u32 %v3814_v6, %v7742_v20  ;;  %v3876_v18 = vrot.slane %v3874_v9, 5  ;;  %v8526_v44 = vcombine.low %v7419_v11, %v7423_v40 }
  0xfa   : > { %v3873_v63 = vrot.slane %v3871_v62, 4  ;;  %v8527_v31 = vrot.slane %v7681_v54, 5  ;;  %v3796_v51 = vrot.slane %v3794_v49, 5  ;;  %v3863_v60 = vor.u32 %v3862_v34, %v7754_v46  ;;  %v7795_v34 = vld [vmem:[%s6645_s11 + $0xac] sm:$0xf] }
  0xfb   : > { %v3866_v9 = vshll.u32 %v7759_v3, 16  ;;  %v8528_v11 = vcombine.low %v7491_v39, %v7495_v55  ;;  %v3782_v40 = vrot.slane %v3781_v26, 4  ;;  %v7788_v54 = vrot.slane %v3880_v50, 5 }
  0xfc   : > { %v3806_v7 = vrot.slane %v3805_v53, 4  ;;  %v3816_v6 = vrot.slane %v3815_v48, 4  ;;  %v3820_v8 = vrot.slane %v3818_v27, 5  ;;  %v3844_v17 = vrot.slane %v3842_v33, 5  ;;  %v7805_v48 = vld [vmem:[%s6645_s11 + $0xb0] sm:$0x1] }
  0xfd   : > { %v3830_v39 = vrot.slane %v3829_v22, 4  ;;  %v3840_v55 = vrot.slane %v3839_v23, 4  ;;  %v3854_v62 = vrot.slane %v3853_v59, 4  ;;  %v3877_v49 = vor.u32 %v3876_v18, %v3873_v63 }
  0xfe   : > { %5965 = vmatmul.mubr.msk.bf16.vlgmr.msra.gmra.mrb[0].mxu0 %vm675_vm3, %v7535_v16  ;;  %v7778_v16 = vsel %vm6897_vm7, %v7703_v28, %v8527_v31  ;;  %v3886_v28 = vrot.slane %v3884_v52, 4  ;;  %v3868_v26 = vrot.slane %v3866_v9, 5  ;;  %v3787_v52 = vsel %vm6671_vm4, %v3782_v40, %v7730_v61 }
  0xff   : > { %5811 = vmatmul.mubr.msk.bf16.gmra.mrb[16].mxu1 %vm675_vm3, %v8526_v44  ;;  %5997 = vmatpush3.bf16.msra.mxu0 %v7476_v14  ;;  %v3792_v14 = vrot.slane %v3791_v4, 4  ;;  %v5454_v44 = vld [vmem:[%s6645_s11 + $0xa8] sm:$0xf]  ;;  %v3890_v22 = vshll.u32 %v7792_v57, 16  ;;  %v3811_v33 = vsel %vm6671_vm4, %v3806_v7, %v7742_v20  ;;  %v3821_v23 = vsel %vm6671_vm4, %v3816_v6, %v3820_v8 }
 0x100   : > { %5814 = vmatprep.mubr.msk.bf16.mxu1 %vm675_vm3, %v8528_v11  ;;  %5968 = vmatprep.mubr.msk.bf16.mxu0 %vm675_vm3, %v7546_v29  ;;  %v3864_v29 = vrot.slane %v3863_v60, 4  ;;  %v3895_v4 = vshrl.u32 %v5454_v44, 16  ;;  %v3898_v50 = vshll.u32 %v5454_v44, 16  ;;  %v3887_v53 = vor.u32 %v3886_v28, %v7788_v54  ;;  %v5503_v11 = vld [vmem:[%s6645_s11 + $0x48] sm:$0xe] }
 0x101   : > { %v3797_v27 = vsel %vm6671_vm4, %v3792_v14, %v3796_v51  ;;  %v3904_v59 = vshll.u32 %v7795_v34, 16  ;;  %v3908_v61 = vshrl.u32 %v7795_v34, 16  ;;  %v3835_v63 = vsel %vm6671_vm4, %v3830_v39, %v7744_v10  ;;  %v7870_v39 = vld [vmem:[%s6645_s11 + $0xb8] sm:$0xf] }
 0x102   : > { %v3845_v18 = vsel %vm6671_vm4, %v3840_v55, %v3844_v17  ;;  %v3859_v20 = vsel %vm6671_vm4, %v3854_v62, %v7754_v46  ;;  %v3878_v31 = vrot.slane %v3877_v49, 4  ;;  %v8529_v51 = vcombine.low %v7508_v12, %v7523_v35 }
 0x103   : > { %v3897_v10 = vrot.slane %v3895_v4, 4  ;;  %v3900_v60 = vrot.slane %v3898_v50, 5  ;;  %v3914_v9 = vshll.u32 %v7805_v48, 16  ;;  %v8530_v46 = vcombine.low %v7593_v21, %v7618_v56  ;;  %v5457_v21 = vld [vmem:[%s6645_s11 + $0xb4] sm:$0xf] }
 0x104   : > { %v5124_v12 = vcombine.low %v7669_v42, %v7676_v47  ;;  %v8531_v35 = vsel %vm6671_vm4, %v7689_v5, %v7678_v41  ;;  %v3888_v14 = vrot.slane %v3887_v53, 4  ;;  %v3892_v28 = vrot.slane %v3890_v22, 5  ;;  %v5505_v4 = vld [vmem:[%s6645_s11 + $0x60] sm:$0xe]  ;;  %v5506_v53 = vld [vmem:[%s6645_s11 + $0x6c] sm:$0xe] }
 0x105   : > { %v5125_v56 = vcombine.low %v7693_v43, %v7778_v16  ;;  %v7853_v44 = vcombine.low %v3787_v52, %v3797_v27  ;;  %v7855_v42 = vrot.slane %v3904_v59, 5  ;;  %v3910_v47 = vrot.slane %v3908_v61, 4  ;;  %v8540_v16 = vld [vmem:[#allocation7_spill] sm:$0xff] }
 0x106   : > { %5969 = vmatmul.mubr.msk.bf16.gmra.mrb[4].mxu0 %vm675_vm3, %v7649_v37  ;;  %v3869_v37 = vsel %vm6671_vm4, %v3864_v29, %v3868_v26  ;;  %v7857_v41 = vcombine.low %v3811_v33, %v3821_v23  ;;  %v7859_v5 = vcombine.low %v3835_v63, %v3845_v18  ;;  %v3883_v6 = vsel %vm6671_vm4, %v3878_v31, %v7788_v54  ;;  %v8533_v23 = vld [vmem:[#allocation14_spill] sm:$0xff]  ;;  %v5460_v63 = vld [vmem:[%s6645_s11 + $0xc0] sm:$0xf]  ;;  %v8535_v18 = vld [vmem:[#allocation12_spill] sm:$0xff] }
 0x107   : > { %5815 = vmatmul.mubr.msk.bf16.gmra.mrb[20].mxu1 %vm675_vm3, %v8529_v51  ;;  %5972 = vmatprep.mubr.msk.bf16.mxu0 %vm675_vm3, %v7663_v58  ;;  %v8532_v58 = vsel %vm6671_vm4, %v7651_v19, %v7606_v1  ;;  %v7861_v7 = vcombine.low %v3859_v20, %v3869_v37  ;;  %v5519_v1 = vrot.slane %v5503_v11, 9  ;;  %v5504_v19 = vld [vmem:[%s6645_s11 + $0x54] sm:$0xe]  ;;  %v3901_v8 = vor.u32 %v3900_v60, %v3897_v10 }
 0x108   : > { %5818 = vmatprep.mubr.msk.bf16.mxu1 %vm675_vm3, %v8530_v46  ;;  %v5473_v40 = vcombine.low %v8532_v58, %v8531_v35  ;;  %v7867_v17 = vrot.slane %v3914_v9, 5  ;;  %v3919_v55 = vshrl.u32 %v5457_v21, 16  ;;  %v3893_v62 = vsel %vm6671_vm4, %v3888_v14, %v3892_v28  ;;  %v8536_v31 = vld [vmem:[#allocation13_spill] sm:$0xff]  ;;  %v8537_v9 = vld [vmem:[#allocation15_spill] sm:$0xff]  ;;  %v7919_v35 = vld [vmem:[%s6645_s11 + $0xbc] sm:$0x1] }
 0x109   : > { %v3922_v49 = vshll.u32 %v5457_v21, 16  ;;  %v4378_v29 = vrot.slane %v7501_v0, 5  ;;  %v4381_v26 = vrot.slane %v7555_v38, 5  ;;  %v3911_v50 = vor.u32 %v3910_v47, %v7855_v42  ;;  %v7922_v58 = vld [vmem:[%s6645_s11 + $0xc4] sm:$0xf] }
 0x10a   : > { %v5520_v52 = vrot.slane %v5504_v19, 9  ;;  %v4385_v54 = vrot.slane %v7512_v24, 5  ;;  %v4388_v27 = vrot.slane %v7564_v15, 5  ;;  %v3928_v22 = vshll.u32 %v7870_v39, 16  ;;  %v5507_v19 = vld [vmem:[%s6645_s11 + $0x78] sm:$0xe] }
 0x10b   : > { %v3932_v33 = vshrl.u32 %v7870_v39, 16  ;;  %v7887_v0 = vsel %vm6897_vm7, %v5519_v1, %v4378_v29  ;;  %v4380_v38 = vrot.slane %v4378_v29, 4  ;;  %v8534_v59 = vcombine.low %v7626_v36, %v8533_v23  ;;  %v8538_v23 = vld [vmem:[#allocation16_spill] sm:$0xff] }
 0x10c   : > { %v7894_v24 = vcombine.low %v3883_v6, %v3893_v62  ;;  %v7898_v15 = vsel %vm6897_vm7, %v5520_v52, %v4385_v54  ;;  %v5521_v61 = vrot.slane %v5505_v4, 9  ;;  %v4392_v20 = vrot.slane %v8535_v18, 5  ;;  %v6388_v6 = vld [vmem:[%s6645_s11 + $0xc] sm:$0xff]  }
 0x10d   : > { %v7904_v36 = vsel %vm6897_vm7, %v4380_v38, %v4381_v26  ;;  %v4395_v51 = vrot.slane %v8536_v31, 5  ;;  %v5522_v37 = vrot.slane %v5506_v53, 9  ;;  %v4399_v11 = vrot.slane %v8537_v9, 5 }
 0x10e   : > { %5973 = vmatmul.mubr.msk.bf16.gmra.mrb[8].mxu0 %vm675_vm3, %v7672_v30  ;;  %v4387_v30 = vrot.slane %v4385_v54, 4  ;;  %v5536_v10 = vcombine.low %v7887_v0, %v7904_v36  ;;  %v4402_v46 = vrot.slane %v7722_v45, 5  ;;  %v7928_v14 = vsel %vm6897_vm7, %v5521_v61, %v4392_v20 }
 0x10f   : > { %5819 = vmatmul.mubr.msk.bf16.gmra.mrb[24].mxu1 %vm675_vm3, %v8534_v59  ;;  %5976 = vmatprep.mubr.msk.bf16.mxu0 %vm675_vm3, %v5473_v40  ;;  %v4394_v28 = vrot.slane %v4392_v20, 4  ;;  %v7930_v21 = vrot.slane %v3919_v55, 4  ;;  %v3943_v47 = vshrl.u32 %v5460_v63, 16  ;;  %v7934_v45 = vsel %vm6897_vm7, %v5522_v37, %v4399_v11  ;;  %v5234_v55 = vld [vmem:[%s6645_s11 + $0x78] sm:$0xf]  ;;  %v8539_v59 = vld [vmem:[#allocation19_spill] sm:$0xff] }
 0x110   : > { %5822 = vmatprep.mubr.msk.bf16.mxu1 %vm675_vm3, %v5124_v12  ;;  %v7912_v60 = vsel %vm6897_vm7, %v4387_v30, %v4388_v27  ;;  %v7916_v12 = vrot.slane %v3901_v8, 4  ;;  %v4401_v1 = vrot.slane %v4399_v11, 4  ;;  %v7938_v8 = vrot.slane %v3911_v50, 4 }
 0x111   : > { %v5537_v40 = vcombine.low %v7898_v15, %v7912_v60  ;;  %v7940_v62 = vrot.slane %v3922_v49, 5  ;;  %v3946_v29 = vshll.u32 %v5460_v63, 16  ;;  %v7944_v26 = vsel %vm6897_vm7, %v4394_v28, %v4395_v51  ;;  %v8542_v28 = vld [vmem:[#allocation17_spill] sm:$0xff]  ;;  %v6451_v60 = vld [vmem:[%s6645_s11 + $0xa0] sm:$0xf] }
 0x112   : > { %v7947_v4 = vrot.slane %v3928_v22, 5  ;;  %v7949_v52 = vrot.slane %v3932_v33, 4  ;;  %v5538_v54 = vcombine.low %v7928_v14, %v7944_v26  ;;  %v7955_v27 = vsel %vm6897_vm7, %v4401_v1, %v4402_v46  ;;  %v5508_v33 = vld [vmem:[%s6645_s11 + $0x84] sm:$0xe]  ;;  %v6389_v1 = vld [vmem:[%s6645_s11 + $0x18] sm:$0xff]  }
 0x113   : > { %v3938_v49 = vshll.u32 %v7919_v35, 16  ;;  %v3952_v50 = vshll.u32 %v7922_v58, 16  ;;  %v5539_v53 = vcombine.low %v7934_v45, %v7955_v27  ;;  %v5523_v22 = vrot.slane %v5507_v19, 9  ;;  %v6455_v27 = vld [vmem:[%s6645_s11 + $0xac] sm:$0xf] }
 0x114   : > { %v3945_v38 = vrot.slane %v3943_v47, 4  ;;  %v4409_v30 = vrot.slane %v8539_v59, 5  ;;  %v2265_v61 = vshrl.u32 %v5234_v55, 16  ;;  %v3948_v63 = vrot.slane %v3946_v29, 5  ;;  %v5463_v29 = vld [vmem:[%s6645_s11 + $0xcc] sm:$0xf] }
 0x115   : > { %v3956_v18 = vshrl.u32 %v7922_v58, 16  ;;  %v2268_v43 = vshll.u32 %v5234_v55, 16  ;;  %v5524_v37 = vrot.slane %v5508_v33, 9  ;;  %v3907_v9 = vsel %vm6671_vm4, %v7916_v12, %v7855_v42  ;;  %v7998_v55 = vld [vmem:[%s6645_s11 + $0xd0] sm:$0xf] }
 0x116   : > { %5977 = vmatmul.mubr.msk.bf16.gmra.mrb[12].mxu0 %vm675_vm3, %v7853_v44  ;;  %v4406_v44 = vrot.slane %v8538_v23, 5  ;;  %v2267_v51 = vrot.slane %v2265_v61, 4  ;;  %v3925_v11 = vor.u32 %v7940_v62, %v7930_v21  ;;  %v4413_v47 = vrot.slane %v8542_v28, 5  ;;  %v6390_v21 = vld [vmem:[%s6645_s11 + $0x24] sm:$0xff]  }
 0x117   : > { %5823 = vmatmul.mubr.msk.bf16.gmra.mrb[28].mxu1 %vm675_vm3, %v5125_v56  ;;  %5980 = vmatprep.mubr.msk.bf16.mxu0 %vm675_vm3, %v7857_v41  ;;  %v8541_v56 = vld [vmem:[#allocation8_spill] sm:$0xff]  ;;  %v2270_v46 = vrot.slane %v2268_v43, 5  ;;  %v3917_v19 = vsel %vm6671_vm4, %v7938_v8, %v7867_v17  ;;  %v4416_v12 = vrot.slane %v7750_v2, 5  ;;  %v8006_v62 = vrot.slane %v3952_v50, 5  ;;  %v5509_v8 = vld [vmem:[%s6645_s11 + $0x90] sm:$0xe] }
 0x118   : > { %5828 = vmatprep.mubr.msk.bf16.mxu1 %vm675_vm3, %v6388_v6  ;;  %v2287_v41 = vsel %vm6671_vm4, %v8541_v56, %v8540_v16  ;;  %v7980_v20 = vsel %vm6897_vm7, %v5523_v22, %v4406_v44  ;;  %v4408_v31 = vrot.slane %v4406_v44, 4  ;;  %v3935_v6 = vor.u32 %v7949_v52, %v7947_v4  ;;  %v8012_v52 = vld [vmem:[%s6645_s11 + $0xc8] sm:$0x1]  ;;  %v8544_v16 = vld [vmem:[#allocation5_spill] sm:$0xff] }
 0x119   : > { %v3958_v22 = vrot.slane %v3956_v18, 4  ;;  %v2271_v17 = vor.u32 %v2270_v46, %v2267_v51  ;;  %v3940_v23 = vrot.slane %v3938_v49, 5  ;;  %v3949_v44 = vor.u32 %v3948_v63, %v3945_v38  ;;  %v8545_v51 = vld [vmem:[#allocation6_spill] sm:$0xff] }
 0x11a   : > { %v8002_v42 = vsel %vm6897_vm7, %v4408_v31, %v4409_v30  ;;  %v8016_v59 = vsel %vm6897_vm7, %v5524_v37, %v4413_v47  ;;  %v4415_v30 = vrot.slane %v4413_v47, 4  ;;  %v3967_v2 = vshrl.u32 %v5463_v29, 16 }
 0x11b   : > { %v5540_v33 = vcombine.low %v7980_v20, %v8002_v42  ;;  %v3970_v50 = vshll.u32 %v5463_v29, 16  ;;  %v3976_v61 = vshll.u32 %v7998_v55, 16  ;;  %v2272_v18 = vrot.slane %v2271_v17, 4  ;;  %v6391_v29 = vld [vmem:[%s6645_s11 + $0x30] sm:$0xff]  }
 0x11c   : > { %v3980_v49 = vshrl.u32 %v7998_v55, 16  ;;  %v8027_v38 = vsel %vm6897_vm7, %v4415_v30, %v4416_v12  ;;  %v5525_v63 = vrot.slane %v5509_v8, 9  ;;  %v3959_v56 = vor.u32 %v3958_v22, %v8006_v62 }
 0x11d   : > { %v3962_v31 = vshll.u32 %v8012_v52, 16  ;;  %v5541_v37 = vcombine.low %v8016_v59, %v8027_v38  ;;  %v5479_v46 = vcombine.low %v3907_v9, %v3917_v19  ;;  %v3926_v28 = vrot.slane %v3925_v11, 4  ;;  %v5510_v11 = vld [vmem:[%s6645_s11 + $0x9c] sm:$0xe] }
 0x11e   : > { %5981 = vmatmul.mubr.msk.bf16.gmra.mrb[16].mxu0 %vm675_vm3, %v7859_v5  ;;  %v8543_v5 = vld [vmem:[#allocation18_spill] sm:$0xff]  ;;  %v3936_v47 = vrot.slane %v3935_v6, 4  ;;  %v3950_v12 = vrot.slane %v3949_v44, 4  ;;  %v4423_v8 = vrot.slane %v7759_v3, 5  ;;  %v3969_v30 = vrot.slane %v3967_v2, 4 }
 0x11f   : > { %5829 = vmatmul.mubr.msk.bf16.vlgmr.msra.gmra.mrb[0].mxu1 %vm675_vm3, %v6389_v1  ;;  %5984 = vmatprep.mubr.msk.bf16.mxu0 %vm675_vm3, %v7861_v7  ;;  %v4420_v43 = vrot.slane %v8543_v5, 5  ;;  %v2277_v7 = vsel %vm6671_vm4, %v2272_v18, %v8545_v51  ;;  %v3972_v18 = vrot.slane %v3970_v50, 5  ;;  %v8050_v5 = vrot.slane %v3976_v61, 5  ;;  %v6392_v19 = vld [vmem:[%s6645_s11 + $0x3c] sm:$0xff]  }
 0x120   : > { %6031 = vmatpush3.bf16.msra.mxu1 %v8544_v16  ;;  %5832 = vmatprep.mubr.msk.bf16.mxu1 %vm675_vm3, %v6390_v21  ;;  %v8039_v1 = vcombine.low %v2277_v7, %v2287_v41  ;;  %v8043_v21 = vld [vmem:[%s6645_s11 + $0xd4] sm:$0x1]  ;;  %v3982_v9 = vrot.slane %v3980_v49, 4  ;;  %v3960_v41 = vrot.slane %v3959_v56, 4  ;;  %v3964_v6 = vrot.slane %v3962_v31, 5 }
 0x121   : > { %v8047_v22 = vsel %vm6897_vm7, %v5525_v63, %v4420_v43  ;;  %v4422_v17 = vrot.slane %v4420_v43, 4  ;;  %v3931_v63 = vsel %vm6671_vm4, %v3926_v28, %v7947_v4  ;;  %v3941_v2 = vsel %vm6671_vm4, %v3936_v47, %v3940_v23  ;;  %v6442_v16 = vld [vmem:[%s6645_s11 + $0x1c] sm:$0xf]  ;;  %v5511_v28 = vld [vmem:[%s6645_s11 + $0xa8] sm:$0xe] }
 0x122   : > { %v3986_v50 = vshll.u32 %v8043_v21, 16  ;;  %v5526_v61 = vrot.slane %v5510_v11, 9  ;;  %v4427_v49 = vrot.slane %v7747_v25, 5  ;;  %v3955_v4 = vsel %vm6671_vm4, %v3950_v12, %v8006_v62  ;;  %v5499_v62 = vld [vmem:[%s6645_s11 + $0x18] sm:$0xe]  ;;  %v6393_v47 = vld [vmem:[%s6645_s11 + $0x48] sm:$0xff]  }
 0x123   : > { %v8056_v44 = vsel %vm6897_vm7, %v4422_v17, %v4423_v8  ;;  %v3983_v43 = vor.u32 %v3982_v9, %v8050_v5  ;;  %v4430_v23 = vrot.slane %v7792_v57, 5  ;;  %v3965_v25 = vsel %vm6671_vm4, %v3960_v41, %v3964_v6  ;;  %v6443_v11 = vld [vmem:[%s6645_s11 + $0x20] sm:$0x1] }
 0x124   : > { %v5542_v3 = vcombine.low %v8047_v22, %v8056_v44  ;;  %v4350_v56 = vrot.slane %v6442_v16, 5  ;;  %v8082_v31 = vsel %vm6897_vm7, %v5526_v61, %v4427_v49  ;;  %v4429_v51 = vrot.slane %v4427_v49, 4  ;;  %v5512_v49 = vld [vmem:[%s6645_s11 + $0xb4] sm:$0xe] }
 0x125   : > { %v5480_v7 = vcombine.low %v3931_v63, %v3941_v2  ;;  %v3984_v17 = vrot.slane %v3983_v43, 4  ;;  %v5527_v41 = vrot.slane %v5511_v28, 9  ;;  %v4434_v6 = vrot.slane %v7795_v34, 5  ;;  %v5500_v2 = vld [vmem:[%s6645_s11 + $0x24] sm:$0xe] }
 0x126   : > { %5985 = vmatmul.mubr.msk.bf16.gmra.mrb[20].mxu0 %vm675_vm3, %v7894_v24  ;;  %v3973_v24 = vor.u32 %v3972_v18, %v3969_v30  ;;  %v8087_v57 = vsel %vm6897_vm7, %v4429_v51, %v4430_v23  ;;  %v6394_v30 = vld [vmem:[%s6645_s11 + $0x54] sm:$0xff]   ;;  %v5515_v18 = vrot.slane %v5499_v62, 9  ;;  %v4352_v9 = vrot.slane %v4350_v56, 4  ;;  %v6446_v28 = vld [vmem:[%s6645_s11 + $0x2c] sm:$0x1] }
 0x127   : > { %5833 = vmatmul.mubr.msk.bf16.gmra.mrb[4].mxu1 %vm675_vm3, %v6391_v29  ;;  %5988 = vmatprep.mubr.msk.bf16.mxu0 %vm675_vm3, %v5479_v46  ;;  %v3988_v46 = vrot.slane %v3986_v50, 5  ;;  %v5481_v29 = vcombine.low %v3955_v4, %v3965_v25  ;;  %v5543_v8 = vcombine.low %v8082_v31, %v8087_v57  ;;  %v4437_v63 = vrot.slane %v7805_v48, 5  ;;  %v6444_v50 = vld [vmem:[%s6645_s11 + $0x28] sm:$0xf]  ;;  %v5501_v25 = vld [vmem:[%s6645_s11 + $0x30] sm:$0xe] }
 0x128   : > { %5836 = vmatprep.mubr.msk.bf16.mxu1 %vm675_vm3, %v6392_v19  ;;  %v3974_v12 = vrot.slane %v3973_v24, 4  ;;  %v4353_v19 = vrot.slane %v6443_v11, 5  ;;  %v4357_v61 = vrot.slane %v6444_v50, 5  ;;  %v8110_v48 = vsel %vm6897_vm7, %v5527_v41, %v4434_v6  ;;  %v6396_v11 = vld [vmem:[%s6645_s11 + $0x6c] sm:$0xff]   ;;  %v5513_v50 = vld [vmem:[%s6645_s11 + $0xc0] sm:$0xe] }
 0x129   : > { %v3989_v34 = vsel %vm6671_vm4, %v3984_v17, %v3988_v46  ;;  %v4436_v24 = vrot.slane %v4434_v6, 4  ;;  %v4351_v43 = vsel %vm6897_vm7, %v5515_v18, %v4350_v56  ;;  %v5516_v51 = vrot.slane %v5500_v2, 9  ;;  %v8546_v41 = vld [vmem:[#allocation9_spill] sm:$0xff]  ;;  %v6460_v31 = vld [vmem:[%s6645_s11 + $0xc8] sm:$0x1] }
 0x12a   : > { %v3979_v4 = vsel %vm6671_vm4, %v3974_v12, %v8050_v5  ;;  %v4354_v23 = vsel %vm6897_vm7, %v4352_v9, %v4353_v19  ;;  %v6445_v5 = vld [vmem:[%s6645_s11 + $0x34] sm:$0xf]  ;;  %v6395_v12 = vld [vmem:[%s6645_s11 + $0x60] sm:$0xff]   ;;  %v5517_v18 = vrot.slane %v5501_v25, 9  ;;  %v4444_v9 = vrot.slane %v7919_v35, 5 }
 0x12b   : > { %v4364_v16 = vrot.slane %v6445_v5, 5  ;;  %v8121_v62 = vsel %vm6897_vm7, %v4436_v24, %v4437_v63  ;;  %v5482_v46 = vcombine.low %v3979_v4, %v3989_v34  ;;  %v5532_v17 = vcombine.low %v4351_v43, %v4354_v23  ;;  %v5502_v24 = vld [vmem:[%s6645_s11 + $0x3c] sm:$0xe] }
 0x12c   : > { %v5544_v56 = vcombine.low %v8110_v48, %v8121_v62  ;;  %v4367_v6 = vrot.slane %v8546_v41, 5  ;;  %v4358_v35 = vsel %vm6897_vm7, %v5516_v51, %v4357_v61  ;;  %v5529_v5 = vrot.slane %v5513_v50, 9 }
 0x12d   : > { %v4366_v19 = vrot.slane %v4364_v16, 4  ;;  %v4365_v23 = vsel %vm6897_vm7, %v5517_v18, %v4364_v16  ;;  %v4451_v51 = vrot.slane %v8012_v52, 5  ;;  %v2428_v57 = vshll.u32 %v6460_v31, 16 }
 0x12e   : > { %5989 = vmatmul.mubr.msk.bf16.gmra.mrb[24].mxu0 %vm675_vm3, %v5480_v7  ;;  %v5528_v7 = vrot.slane %v5512_v49, 9 }
 0x12f   : > { %5837 = vmatmul.mubr.msk.bf16.gmra.mrb[8].mxu1 %vm675_vm3, %v6393_v47  ;;  %5992 = vmatprep.mubr.msk.bf16.mxu0 %vm675_vm3, %v5481_v29  ;;  %v4360_v47 = vrot.slane %v6446_v28, 5  ;;  %v4441_v29 = vrot.slane %v7870_v39, 5  ;;  %v8547_v39 = vld [vmem:[#allocation10_spill] sm:$0xff]  ;;  %v4368_v25 = vsel %vm6897_vm7, %v4366_v19, %v4367_v6  ;;  %v5518_v28 = vrot.slane %v5502_v24, 9 }
 0x130   : > { %5840 = vmatprep.mubr.msk.bf16.mxu1 %vm675_vm3, %v6394_v30  ;;  %v4359_v30 = vrot.slane %v4357_v61, 4  ;;  %v4371_v49 = vrot.slane %v8547_v39, 5  ;;  %v4448_v61 = vrot.slane %v7922_v58, 5  ;;  %v6447_v39 = vld [vmem:[%s6645_s11 + $0x70] sm:$0xf]  ;;  %v4455_v24 = vrot.slane %v7998_v55, 5 }
 0x131   : > { %v8133_v63 = vsel %vm6897_vm7, %v5528_v7, %v4441_v29  ;;  %v4443_v2 = vrot.slane %v4441_v29, 4  ;;  %v5231_v7 = vld [vmem:[%s6645_s11 + $0x6c] sm:$0xf]  ;;  %v8548_v29 = vld [vmem:[#allocation11_spill] sm:$0xff] }
 0x132   : > { %v4361_v34 = vsel %vm6897_vm7, %v4359_v30, %v4360_v47  ;;  %v4373_v47 = vrot.slane %v4371_v49, 4  ;;  %v6397_v30 = vld [vmem:[%s6645_s11 + $0x78] sm:$0xff]   ;;  %v8164_v16 = vsel %vm6897_vm7, %v5529_v5, %v4448_v61  ;;  %v4450_v18 = vrot.slane %v4448_v61, 4 }
 0x133   : > { %v8140_v4 = vsel %vm6897_vm7, %v4443_v2, %v4444_v9  ;;  %v5534_v9 = vcombine.low %v4365_v23, %v4368_v25  ;;  %v2241_v19 = vshrl.u32 %v5231_v7, 16  ;;  %v2244_v41 = vshll.u32 %v5231_v7, 16 }
 0x134   : > { %v5545_v43 = vcombine.low %v8133_v63, %v8140_v4  ;;  %v8169_v58 = vsel %vm6897_vm7, %v4450_v18, %v4451_v51  ;;  %v4372_v6 = vsel %vm6897_vm7, %v5518_v28, %v4371_v49  ;;  %v4458_v49 = vrot.slane %v8043_v21, 5  ;;  %v6399_v51 = vld [vmem:[%s6645_s11 + $0x90] sm:$0xff]   ;;  %v6400_v21 = vld [vmem:[%s6645_s11 + $0x9c] sm:$0xff]  }
 0x135   : > { %v5546_v50 = vcombine.low %v8164_v16, %v8169_v58  ;;  %v2243_v23 = vrot.slane %v2241_v19, 4  ;;  %v2246_v25 = vrot.slane %v2244_v41, 5  ;;  %v4457_v7 = vrot.slane %v4455_v24, 4 }
 0x136   : > { %5993 = vmatmul.mubr.msk.bf16.gmra.mrb[28].mxu0 %vm675_vm3, %v5482_v46  ;;  %v5533_v46 = vcombine.low %v4358_v35, %v4361_v34  ;;  %v2250_v35 = vshll.u32 %v6447_v39, 16  ;;  %v2254_v34 = vshrl.u32 %v6447_v39, 16 }
 0x137   : > { %5841 = vmatmul.mubr.msk.bf16.gmra.mrb[12].mxu1 %vm675_vm3, %v6395_v12  ;;  %5998 = vmatprep.mubr.msk.bf16.mxu0 %vm675_vm3, %v5532_v17  ;;  %v4374_v12 = vrot.slane %v8548_v29, 5  ;;  %v5514_v17 = vld [vmem:[%s6645_s11 + $0xcc] sm:$0xe]  ;;  %v8191_v55 = vsel %vm6897_vm7, %v4457_v7, %v4458_v49 }
 0x138   : > { %5844 = vmatprep.mubr.msk.bf16.mxu1 %vm675_vm3, %v6396_v11  ;;  %v6398_v11 = vld [vmem:[%s6645_s11 + $0x84] sm:$0xff]   ;;  %v5530_v52 = vrot.slane %v5514_v17, 9  ;;  %v2256_v28 = vrot.slane %v2254_v34, 4  ;;  %v6448_v17 = vld [vmem:[%s6645_s11 + $0x74] sm:$0x1] }
 0x139   : > { %v4375_v2 = vsel %vm6897_vm7, %v4373_v47, %v4374_v12  ;;  %v5237_v47 = vld [vmem:[%s6645_s11 + $0x84] sm:$0xf]  ;;  %v2247_v12 = vor.u32 %v2246_v25, %v2243_v23  ;;  %v6402_v34 = vld [vmem:[%s6645_s11 + $0xb4] sm:$0xff]  }
 0x13a   : > { %v8186_v5 = vsel %vm6897_vm7, %v5530_v52, %v4455_v24  ;;  %v5535_v61 = vcombine.low %v4372_v6, %v4375_v2  ;;  %v2292_v18 = vshll.u32 %v5237_v47, 16  ;;  %v5240_v6 = vld [vmem:[%s6645_s11 + $0x90] sm:$0xf]  ;;  %v6401_v2 = vld [vmem:[%s6645_s11 + $0xa8] sm:$0xff]  }
 0x13b   : > { %v5547_v29 = vcombine.low %v8186_v5, %v8191_v55  ;;  %v2248_v52 = vrot.slane %v2247_v12, 4  ;;  %v2313_v23 = vshrl.u32 %v5240_v6, 16  ;;  %v2316_v25 = vshll.u32 %v5240_v6, 16 }
 0x13c   : > { %v2346_v12 = vshll.u32 %v6451_v60, 16 }
 0x13d   : > { %v2318_v14 = vrot.slane %v2316_v25, 5  ;;  %v6454_v25 = vld [vmem:[%s6645_s11 + $0xa4] sm:$0x1] }
 0x13e   : > { %5999 = vmatmul.mubr.msk.bf16.vlgmr.msra.gmra.mrb[0].mxu0 %vm675_vm3, %v5533_v46  ;;  %v2252_v46 = vrot.slane %v2250_v35, 5  ;;  %v5243_v35 = vld [vmem:[%s6645_s11 + $0x9c] sm:$0xf]  ;;  %v8233_v6 = vrot.slane %v2346_v12, 5 }
 0x13f   : > { %5845 = vmatmul.mubr.msk.bf16.gmra.mrb[16].mxu1 %vm675_vm3, %v6397_v30  ;;  %6002 = vmatprep.mubr.msk.bf16.mxu0 %vm675_vm3, %v5534_v9  ;;  %v2260_v30 = vshll.u32 %v6448_v17, 16  ;;  %v2289_v9 = vshrl.u32 %v5237_v47, 16  ;;  %v2340_v47 = vshll.u32 %v5243_v35, 16  ;;  %v6452_v17 = vld [vmem:[%s6645_s11 + $0x8c] sm:$0x1] }
 0x140   : > { %5848 = vmatprep.mubr.msk.bf16.mxu1 %vm675_vm3, %v6398_v11  ;;  %v2257_v13 = vor.u32 %v2256_v28, %v2252_v46  ;;  %v6449_v11 = vld [vmem:[%s6645_s11 + $0x88] sm:$0xf]  ;;  %v2253_v7 = vsel %vm6671_vm4, %v2248_v52, %v2252_v46 }
 0x141   : > { %v2298_v19 = vshll.u32 %v6449_v11, 16  ;;  %v2302_v41 = vshrl.u32 %v6449_v11, 16  ;;  %v2262_v0 = vrot.slane %v2260_v30, 5  ;;  %v2291_v36 = vrot.slane %v2289_v9, 4 }
 0x142   : > { %v2258_v39 = vrot.slane %v2257_v13, 4  ;;  %v2308_v30 = vshll.u32 %v6452_v17, 16  ;;  %v2315_v9 = vrot.slane %v2313_v23, 4  ;;  %v2342_v11 = vrot.slane %v2340_v47, 5 }
 0x143   : > { %v8210_v24 = vrot.slane %v2298_v19, 5  ;;  %v2304_v49 = vrot.slane %v2302_v41, 4  ;;  %v6403_v19 = vld [vmem:[%s6645_s11 + $0xc0] sm:$0xff]  }
 0x144   : > { %v2263_v46 = vsel %vm6671_vm4, %v2258_v39, %v2262_v0  ;;  %v5246_v39 = vld [vmem:[%s6645_s11 + $0xa8] sm:$0xf] }
 0x145   : > { %v2305_v13 = vor.u32 %v2304_v49, %v8210_v24  ;;  %v5264_v41 = vcombine.low %v2253_v7, %v2263_v46  ;;  %v2356_v7 = vshll.u32 %v6454_v25, 16  ;;  %v2364_v45 = vshll.u32 %v5246_v39, 16 }
 0x146   : > { %6003 = vmatmul.mubr.msk.bf16.gmra.mrb[4].mxu0 %vm675_vm3, %v5535_v61  ;;  %v6450_v61 = vld [vmem:[%s6645_s11 + $0x94] sm:$0xf] }
 0x147   : > { %5849 = vmatmul.mubr.msk.bf16.gmra.mrb[20].mxu1 %vm675_vm3, %v6399_v51  ;;  %6006 = vmatprep.mubr.msk.bf16.mxu0 %vm675_vm3, %v5536_v10  ;;  %v2294_v10 = vrot.slane %v2292_v18, 5  ;;  %v2322_v51 = vshll.u32 %v6450_v61, 16  ;;  %v2326_v28 = vshrl.u32 %v6450_v61, 16  ;;  %v2306_v0 = vrot.slane %v2305_v13, 4 }
 0x148   : > { %5852 = vmatprep.mubr.msk.bf16.mxu1 %vm675_vm3, %v6400_v21  ;;  %v2337_v21 = vshrl.u32 %v5243_v35, 16  ;;  %v6453_v35 = vld [vmem:[%s6645_s11 + $0x98] sm:$0x1]  ;;  %v2361_v61 = vshrl.u32 %v5246_v39, 16  ;;  %v5252_v39 = vld [vmem:[%s6645_s11 + $0xc0] sm:$0xf] }
 0x149   : > { %v2295_v15 = vor.u32 %v2294_v10, %v2291_v36  ;;  %v8230_v26 = vrot.slane %v2322_v51, 5  ;;  %v2310_v36 = vrot.slane %v2308_v30, 5  ;;  %v2319_v10 = vor.u32 %v2318_v14, %v2315_v9  ;;  %v5249_v51 = vld [vmem:[%s6645_s11 + $0xb4] sm:$0xf] }
 0x14a   : > { %v2339_v18 = vrot.slane %v2337_v21, 4  ;;  %v2374_v21 = vshrl.u32 %v6455_v27, 16  ;;  %v2385_v20 = vshrl.u32 %v5249_v51, 16  ;;  %v2388_v42 = vshll.u32 %v5249_v51, 16 }
 0x14b   : > { %v2296_v52 = vrot.slane %v2295_v15, 4  ;;  %v2311_v46 = vsel %vm6671_vm4, %v2306_v0, %v2310_v36  ;;  %v2320_v15 = vrot.slane %v2319_v10, 4  ;;  %v2358_v30 = vrot.slane %v2356_v7, 5 }
 0x14c   : > { %v2343_v23 = vor.u32 %v2342_v11, %v2339_v18  ;;  %v2363_v9 = vrot.slane %v2361_v61, 4  ;;  %v2376_v11 = vrot.slane %v2374_v21, 4  ;;  %v6459_v61 = vld [vmem:[%s6645_s11 + $0xbc] sm:$0x1] }
 0x14d   : > { %v2301_v47 = vsel %vm6671_vm4, %v2296_v52, %v8210_v24  ;;  %v2325_v0 = vsel %vm6671_vm4, %v2320_v15, %v8230_v26  ;;  %v2404_v22 = vshll.u32 %v6459_v61, 16 }
 0x14e   : > { %6007 = vmatmul.mubr.msk.bf16.gmra.mrb[8].mxu0 %vm675_vm3, %v5537_v40  ;;  %v2350_v40 = vshrl.u32 %v6451_v60, 16  ;;  %v2344_v17 = vrot.slane %v2343_v23, 4  ;;  %v5266_v24 = vcombine.low %v2301_v47, %v2311_v46 }
 0x14f   : > { %5853 = vmatmul.mubr.msk.bf16.gmra.mrb[24].mxu1 %vm675_vm3, %v6401_v2  ;;  %6010 = vmatprep.mubr.msk.bf16.mxu0 %vm675_vm3, %v5538_v54  ;;  %v2328_v54 = vrot.slane %v2326_v28, 4 }
 0x150   : > { %5856 = vmatprep.mubr.msk.bf16.mxu1 %vm675_vm3, %v6402_v34  ;;  %v2352_v2 = vrot.slane %v2350_v40, 4  ;;  %v2332_v34 = vshll.u32 %v6453_v35, 16  ;;  %v2349_v10 = vsel %vm6671_vm4, %v2344_v17, %v8233_v6  ;;  %v2430_v17 = vrot.slane %v2428_v57, 5 }
 0x151   : > { %v2329_v49 = vor.u32 %v2328_v54, %v8230_v26  ;;  %v2366_v54 = vrot.slane %v2364_v45, 5  ;;  %v6457_v26 = vld [vmem:[%s6645_s11 + $0xb0] sm:$0x1] }
 0x152   : > { %v2353_v28 = vor.u32 %v2352_v2, %v8233_v6  ;;  %v2334_v60 = vrot.slane %v2332_v34, 5  ;;  %v2380_v35 = vshll.u32 %v6457_v26, 16  ;;  %v2409_v34 = vshrl.u32 %v5252_v39, 16 }
 0x153   : > { %v2330_v13 = vrot.slane %v2329_v49, 4  ;;  %v2367_v38 = vor.u32 %v2366_v54, %v2363_v9  ;;  %v2412_v6 = vshll.u32 %v5252_v39, 16  ;;  %v6458_v49 = vld [vmem:[%s6645_s11 + $0xc4] sm:$0xf] }
 0x154   : > { %v2354_v14 = vrot.slane %v2353_v28, 4  ;;  %v2418_v23 = vshll.u32 %v6458_v49, 16  ;;  %v2422_v25 = vshrl.u32 %v6458_v49, 16  ;;  %v2382_v45 = vrot.slane %v2380_v35, 5 }
 0x155   : > { %v2335_v36 = vsel %vm6671_vm4, %v2330_v13, %v2334_v60  ;;  %v2368_v51 = vrot.slane %v2367_v38, 4  ;;  %v2406_v60 = vrot.slane %v2404_v22, 5 }
 0x156   : > { %6011 = vmatmul.mubr.msk.bf16.gmra.mrb[12].mxu0 %vm675_vm3, %v5539_v53  ;;  %v2370_v53 = vshll.u32 %v6455_v27, 16  ;;  %v2359_v59 = vsel %vm6671_vm4, %v2354_v14, %v2358_v30  ;;  %v5267_v44 = vcombine.low %v2325_v0, %v2335_v36  ;;  %v2411_v27 = vrot.slane %v2409_v34, 4 }
 0x157   : > { %5857 = vmatmul.mubr.msk.bf16.gmra.mrb[28].mxu1 %vm675_vm3, %v6403_v19  ;;  %6014 = vmatprep.mubr.msk.bf16.mxu0 %vm675_vm3, %v5540_v33  ;;  %v6456_v33 = vld [vmem:[%s6645_s11 + $0xb8] sm:$0xf]  ;;  %v2387_v19 = vrot.slane %v2385_v20, 4  ;;  %v2420_v21 = vrot.slane %v2418_v23, 5  ;;  %v2424_v47 = vrot.slane %v2422_v25, 4 }
 0x158   : > { %5878 = vmatprep.mubr.msk.bf16.mxu1 %vm675_vm3, %v5264_v41  ;;  %v2394_v12 = vshll.u32 %v6456_v33, 16  ;;  %v2398_v40 = vshrl.u32 %v6456_v33, 16  ;;  %v2372_v18 = vrot.slane %v2370_v53, 5  ;;  %v2390_v41 = vrot.slane %v2388_v42, 5 }
 0x159   : > { %v2414_v53 = vrot.slane %v2412_v6, 5 }
 0x15a   : > { %v2396_v52 = vrot.slane %v2394_v12, 5  ;;  %v2400_v2 = vrot.slane %v2398_v40, 4  ;;  %v2373_v20 = vsel %vm6671_vm4, %v2368_v51, %v2372_v18  ;;  %v2425_v12 = vor.u32 %v2424_v47, %v2420_v21 }
 0x15b   : > { %v2415_v33 = vor.u32 %v2414_v53, %v2411_v27 }
 0x15c   : > { %v2401_v7 = vor.u32 %v2400_v2, %v2396_v52  ;;  %v2426_v13 = vrot.slane %v2425_v12, 4  ;;  %v8341_v2 = vld [vmem:[%s8478_s2] ss:$0 sm:$0xff] }
 0x15d   : > { %v2416_v40 = vrot.slane %v2415_v33, 4 }
 0x15e   : > { %6015 = vmatmul.mubr.msk.bf16.gmra.mrb[16].mxu0 %vm675_vm3, %v5541_v37  ;;  %v2377_v37 = vor.u32 %v2376_v11, %v2372_v18  ;;  %v2402_v15 = vrot.slane %v2401_v7, 4  ;;  %v2431_v9 = vsel %vm6671_vm4, %v2426_v13, %v2430_v17 }
 0x15f   : > { %5879 = vmatmul.mubr.msk.bf16.vlgmr.msra.gmra.mrb[16].mxu1 %vm675_vm3, %v8039_v1  ;;  %6018 = vmatprep.mubr.msk.bf16.mxu0 %vm675_vm3, %v5542_v3  ;;  %v2391_v1 = vor.u32 %v2390_v41, %v2387_v19  ;;  %v5268_v3 = vcombine.low %v2349_v10, %v2359_v59  ;;  %v2421_v30 = vsel %vm6671_vm4, %v2416_v40, %v2420_v21 }
 0x160   : > { %5882 = vmatprep.mubr.msk.bf16.mxu1 %vm675_vm3, %v5266_v24  ;;  %v2378_v28 = vrot.slane %v2377_v37, 4  ;;  %v2407_v48 = vsel %vm6671_vm4, %v2402_v15, %v2406_v60  ;;  %v5271_v14 = vcombine.low %v2421_v30, %v2431_v9 }
 0x161   : > { %v2392_v46 = vrot.slane %v2391_v1, 4 }
 0x162   : > { %v2383_v42 = vsel %vm6671_vm4, %v2378_v28, %v2382_v45 }
 0x163   : > { %v5269_v62 = vcombine.low %v2373_v20, %v2383_v42 }
 0x166   : > { %6019 = vmatmul.mubr.msk.bf16.gmra.mrb[20].mxu0 %vm675_vm3, %v5543_v8  ;;  %v2397_v8 = vsel %vm6671_vm4, %v2392_v46, %v2396_v52 }
 0x167   : > { %5883 = vmatmul.mubr.msk.bf16.gmra.mrb[20].mxu1 %vm675_vm3, %v5267_v44  ;;  %6022 = vmatprep.mubr.msk.bf16.mxu0 %vm675_vm3, %v5544_v56  ;;  %v5270_v56 = vcombine.low %v2397_v8, %v2407_v48 }
 0x168   : > { %5886 = vmatprep.mubr.msk.bf16.mxu1 %vm675_vm3, %v5268_v3 }
 0x16e   : > { %6023 = vmatmul.mubr.msk.bf16.gmra.mrb[24].mxu0 %vm675_vm3, %v5545_v43 }
 0x16f   : > { %5887 = vmatmul.mubr.msk.bf16.gmra.mrb[24].mxu1 %vm675_vm3, %v5269_v62  ;;  %6026 = vmatprep.mubr.msk.bf16.mxu0 %vm675_vm3, %v5546_v50 }
 0x170   : > { %5890 = vmatprep.mubr.msk.bf16.mxu1 %vm675_vm3, %v5270_v56 }
 0x176   : > { %6027 = vmatmul.mubr.msk.bf16.gmra.mrb[28].mxu0 %vm675_vm3, %v5547_v29 }
 0x177   : > { %5891 = vmatmul.mubr.msk.bf16.gmra.mrb[28].mxu1 %vm675_vm3, %v5271_v14 }
 0x1f2   : > { %v5830_v63 = vpop.f32.mrb[0].mxu1 }
 0x1f3   : > { %v1841_v4 = vpop.f32.mrb[1].mxu1 }
 0x1f4   : > { %v5831_v43 = vpop.f32.mrb[2].mxu1 }
 0x1f5   : > { %v1844_v16 = vpop.f32.mrb[3].mxu1 }
 0x1fa   : > { %v5834_v58 = vpop.f32.mrb[4].mxu1 }
 0x1fb   : > { %v1857_v50 = vpop.f32.mrb[5].mxu1 }
 0x1fc   : > { %v5835_v54 = vpop.f32.mrb[6].mxu1 }
 0x1fd   : > { %v1860_v18 = vpop.f32.mrb[7].mxu1 }
 0x202   : > { %v8321_v32 = vpop.f32.mrb[8].mxu1 }
 0x203   : > { %v8323_v11 = vpop.f32.mrb[9].mxu1 }
 0x204   : > { %v8325_v24 = vpop.f32.mrb[10].mxu1 }
 0x205   : > { %v8327_v5 = vpop.f32.mrb[11].mxu1 }
 0x20a   : > { %v8329_v55 = vpop.f32.mrb[12].mxu1 }
 0x20b   : > { %v8331_v29 = vpop.f32.mrb[13].mxu1 }
 0x20c   : > { %v8333_v19 = vpop.f32.mrb[14].mxu1 }
 0x20d   : > { %v8335_v41 = vpop.f32.mrb[15].mxu1 }
 0x211   : > { %v6000_v52 = vpop.f32.mrb[0].mxu0 }
 0x212   : > { %v6032_v39 = vadd.f32 %v6000_v52, %v5830_v63  ;;  %v4595_v0 = vpop.f32.mrb[1].mxu0 }
 0x213   : > { %v6033_v36 = vadd.f32 %v4595_v0, %v1841_v4  ;;  %v6001_v10 = vpop.f32.mrb[2].mxu0 }
 0x214   : > { %v4763_v59 = vadd.f32 %v6032_v39, %v8341_v2  ;;  %v6034_v38 = vadd.f32 %v6001_v10, %v5831_v43  ;;  %v4598_v37 = vpop.f32.mrb[3].mxu0 }
 0x215   : > { %v4761_v26 = vadd.f32 %v6033_v36, %v8341_v2  ;;  %v6035_v35 = vadd.f32 %v4598_v37, %v1844_v16 }
 0x216   : > { %vm4795_vm8 = vcmp.ge.f32.partialorder %v4763_v59, 0.0  ;;  %v4827_v34 = vmul.f32 0.1, %v4763_v59  ;;  %v4764_v6 = vadd.f32 %v6034_v38, %v8341_v2 }
 0x217   : > { %vm4793_vm9 = vcmp.ge.f32.partialorder %v4761_v26, 0.0  ;;  %v4825_v49 = vmul.f32 0.1, %v4761_v26  ;;  %v4762_v23 = vadd.f32 %v6035_v35, %v8341_v2 }
 0x218   : > { %v4859_v25 = vsel %vm4795_vm8, %v4763_v59, %v4827_v34  ;;  %vm4796_vm10 = vcmp.ge.f32.partialorder %v4764_v6, 0.0  ;;  %v4828_v1 = vmul.f32 0.1, %v4764_v6 }
 0x219   : > { %4891 = vst [vmem:[%s8349_s19 + $0x10] sm:$0xff] %v4859_v25  ;;  %v4857_v7 = vsel %vm4793_vm9, %v4761_v26, %v4825_v49  ;;  %vm4794_vm11 = vcmp.ge.f32.partialorder %v4762_v23, 0.0  ;;  %v4826_v61 = vmul.f32 0.1, %v4762_v23  ;;  %v6004_v22 = vpop.f32.mrb[4].mxu0 }
 0x21a   : > { %4889 = vst [vmem:[%s8349_s19] sm:$0xff] %v4857_v7  ;;  %v4860_v44 = vsel %vm4796_vm10, %v4764_v6, %v4828_v1  ;;  %v6036_v3 = vadd.f32 %v6004_v22, %v5834_v58  ;;  %v4611_v51 = vpop.f32.mrb[5].mxu0 }
 0x21b   : > { %4892 = vst [vmem:[%s8349_s19 + $0x18] sm:$0xff] %v4860_v44  ;;  %v4858_v28 = vsel %vm4794_vm11, %v4762_v23, %v4826_v61  ;;  %v6037_v45 = vadd.f32 %v4611_v51, %v1857_v50  ;;  %v6005_v27 = vpop.f32.mrb[6].mxu0 }
 0x21c   : > { %4890 = vst [vmem:[%s8349_s19 + $0x8] sm:$0xff] %v4858_v28  ;;  %v4767_v53 = vadd.f32 %v6036_v3, %v8341_v2  ;;  %v6038_v21 = vadd.f32 %v6005_v27, %v5835_v54  ;;  %v4614_v47 = vpop.f32.mrb[7].mxu0 }
 0x21d   : > { %v4765_v46 = vadd.f32 %v6037_v45, %v8341_v2  ;;  %v6039_v15 = vadd.f32 %v4614_v47, %v1860_v18 }
 0x21e   : > { %vm4799_vm12 = vcmp.ge.f32.partialorder %v4767_v53, 0.0  ;;  %v4831_v60 = vmul.f32 0.1, %v4767_v53  ;;  %v4768_v20 = vadd.f32 %v6038_v21, %v8341_v2 }
 0x21f   : > { %vm4797_vm13 = vcmp.ge.f32.partialorder %v4765_v46, 0.0  ;;  %v4829_v42 = vmul.f32 0.1, %v4765_v46  ;;  %v4766_v33 = vadd.f32 %v6039_v15, %v8341_v2 }
 0x220   : > { %v4863_v12 = vsel %vm4799_vm12, %v4767_v53, %v4831_v60  ;;  %vm4800_vm14 = vcmp.ge.f32.partialorder %v4768_v20, 0.0  ;;  %v4832_v31 = vmul.f32 0.1, %v4768_v20 }
 0x221   : > { %4895 = vst [vmem:[%s8349_s19 + $0x30] sm:$0xff] %v4863_v12  ;;  %v4861_v57 = vsel %vm4797_vm13, %v4765_v46, %v4829_v42  ;;  %vm4798_vm15 = vcmp.ge.f32.partialorder %v4766_v33, 0.0  ;;  %v4830_v8 = vmul.f32 0.1, %v4766_v33  ;;  %v6008_v48 = vpop.f32.mrb[8].mxu0 }
 0x222   : > { %4893 = vst [vmem:[%s8349_s19 + $0x20] sm:$0xff] %v4861_v57  ;;  %v4864_v62 = vsel %vm4800_vm14, %v4768_v20, %v4832_v31  ;;  %v6040_v56 = vadd.f32 %v6008_v48, %v8321_v32  ;;  %v4627_v40 = vpop.f32.mrb[9].mxu0 }
 0x223   : > { %4896 = vst [vmem:[%s8349_s19 + $0x38] sm:$0xff] %v4864_v62  ;;  %v4862_v13 = vsel %vm4798_vm15, %v4766_v33, %v4830_v8  ;;  %v6041_v17 = vadd.f32 %v4627_v40, %v8323_v11  ;;  %v6009_v30 = vpop.f32.mrb[10].mxu0 }
 0x224   : > { %4894 = vst [vmem:[%s8349_s19 + $0x28] sm:$0xff] %v4862_v13  ;;  %v4771_v9 = vadd.f32 %v6040_v56, %v8341_v2  ;;  %v6042_v14 = vadd.f32 %v6009_v30, %v8325_v24  ;;  %v4630_v63 = vpop.f32.mrb[11].mxu0 }
 0x225   : > { %v4769_v4 = vadd.f32 %v6041_v17, %v8341_v2  ;;  %v6043_v43 = vadd.f32 %v4630_v63, %v8327_v5 }
 0x226   : > { %vm4803_vm0 = vcmp.ge.f32.partialorder %v4771_v9, 0.0  ;;  %v4835_v16 = vmul.f32 0.1, %v4771_v9  ;;  %v4772_v58 = vadd.f32 %v6042_v14, %v8341_v2 }
 0x227   : > { %vm4801_vm1 = vcmp.ge.f32.partialorder %v4769_v4, 0.0  ;;  %v4833_v50 = vmul.f32 0.1, %v4769_v4  ;;  %v4770_v54 = vadd.f32 %v6043_v43, %v8341_v2 }
 0x228   : > { %v4867_v18 = vsel %vm4803_vm0, %v4771_v9, %v4835_v16  ;;  %vm4804_vm2 = vcmp.ge.f32.partialorder %v4772_v58, 0.0  ;;  %v4836_v32 = vmul.f32 0.1, %v4772_v58 }
 0x229   : > { %4899 = vst [vmem:[%s8349_s19 + $0x50] sm:$0xff] %v4867_v18  ;;  %v4865_v11 = vsel %vm4801_vm1, %v4769_v4, %v4833_v50  ;;  %vm4802_vm3 = vcmp.ge.f32.partialorder %v4770_v54, 0.0  ;;  %v4834_v24 = vmul.f32 0.1, %v4770_v54  ;;  %v6012_v52 = vpop.f32.mrb[12].mxu0 }
 0x22a   : > { %4897 = vst [vmem:[%s8349_s19 + $0x40] sm:$0xff] %v4865_v11  ;;  %v4868_v5 = vsel %vm4804_vm2, %v4772_v58, %v4836_v32  ;;  %v6044_v39 = vadd.f32 %v6012_v52, %v8329_v55  ;;  %v4643_v0 = vpop.f32.mrb[13].mxu0 }
 0x22b   : > { %4900 = vst [vmem:[%s8349_s19 + $0x58] sm:$0xff] %v4868_v5  ;;  %v4866_v36 = vsel %vm4802_vm3, %v4770_v54, %v4834_v24  ;;  %v6045_v10 = vadd.f32 %v4643_v0, %v8331_v29  ;;  %v6013_v59 = vpop.f32.mrb[14].mxu0 }
 0x22c   : > { %4898 = vst [vmem:[%s8349_s19 + $0x48] sm:$0xff] %v4866_v36  ;;  %v4775_v38 = vadd.f32 %v6044_v39, %v8341_v2  ;;  %v6046_v37 = vadd.f32 %v6013_v59, %v8333_v19  ;;  %v4646_v26 = vpop.f32.mrb[15].mxu0 }
 0x22d   : > { %v4773_v35 = vadd.f32 %v6045_v10, %v8341_v2  ;;  %v6047_v34 = vadd.f32 %v4646_v26, %v8335_v41 }
 0x22e   : > { %vm4807_vm4 = vcmp.ge.f32.partialorder %v4775_v38, 0.0  ;;  %v4839_v55 = vmul.f32 0.1, %v4775_v38  ;;  %v4776_v6 = vadd.f32 %v6046_v37, %v8341_v2 }
 0x22f   : > { %vm4805_vm5 = vcmp.ge.f32.partialorder %v4773_v35, 0.0  ;;  %v4837_v29 = vmul.f32 0.1, %v4773_v35  ;;  %v4774_v49 = vadd.f32 %v6047_v34, %v8341_v2 }
 0x230   : > { %v4871_v23 = vsel %vm4807_vm4, %v4775_v38, %v4839_v55  ;;  %vm4808_vm6 = vcmp.ge.f32.partialorder %v4776_v6, 0.0  ;;  %v4840_v25 = vmul.f32 0.1, %v4776_v6 }
 0x231   : > { %4903 = vst [vmem:[%s8349_s19 + $0x70] sm:$0xff] %v4871_v23  ;;  %v4869_v19 = vsel %vm4805_vm5, %v4773_v35, %v4837_v29  ;;  %vm4806_vm7 = vcmp.ge.f32.partialorder %v4774_v49, 0.0  ;;  %v4838_v1 = vmul.f32 0.1, %v4774_v49  ;;  %v6016_v7 = vpop.f32.mrb[16].mxu0 }
 0x232   : > { %4901 = vst [vmem:[%s8349_s19 + $0x60] sm:$0xff] %v4869_v19  ;;  %v4872_v41 = vsel %vm4808_vm6, %v4776_v6, %v4840_v25  ;;  %v5880_v61 = vpop.f32.mrb[16].mxu1  ;;  %v4659_v22 = vpop.f32.mrb[17].mxu0 }
 0x233   : > { %4904 = vst [vmem:[%s8349_s19 + $0x78] sm:$0xff] %v4872_v41  ;;  %v4870_v44 = vsel %vm4806_vm7, %v4774_v49, %v4838_v1  ;;  %v6048_v3 = vadd.f32 %v6016_v7, %v5880_v61  ;;  %v2631_v51 = vpop.f32.mrb[17].mxu1  ;;  %v6017_v28 = vpop.f32.mrb[18].mxu0 }
 0x234   : > { %4902 = vst [vmem:[%s8349_s19 + $0x68] sm:$0xff] %v4870_v44  ;;  %v6049_v45 = vadd.f32 %v4659_v22, %v2631_v51  ;;  %v5881_v27 = vpop.f32.mrb[18].mxu1  ;;  %v4662_v53 = vpop.f32.mrb[19].mxu0 }
 0x235   : > { %v4779_v21 = vadd.f32 %v6048_v3, %v8341_v2  ;;  %v6050_v47 = vadd.f32 %v6017_v28, %v5881_v27  ;;  %v2634_v46 = vpop.f32.mrb[19].mxu1 }
 0x236   : > { %v4777_v15 = vadd.f32 %v6049_v45, %v8341_v2  ;;  %v6051_v60 = vadd.f32 %v4662_v53, %v2634_v46 }
 0x237   : > { %vm4811_vm8 = vcmp.ge.f32.partialorder %v4779_v21, 0.0  ;;  %v4843_v20 = vmul.f32 0.1, %v4779_v21  ;;  %v4780_v42 = vadd.f32 %v6050_v47, %v8341_v2 }
 0x238   : > { %vm4809_vm9 = vcmp.ge.f32.partialorder %v4777_v15, 0.0  ;;  %v4841_v33 = vmul.f32 0.1, %v4777_v15  ;;  %v4778_v12 = vadd.f32 %v6051_v60, %v8341_v2 }
 0x239   : > { %v4875_v31 = vsel %vm4811_vm8, %v4779_v21, %v4843_v20  ;;  %vm4812_vm10 = vcmp.ge.f32.partialorder %v4780_v42, 0.0  ;;  %v4844_v57 = vmul.f32 0.1, %v4780_v42  ;;  %v6020_v8 = vpop.f32.mrb[20].mxu0 }
 0x23a   : > { %4907 = vst [vmem:[%s8349_s19 + $0x90] sm:$0xff] %v4875_v31  ;;  %v4873_v48 = vsel %vm4809_vm9, %v4777_v15, %v4841_v33  ;;  %vm4810_vm11 = vcmp.ge.f32.partialorder %v4778_v12, 0.0  ;;  %v4842_v62 = vmul.f32 0.1, %v4778_v12  ;;  %v5884_v56 = vpop.f32.mrb[20].mxu1  ;;  %v4675_v40 = vpop.f32.mrb[21].mxu0 }
 0x23b   : > { %4905 = vst [vmem:[%s8349_s19 + $0x80] sm:$0xff] %v4873_v48  ;;  %v4876_v13 = vsel %vm4812_vm10, %v4780_v42, %v4844_v57  ;;  %v6052_v17 = vadd.f32 %v6020_v8, %v5884_v56  ;;  %v2647_v30 = vpop.f32.mrb[21].mxu1  ;;  %v6021_v9 = vpop.f32.mrb[22].mxu0 }
 0x23c   : > { %4908 = vst [vmem:[%s8349_s19 + $0x98] sm:$0xff] %v4876_v13  ;;  %v4874_v14 = vsel %vm4810_vm11, %v4778_v12, %v4842_v62  ;;  %v6053_v63 = vadd.f32 %v4675_v40, %v2647_v30  ;;  %v5885_v4 = vpop.f32.mrb[22].mxu1  ;;  %v4678_v43 = vpop.f32.mrb[23].mxu0 }
 0x23d   : > { %4906 = vst [vmem:[%s8349_s19 + $0x88] sm:$0xff] %v4874_v14  ;;  %v4783_v16 = vadd.f32 %v6052_v17, %v8341_v2  ;;  %v6054_v58 = vadd.f32 %v6021_v9, %v5885_v4  ;;  %v2650_v50 = vpop.f32.mrb[23].mxu1 }
 0x23e   : > { %v4781_v54 = vadd.f32 %v6053_v63, %v8341_v2  ;;  %v6055_v18 = vadd.f32 %v4678_v43, %v2650_v50 }
 0x23f   : > { %vm4815_vm12 = vcmp.ge.f32.partialorder %v4783_v16, 0.0  ;;  %v4847_v32 = vmul.f32 0.1, %v4783_v16  ;;  %v4784_v11 = vadd.f32 %v6054_v58, %v8341_v2 }
 0x240   : > { %vm4813_vm13 = vcmp.ge.f32.partialorder %v4781_v54, 0.0  ;;  %v4845_v24 = vmul.f32 0.1, %v4781_v54  ;;  %v4782_v52 = vadd.f32 %v6055_v18, %v8341_v2 }
 0x241   : > { %v4879_v5 = vsel %vm4815_vm12, %v4783_v16, %v4847_v32  ;;  %vm4816_vm14 = vcmp.ge.f32.partialorder %v4784_v11, 0.0  ;;  %v4848_v39 = vmul.f32 0.1, %v4784_v11  ;;  %v6024_v0 = vpop.f32.mrb[24].mxu0 }
 0x242   : > { %4911 = vst [vmem:[%s8349_s19 + $0xb0] sm:$0xff] %v4879_v5  ;;  %v4877_v36 = vsel %vm4813_vm13, %v4781_v54, %v4845_v24  ;;  %vm4814_vm15 = vcmp.ge.f32.partialorder %v4782_v52, 0.0  ;;  %v4846_v10 = vmul.f32 0.1, %v4782_v52  ;;  %v5888_v59 = vpop.f32.mrb[24].mxu1  ;;  %v4691_v38 = vpop.f32.mrb[25].mxu0 }
 0x243   : > { %4909 = vst [vmem:[%s8349_s19 + $0xa0] sm:$0xff] %v4877_v36  ;;  %v4880_v37 = vsel %vm4816_vm14, %v4784_v11, %v4848_v39  ;;  %v6056_v26 = vadd.f32 %v6024_v0, %v5888_v59  ;;  %v2663_v35 = vpop.f32.mrb[25].mxu1  ;;  %v6025_v34 = vpop.f32.mrb[26].mxu0 }
 0x244   : > { %4912 = vst [vmem:[%s8349_s19 + $0xb8] sm:$0xff] %v4880_v37  ;;  %v4878_v55 = vsel %vm4814_vm15, %v4782_v52, %v4846_v10  ;;  %v6057_v6 = vadd.f32 %v4691_v38, %v2663_v35  ;;  %v5889_v29 = vpop.f32.mrb[26].mxu1  ;;  %v4694_v49 = vpop.f32.mrb[27].mxu0 }
 0x245   : > { %4910 = vst [vmem:[%s8349_s19 + $0xa8] sm:$0xff] %v4878_v55  ;;  %v4787_v23 = vadd.f32 %v6056_v26, %v8341_v2  ;;  %v6058_v25 = vadd.f32 %v6025_v34, %v5889_v29  ;;  %v2666_v19 = vpop.f32.mrb[27].mxu1 }
 0x246   : > { %v4785_v1 = vadd.f32 %v6057_v6, %v8341_v2  ;;  %v6059_v7 = vadd.f32 %v4694_v49, %v2666_v19 }
 0x247   : > { %vm4819_vm0 = vcmp.ge.f32.partialorder %v4787_v23, 0.0  ;;  %v4851_v41 = vmul.f32 0.1, %v4787_v23  ;;  %v4788_v61 = vadd.f32 %v6058_v25, %v8341_v2 }
 0x248   : > { %vm4817_vm1 = vcmp.ge.f32.partialorder %v4785_v1, 0.0  ;;  %v4849_v22 = vmul.f32 0.1, %v4785_v1  ;;  %v4786_v44 = vadd.f32 %v6059_v7, %v8341_v2 }
 0x249   : > { %v4883_v3 = vsel %vm4819_vm0, %v4787_v23, %v4851_v41  ;;  %vm4820_vm2 = vcmp.ge.f32.partialorder %v4788_v61, 0.0  ;;  %v4852_v51 = vmul.f32 0.1, %v4788_v61  ;;  %v6028_v28 = vpop.f32.mrb[28].mxu0 }
 0x24a   : > { %4915 = vst [vmem:[%s8349_s19 + $0xd0] sm:$0xff] %v4883_v3  ;;  %v4881_v45 = vsel %vm4817_vm1, %v4785_v1, %v4849_v22  ;;  %vm4818_vm3 = vcmp.ge.f32.partialorder %v4786_v44, 0.0  ;;  %v4850_v27 = vmul.f32 0.1, %v4786_v44  ;;  %v5892_v53 = vpop.f32.mrb[28].mxu1  ;;  %v4707_v21 = vpop.f32.mrb[29].mxu0 }
 0x24b   : > { %4913 = vst [vmem:[%s8349_s19 + $0xc0] sm:$0xff] %v4881_v45  ;;  %v4884_v47 = vsel %vm4820_vm2, %v4788_v61, %v4852_v51  ;;  %v6060_v46 = vadd.f32 %v6028_v28, %v5892_v53  ;;  %v2679_v15 = vpop.f32.mrb[29].mxu1  ;;  %v6029_v60 = vpop.f32.mrb[30].mxu0 }
 0x24c   : > { %4916 = vst [vmem:[%s8349_s19 + $0xd8] sm:$0xff] %v4884_v47  ;;  %v4882_v20 = vsel %vm4818_vm3, %v4786_v44, %v4850_v27  ;;  %v6061_v42 = vadd.f32 %v4707_v21, %v2679_v15  ;;  %v5893_v33 = vpop.f32.mrb[30].mxu1  ;;  %v4710_v12 = vpop.f32.mrb[31].mxu0 }
 0x24d   : > { %4914 = vst [vmem:[%s8349_s19 + $0xc8] sm:$0xff] %v4882_v20  ;;  %v4791_v31 = vadd.f32 %v6060_v46, %v8341_v2  ;;  %v6062_v57 = vadd.f32 %v6029_v60, %v5893_v33  ;;  %v2682_v8 = vpop.f32.mrb[31].mxu1 }
 0x24e   : > { %v4789_v48 = vadd.f32 %v6061_v42, %v8341_v2  ;;  %v6063_v62 = vadd.f32 %v4710_v12, %v2682_v8 }
 0x24f   : > { %vm4823_vm4 = vcmp.ge.f32.partialorder %v4791_v31, 0.0  ;;  %v4855_v56 = vmul.f32 0.1, %v4791_v31  ;;  %v4792_v40 = vadd.f32 %v6062_v57, %v8341_v2 }
 0x250   : > { %vm4821_vm5 = vcmp.ge.f32.partialorder %v4789_v48, 0.0  ;;  %v4853_v13 = vmul.f32 0.1, %v4789_v48  ;;  %v4790_v17 = vadd.f32 %v6063_v62, %v8341_v2 }
 0x251   : > { %v4887_v30 = vsel %vm4823_vm4, %v4791_v31, %v4855_v56  ;;  %vm4824_vm6 = vcmp.ge.f32.partialorder %v4792_v40, 0.0  ;;  %v4856_v9 = vmul.f32 0.1, %v4792_v40 }
 0x252   : > { %4919 = vst [vmem:[%s8349_s19 + $0xf0] sm:$0xff] %v4887_v30  ;;  %v4885_v14 = vsel %vm4821_vm5, %v4789_v48, %v4853_v13  ;;  %vm4822_vm7 = vcmp.ge.f32.partialorder %v4790_v17, 0.0  ;;  %v4854_v63 = vmul.f32 0.1, %v4790_v17 }
 0x253   : > { %4917 = vst [vmem:[%s8349_s19 + $0xe0] sm:$0xff] %v4885_v14  ;;  %v4888_v2 = vsel %vm4824_vm6, %v4792_v40, %v4856_v9 }
 0x254   : > { %4920 = vst [vmem:[%s8349_s19 + $0xf8] sm:$0xff] %v4888_v2  ;;  %v4886_v4 = vsel %vm4822_vm7, %v4790_v17, %v4854_v63 }
 0x255   : > { %4918 = vst [vmem:[%s8349_s19 + $0xe8] sm:$0xff] %v4886_v4 }
 0x256   : > { %6474 = shalt.err (!%p6471_p5)
}
 0x257   : > { %s6475_s6 = scalar_lea.hbm %s8421_s15, 4096  ;;  %s6479_s9 = scalar_lea.hbm %s8479_s3, 8192 }
 0x258   : > { %p6476_p6 = scmp.ne.s32.totalorder %s8421_s15, %s6475_s6  ;;  %p6480_p10 = scmp.lt.u32.totalorder %s8421_s15, %s8479_s3 }
 0x259   : > { %p6481_p11 = scmp.lt.u32.totalorder %s6479_s9, %s6475_s6  ;;  %p6483_p13 = scmp.lt.u32.totalorder %s6475_s6, %s8421_s15 }
 0x25a   : > { %p6477_p7 = pnand %p6476_p6, %p6604_p4 }
 0x25b   : > { %p6482_p12 = por %p6481_p11, %p6480_p10 }
 0x25c   : > { %p6478_p9 = pneg %p6477_p7 }
 0x25d   : > { %p6484_p0 = por %p6483_p13, %p6482_p12 }
 0x25f   : > { %p6485_p1 = pnand %p6484_p0, %p6478_p9 }
 0x261   : > { %6488 = shalt.err (!%p6485_p1)
}
 0x262   : > { %s6542_s18 = smov 128   ;;  %s6543_s19 = smov 8  }
 0x263   : > { %6299 = dma.vmem_to_hbm [thread:$0]  (%p6604_p4), %s8423_s23, 4096, %s8421_s15, %s8430_s28, %s6542_s18, %s6542_s18, %s6543_s19  }
 0x264 PF: > { %p6305_p2 = scmp.ge.s32.totalorder %s6539_s17, 2  ;;  %s4953_s21 = sand.u32 1, %s6519_s12  }
 0x265   : > { %s4954_s26 = scalar_lea.sflag [#allocation3], %s4953_s21 }
 0x266   : > { %p6302_p3 = pnand %p6305_p2, %p6611_p8 }
 0x268   : > { %6514 = dma.done.wait (!%p6302_p3), %s4954_s26, 4096  }
 0x269   : > { %6516 = vsyncadd (!%p6302_p3), %s4954_s26, 4294963200  ;;  %s16_s17 = sadd.s32 1, %s6539_s17   ;;  %s8549_s12 = smov %s6523_s13 }
 0x26a   : > { %p13_p5 = scmp.ge.s32.totalorder %s16_s17, 4   ;;  %s8550_s13 = smov %s6527_s14 }
 0x26b   : > { %s8551_s14 = smov %s6617_s25  ;;  %s8552_s15 = smov %s6535_s16 }
 0x26c   : > { %s8553_s16 = smov %s8555_s20  ;;  %15 = sbr.rel (!%p13_p5) target bundleno = 4 (0x4), region = 78 }
 0x273   :  { %4959 = vsyncpa [#allocation3], 1 }
 0x274   :  { %4961 = vsyncpa [#allocation3 + $0x1], 1 }

</bundles_post_ra>
